<compile_context>
chip_gen: v6e
topology: v6e:2x2x1
jax: 0.10.0
libtpu: 0.0.40
codegen_flags: <defaults>
</compile_context>

<pallas_src>
import math
from functools import partial

import jax
import jax.numpy as jnp
from jax.experimental import pallas as pl
from jax.experimental.pallas import tpu as pltpu

LN_EPS = 1e-5  # PyTorch nn.LayerNorm default


def _layer_norm(z):
    mu = jnp.mean(z, axis=-1, keepdims=True)
    var = jnp.mean((z - mu) ** 2, axis=-1, keepdims=True)
    return (z - mu) * jax.lax.rsqrt(var + LN_EPS)


def _gelu_tanh(x):
    # exact tanh-approx GELU from the PyTorch module
    return 0.5 * x * (1.0 + jnp.tanh(math.sqrt(2.0 / math.pi)
                                     * (x + 0.044715 * x * x * x)))


# --------------------------------------------------------------------------
# Fused ViT forward kernel
# --------------------------------------------------------------------------
def vit_kernel(patches_ref, w_pe_ref, b_pe_ref, cls_ref, pos_ref,
               wqkv_ref, wfc_ref, w1_ref, b1_ref, w2_ref, b2_ref,
               ln_g_ref, ln_b_ref, w_fc_ref, b_fc_ref,
               o_ref, x_ref,
               *, n_layers, n_heads, head_dim, B, N, S, S_pad, D, A):
    f32 = jnp.float32
    scale = 1.0 / math.sqrt(head_dim)

    # ---- patch embedding + cls token + positional embedding ----
    # patches_ref: (B*N, PD), w_pe: (PD, D)
    emb = jnp.dot(patches_ref[...], w_pe_ref[...],
                  preferred_element_type=f32) + b_pe_ref[...]        # (B*N, D)
    pos = pos_ref[...]                                               # (S, D)
    cls_row = cls_ref[...] + pos[0:1, :]                             # (1, D)

    # activation buffer (B*S_pad, D); padded rows stay zero initially
    x_ref[...] = jnp.zeros_like(x_ref)
    for b in range(B):
        base = b * S_pad
        x_ref[pl.ds(base, 1), :] = cls_row
        x_ref[pl.ds(base + 1, N), :] = emb[b * N:(b + 1) * N, :] + pos[1:S, :]

    # key-padding bias: padded key columns get -1e30 before the softmax
    col = jax.lax.broadcasted_iota(jnp.int32, (1, S_pad), 1)
    key_bias = jnp.where(col < S, 0.0, -1e30).astype(f32)            # (1, S_pad)

    # ---- transformer layers (static unroll, weights resident in VMEM) ----
    for l in range(n_layers):
        wqkv = wqkv_ref[l]            # (D, 3A)
        wfc = wfc_ref[l]              # (A, D)
        w1 = w1_ref[l]                # (D, M)
        b1 = b1_ref[l]                # (1, M)
        w2 = w2_ref[l]                # (M, D)
        b2 = b2_ref[l]                # (1, D)

        # -- attention sub-block (pre-LN, no affine); batch flattened into M --
        xf = x_ref[...]                                              # (B*S_pad, D)
        xn = _layer_norm(xf)
        qkv = jnp.dot(xn, wqkv, preferred_element_type=f32)          # (B*S_pad, 3A)

        for b in range(B):
            base = b * S_pad
            qkv_b = qkv[base:base + S_pad, :]                        # (S_pad, 3A)
            attn_out = jnp.zeros((S_pad, D), f32)
            for h in range(n_heads):
                lo = h * head_dim
                q = qkv_b[:, lo:lo + head_dim]
                k = qkv_b[:, A + lo:A + lo + head_dim]
                v = qkv_b[:, 2 * A + lo:2 * A + lo + head_dim]
                s = jnp.dot(q, k.T, preferred_element_type=f32) * scale
                s = s + key_bias
                s = s - jnp.max(s, axis=-1, keepdims=True)
                e = jnp.exp(s)
                p = e / jnp.sum(e, axis=-1, keepdims=True)           # (S_pad, S_pad)
                pv = jnp.dot(p, v, preferred_element_type=f32)       # (S_pad, hd)
                # fold head output straight through its slice of the output
                # projection (no concatenate of head outputs)
                attn_out = attn_out + jnp.dot(pv, wfc[lo:lo + head_dim, :],
                                              preferred_element_type=f32)
            x_ref[pl.ds(base, S_pad), :] = xf[base:base + S_pad, :] + attn_out

        # -- MLP sub-block (pre-LN, no affine) --
        xf = x_ref[...]
        xn = _layer_norm(xf)
        h1 = jnp.dot(xn, w1, preferred_element_type=f32) + b1
        g = _gelu_tanh(h1)
        h2 = jnp.dot(g, w2, preferred_element_type=f32) + b2
        x_ref[...] = xf + h2

    # ---- head: affine LayerNorm + classifier, keep only the cls rows ----
    xf = x_ref[...]
    xn = _layer_norm(xf) * ln_g_ref[...] + ln_b_ref[...]
    logits_all = jnp.dot(xn, w_fc_ref[...],
                         preferred_element_type=f32) + b_fc_ref[...]  # (B*S_pad, C)
    for b in range(B):
        o_ref[pl.ds(b, 1), :] = logits_all[b * S_pad:b * S_pad + 1, :]


# --------------------------------------------------------------------------
# Wrapper / glue
# --------------------------------------------------------------------------
def extract_patches(img, image_size, patch_size, num_patches, patch_dim):
    B = img.shape[0]
    hw = image_size // patch_size
    x = img.reshape(B, 3, hw, patch_size, hw, patch_size)
    x = x.transpose(0, 2, 4, 1, 3, 5)
    return x.reshape(B * num_patches, patch_dim)       # flattened for the kernel


def vit_forward(img, params, cfg):
    B = img.shape[0]
    N, PD = cfg["num_patches"], cfg["patch_dim"]
    D, A, C = cfg["embed_dim"], cfg["attn_dim"], cfg["num_classes"]
    S = N + 1
    S_pad = ((S + 7) // 8) * 8                          # pad seq to sublane multiple

    patches = extract_patches(img, cfg["image_size"], cfg["patch_size"], N, PD)

    kern = partial(vit_kernel,
                   n_layers=cfg["n_layers"], n_heads=cfg["heads"],
                   head_dim=cfg["head_dim"], B=B, N=N, S=S, S_pad=S_pad, D=D, A=A)
    vmem = pltpu.MemorySpace.VMEM
    return pl.pallas_call(
        kern,
        out_shape=jax.ShapeDtypeStruct((B, C), jnp.float32),
        in_specs=[pl.BlockSpec(memory_space=vmem)] * 15,
        out_specs=pl.BlockSpec(memory_space=vmem),
        scratch_shapes=[pltpu.VMEM((B * S_pad, D), jnp.float32)],
    )(patches, params["w_pe"], params["b_pe"], params["cls"], params["pos"],
      params["wqkv"], params["wfc"], params["w1"], params["b1"],
      params["w2"], params["b2"],
      params["ln_g"], params["ln_b"], params["w_fc"], params["b_fc"])


# Pure-JAX reference (same math), used only for the correctness check.
def vit_ref(img, params, cfg):
    B = img.shape[0]
    D, A, nh, hd = cfg["embed_dim"], cfg["attn_dim"], cfg["heads"], cfg["head_dim"]
    N, PD = cfg["num_patches"], cfg["patch_dim"]
    x = extract_patches(img, cfg["image_size"], cfg["patch_size"], N, PD)
    x = x.reshape(B, N, PD)
    x = x @ params["w_pe"] + params["b_pe"]
    cls = jnp.broadcast_to(params["cls"][None], (B, 1, D))
    x = jnp.concatenate([cls, x], axis=1) + params["pos"][None]

    def ln(z):
        mu = z.mean(-1, keepdims=True)
        var = ((z - mu) ** 2).mean(-1, keepdims=True)
        return (z - mu) / jnp.sqrt(var + LN_EPS)

    S = x.shape[1]
    for l in range(cfg["n_layers"]):
        res = x
        xn = ln(x)
        qkv = xn @ params["wqkv"][l]
        q, k, v = qkv[..., :A], qkv[..., A:2 * A], qkv[..., 2 * A:]
        q = q.reshape(B, S, nh, hd)
        k = k.reshape(B, S, nh, hd)
        v = v.reshape(B, S, nh, hd)
        attn = jnp.einsum("bqnc,bknc->bnqk", q, k) / math.sqrt(hd)
        attn = jax.nn.softmax(attn, axis=-1)
        av = jnp.einsum("bnqk,bknc->bqnc", attn, v).reshape(B, S, A)
        x = res + av @ params["wfc"][l]
        res = x
        xn = ln(x)
        h1 = xn @ params["w1"][l] + params["b1"][l]
        g = 0.5 * h1 * (1.0 + jnp.tanh(math.sqrt(2.0 / math.pi)
                                       * (h1 + 0.044715 * h1 ** 3)))
        x = res + (g @ params["w2"][l] + params["b2"][l])

    xc = ln(x[:, 0]) * params["ln_g"] + params["ln_b"]
    return xc @ params["w_fc"] + params["b_fc"]


def init_params(key, cfg):
    D, A, M = cfg["embed_dim"], cfg["attn_dim"], cfg["mlp_dim"]
    PD, N, C, L = cfg["patch_dim"], cfg["num_patches"], cfg["num_classes"], cfg["n_layers"]
    ki = iter(jax.random.split(key, 16))

    def nrm(shape, scale=0.02):
        return (scale * jax.random.normal(next(ki), shape)).astype(jnp.float32)

    return {
        "w_pe": nrm((PD, D)),
        "b_pe": nrm((1, D)),
        "cls": jax.random.normal(next(ki), (1, D)).astype(jnp.float32),
        "pos": jax.random.normal(next(ki), (N + 1, D)).astype(jnp.float32),
        "ln_g": jnp.ones((1, D), jnp.float32),
        "ln_b": jnp.zeros((1, D), jnp.float32),
        # NOTE: the PyTorch module zero-inits the classifier; small random values
        # are used here purely so the end-to-end numerical check is meaningful.
        "w_fc": nrm((D, C)),
        "b_fc": nrm((1, C)),
        # per-layer weights stacked along a leading L axis (kept resident in VMEM)
        "wqkv": nrm((L, D, 3 * A)),
        "wfc": nrm((L, A, D)),
        "w1": nrm((L, D, M)),
        "b1": nrm((L, 1, M)),
        "w2": nrm((L, M, D)),
        "b2": nrm((L, 1, D)),
    }


if __name__ == "__main__":
    cfg = dict(image_size=16, patch_size=4, num_classes=10, embed_dim=32,
               n_layers=2, heads=4, attn_dim=32, channels=3)
    cfg["head_dim"] = cfg["attn_dim"] // cfg["heads"]
    cfg["mlp_dim"] = cfg["embed_dim"] * 4
    cfg["num_patches"] = (cfg["image_size"] // cfg["patch_size"]) ** 2
    cfg["patch_dim"] = cfg["channels"] * cfg["patch_size"] ** 2

    key = jax.random.PRNGKey(0)
    k_img, k_param = jax.random.split(key)
    img = jax.random.normal(k_img, (2, 3, cfg["image_size"], cfg["image_size"]),
                            dtype=jnp.float32)
    params = init_params(k_param, cfg)

    out = jax.block_until_ready(vit_forward(img, params, cfg))
    ref = jax.block_until_ready(vit_ref(img, params, cfg))

    assert out.shape == (2, cfg["num_classes"]), out.shape
    assert bool(jnp.all(jnp.isfinite(out)))
    assert bool(jnp.allclose(out, ref, atol=1e-4, rtol=1e-4)), (out, ref)
    print("KERNEL_OK")
</pallas_src>

<mosaic_0001>
module attributes {stable_mosaic.version = 11 : i64} {
  func.func @vit_kernel(%arg0: memref<32x48xf32, #tpu.memory_space<vmem>>, %arg1: memref<48x32xf32, #tpu.memory_space<vmem>>, %arg2: memref<1x32xf32, #tpu.memory_space<vmem>>, %arg3: memref<1x32xf32, #tpu.memory_space<vmem>>, %arg4: memref<17x32xf32, #tpu.memory_space<vmem>>, %arg5: memref<2x32x96xf32, #tpu.memory_space<vmem>>, %arg6: memref<2x32x32xf32, #tpu.memory_space<vmem>>, %arg7: memref<2x32x128xf32, #tpu.memory_space<vmem>>, %arg8: memref<2x1x128xf32, #tpu.memory_space<vmem>>, %arg9: memref<2x128x32xf32, #tpu.memory_space<vmem>>, %arg10: memref<2x1x32xf32, #tpu.memory_space<vmem>>, %arg11: memref<1x32xf32, #tpu.memory_space<vmem>>, %arg12: memref<1x32xf32, #tpu.memory_space<vmem>>, %arg13: memref<32x10xf32, #tpu.memory_space<vmem>>, %arg14: memref<1x10xf32, #tpu.memory_space<vmem>>, %arg15: memref<2x10xf32, #tpu.memory_space<vmem>>, %arg16: memref<48x32xf32, #tpu.memory_space<vmem>>) attributes {dimension_semantics = [], scalar_prefetch = 0 : i64, scratch_operands = 1 : i64, tpu.core_type = #tpu.core_type<tc>} {
    %c0 = arith.constant 0 : index
    %c0_0 = arith.constant 0 : index
    %0 = vector.load %arg0[%c0, %c0_0] : memref<32x48xf32, #tpu.memory_space<vmem>>, vector<32x48xf32>
    %c0_1 = arith.constant 0 : index
    %c0_2 = arith.constant 0 : index
    %1 = vector.load %arg1[%c0_1, %c0_2] : memref<48x32xf32, #tpu.memory_space<vmem>>, vector<48x32xf32>
    %cst = arith.constant dense<0.000000e+00> : vector<32x32xf32>
    %2 = tpu.matmul %0, %1, %cst {dimension_numbers = #tpu.dot_dimension_numbers<[1], [0], [0], [1], [0, 0, 1, 1], [], []>} : vector<32x48xf32>, vector<48x32xf32>, vector<32x32xf32> -> vector<32x32xf32>
    %c0_3 = arith.constant 0 : index
    %c0_4 = arith.constant 0 : index
    %3 = vector.load %arg2[%c0_3, %c0_4] : memref<1x32xf32, #tpu.memory_space<vmem>>, vector<1x32xf32>
    %4 = vector.broadcast %3 : vector<1x32xf32> to vector<32x32xf32>
    %5 = arith.addf %2, %4 : vector<32x32xf32>
    %c0_5 = arith.constant 0 : index
    %c0_6 = arith.constant 0 : index
    %6 = vector.load %arg4[%c0_5, %c0_6] : memref<17x32xf32, #tpu.memory_space<vmem>>, vector<17x32xf32>
    %c0_7 = arith.constant 0 : index
    %c0_8 = arith.constant 0 : index
    %7 = vector.load %arg3[%c0_7, %c0_8] : memref<1x32xf32, #tpu.memory_space<vmem>>, vector<1x32xf32>
    %8 = vector.extract_strided_slice %6 {offsets = [0, 0], sizes = [1, 32], strides = [1, 1]} : vector<17x32xf32> to vector<1x32xf32>
    %9 = arith.addf %7, %8 : vector<1x32xf32>
    %cst_9 = arith.constant 0.000000e+00 : f32
    %10 = vector.broadcast %cst_9 : f32 to vector<48x32xf32>
    %c0_10 = arith.constant 0 : index
    %c0_11 = arith.constant 0 : index
    %11 = vector.load %arg16[%c0_10, %c0_11] : memref<48x32xf32, #tpu.memory_space<vmem>>, vector<48x32xf32>
    tpu.vector_store %arg16[%c0_10, %c0_11], %10 {strides = array<i32>} : memref<48x32xf32, #tpu.memory_space<vmem>>, vector<48x32xf32>,
    %c0_12 = arith.constant 0 : index
    %c0_13 = arith.constant 0 : index
    %12 = vector.load %arg16[%c0_12, %c0_13] : memref<48x32xf32, #tpu.memory_space<vmem>>, vector<1x32xf32>
    tpu.vector_store %arg16[%c0_12, %c0_13], %9 {strides = array<i32>} : memref<48x32xf32, #tpu.memory_space<vmem>>, vector<1x32xf32>,
    %13 = vector.extract_strided_slice %5 {offsets = [0, 0], sizes = [16, 32], strides = [1, 1]} : vector<32x32xf32> to vector<16x32xf32>
    %14 = vector.extract_strided_slice %6 {offsets = [1, 0], sizes = [16, 32], strides = [1, 1]} : vector<17x32xf32> to vector<16x32xf32>
    %15 = arith.addf %13, %14 : vector<16x32xf32>
    %c1 = arith.constant 1 : index
    %c0_14 = arith.constant 0 : index
    %16 = vector.load %arg16[%c1, %c0_14] : memref<48x32xf32, #tpu.memory_space<vmem>>, vector<16x32xf32>
    tpu.vector_store %arg16[%c1, %c0_14], %15 {strides = array<i32>} : memref<48x32xf32, #tpu.memory_space<vmem>>, vector<16x32xf32>,
    %c24 = arith.constant 24 : index
    %c0_15 = arith.constant 0 : index
    %17 = vector.load %arg16[%c24, %c0_15] : memref<48x32xf32, #tpu.memory_space<vmem>>, vector<1x32xf32>
    tpu.vector_store %arg16[%c24, %c0_15], %9 {strides = array<i32>} : memref<48x32xf32, #tpu.memory_space<vmem>>, vector<1x32xf32>,
    %18 = vector.extract_strided_slice %5 {offsets = [16, 0], sizes = [16, 32], strides = [1, 1]} : vector<32x32xf32> to vector<16x32xf32>
    %19 = vector.extract_strided_slice %6 {offsets = [1, 0], sizes = [16, 32], strides = [1, 1]} : vector<17x32xf32> to vector<16x32xf32>
    %20 = arith.addf %18, %19 : vector<16x32xf32>
    %c25 = arith.constant 25 : index
    %c0_16 = arith.constant 0 : index
    %21 = vector.load %arg16[%c25, %c0_16] : memref<48x32xf32, #tpu.memory_space<vmem>>, vector<16x32xf32>
    tpu.vector_store %arg16[%c25, %c0_16], %20 {strides = array<i32>} : memref<48x32xf32, #tpu.memory_space<vmem>>, vector<16x32xf32>,
    %22 = tpu.iota {dimensions = array<i32: 1>} : vector<1x24xi32>
    %c17_i32 = arith.constant 17 : i32
    %23 = vector.broadcast %c17_i32 : i32 to vector<1x24xi32>
    %24 = arith.cmpi slt, %22, %23 : vector<1x24xi32>
    %cst_17 = arith.constant 0.000000e+00 : f32
    %cst_18 = arith.constant -1.000000e+30 : f32
    %25 = vector.broadcast %cst_17 : f32 to vector<1x24xf32>
    %26 = vector.broadcast %cst_18 : f32 to vector<1x24xf32>
    %27 = arith.select %24, %25, %26 : vector<1x24xi1>, vector<1x24xf32>
    %c0_19 = arith.constant 0 : index
    %c0_20 = arith.constant 0 : index
    %c0_21 = arith.constant 0 : index
    %28 = vector.load %arg5[%c0_19, %c0_20, %c0_21] : memref<2x32x96xf32, #tpu.memory_space<vmem>>, vector<1x32x96xf32>
    %29 = vector.shape_cast %28 : vector<1x32x96xf32> to vector<32x96xf32>
    %c0_22 = arith.constant 0 : index
    %c0_23 = arith.constant 0 : index
    %c0_24 = arith.constant 0 : index
    %30 = vector.load %arg6[%c0_22, %c0_23, %c0_24] : memref<2x32x32xf32, #tpu.memory_space<vmem>>, vector<1x32x32xf32>
    %31 = vector.shape_cast %30 : vector<1x32x32xf32> to vector<32x32xf32>
    %c0_25 = arith.constant 0 : index
    %c0_26 = arith.constant 0 : index
    %c0_27 = arith.constant 0 : index
    %32 = vector.load %arg7[%c0_25, %c0_26, %c0_27] : memref<2x32x128xf32, #tpu.memory_space<vmem>>, vector<1x32x128xf32>
    %33 = vector.shape_cast %32 : vector<1x32x128xf32> to vector<32x128xf32>
    %c0_28 = arith.constant 0 : index
    %c0_29 = arith.constant 0 : index
    %c0_30 = arith.constant 0 : index
    %34 = vector.load %arg8[%c0_28, %c0_29, %c0_30] : memref<2x1x128xf32, #tpu.memory_space<vmem>>, vector<1x1x128xf32>
    %35 = vector.shape_cast %34 : vector<1x1x128xf32> to vector<1x128xf32>
    %c0_31 = arith.constant 0 : index
    %c0_32 = arith.constant 0 : index
    %c0_33 = arith.constant 0 : index
    %36 = vector.load %arg9[%c0_31, %c0_32, %c0_33] : memref<2x128x32xf32, #tpu.memory_space<vmem>>, vector<1x128x32xf32>
    %37 = vector.shape_cast %36 : vector<1x128x32xf32> to vector<128x32xf32>
    %c0_34 = arith.constant 0 : index
    %c0_35 = arith.constant 0 : index
    %c0_36 = arith.constant 0 : index
    %38 = vector.load %arg10[%c0_34, %c0_35, %c0_36] : memref<2x1x32xf32, #tpu.memory_space<vmem>>, vector<1x1x32xf32>
    %39 = vector.shape_cast %38 : vector<1x1x32xf32> to vector<1x32xf32>
    %c0_37 = arith.constant 0 : index
    %c0_38 = arith.constant 0 : index
    %40 = vector.load %arg16[%c0_37, %c0_38] : memref<48x32xf32, #tpu.memory_space<vmem>>, vector<48x32xf32>
    %cst_39 = arith.constant dense<0.000000e+00> : vector<48xf32>
    %41 = vector.multi_reduction <add>, %40, %cst_39 [1] : vector<48x32xf32> to vector<48xf32>
    %42 = vector.shape_cast %41 : vector<48xf32> to vector<48x1xf32>
    %cst_40 = arith.constant 3.200000e+01 : f32
    %43 = vector.broadcast %cst_40 : f32 to vector<48x1xf32>
    %44 = arith.divf %42, %43 : vector<48x1xf32>
    %45 = vector.broadcast %44 : vector<48x1xf32> to vector<48x32xf32>
    %46 = arith.subf %40, %45 : vector<48x32xf32>
    %47 = arith.mulf %46, %46 : vector<48x32xf32>
    %cst_41 = arith.constant dense<0.000000e+00> : vector<48xf32>
    %48 = vector.multi_reduction <add>, %47, %cst_41 [1] : vector<48x32xf32> to vector<48xf32>
    %49 = vector.shape_cast %48 : vector<48xf32> to vector<48x1xf32>
    %cst_42 = arith.constant 3.200000e+01 : f32
    %50 = vector.broadcast %cst_42 : f32 to vector<48x1xf32>
    %51 = arith.divf %49, %50 : vector<48x1xf32>
    %52 = vector.broadcast %44 : vector<48x1xf32> to vector<48x32xf32>
    %53 = arith.subf %40, %52 : vector<48x32xf32>
    %cst_43 = arith.constant 9.99999974E-6 : f32
    %54 = vector.broadcast %cst_43 : f32 to vector<48x1xf32>
    %55 = arith.addf %51, %54 : vector<48x1xf32>
    %56 = math.rsqrt %55 : vector<48x1xf32>
    %57 = vector.broadcast %56 : vector<48x1xf32> to vector<48x32xf32>
    %58 = arith.mulf %53, %57 : vector<48x32xf32>
    %cst_44 = arith.constant dense<0.000000e+00> : vector<48x96xf32>
    %59 = tpu.matmul %58, %29, %cst_44 {dimension_numbers = #tpu.dot_dimension_numbers<[1], [0], [0], [1], [0, 0, 1, 1], [], []>} : vector<48x32xf32>, vector<32x96xf32>, vector<48x96xf32> -> vector<48x96xf32>
    %60 = vector.extract_strided_slice %59 {offsets = [0, 0], sizes = [24, 96], strides = [1, 1]} : vector<48x96xf32> to vector<24x96xf32>
    %cst_45 = arith.constant 0.000000e+00 : f32
    %61 = vector.broadcast %cst_45 : f32 to vector<24x32xf32>
    %62 = vector.extract_strided_slice %60 {offsets = [0, 0], sizes = [24, 8], strides = [1, 1]} : vector<24x96xf32> to vector<24x8xf32>
    %63 = vector.extract_strided_slice %60 {offsets = [0, 32], sizes = [24, 8], strides = [1, 1]} : vector<24x96xf32> to vector<24x8xf32>
    %64 = vector.extract_strided_slice %60 {offsets = [0, 64], sizes = [24, 8], strides = [1, 1]} : vector<24x96xf32> to vector<24x8xf32>
    %65 = tpu.transpose %63, [1, 0] : vector<24x8xf32> -> vector<8x24xf32>
    %cst_46 = arith.constant dense<0.000000e+00> : vector<24x24xf32>
    %66 = tpu.matmul %62, %65, %cst_46 {dimension_numbers = #tpu.dot_dimension_numbers<[1], [0], [0], [1], [0, 0, 1, 1], [], []>} : vector<24x8xf32>, vector<8x24xf32>, vector<24x24xf32> -> vector<24x24xf32>
    %cst_47 = arith.constant 0.353553385 : f32
    %67 = vector.broadcast %cst_47 : f32 to vector<24x24xf32>
    %68 = arith.mulf %66, %67 : vector<24x24xf32>
    %69 = vector.broadcast %27 : vector<1x24xf32> to vector<24x24xf32>
    %70 = arith.addf %68, %69 : vector<24x24xf32>
    %cst_48 = arith.constant dense<0xFF800000> : vector<24xf32>
    %71 = vector.multi_reduction <maximumf>, %70, %cst_48 [1] : vector<24x24xf32> to vector<24xf32>
    %72 = vector.shape_cast %71 : vector<24xf32> to vector<24x1xf32>
    %73 = vector.broadcast %72 : vector<24x1xf32> to vector<24x24xf32>
    %74 = arith.subf %70, %73 : vector<24x24xf32>
    %75 = math.exp %74 : vector<24x24xf32>
    %cst_49 = arith.constant dense<0.000000e+00> : vector<24xf32>
    %76 = vector.multi_reduction <add>, %75, %cst_49 [1] : vector<24x24xf32> to vector<24xf32>
    %77 = vector.shape_cast %76 : vector<24xf32> to vector<24x1xf32>
    %78 = vector.broadcast %77 : vector<24x1xf32> to vector<24x24xf32>
    %79 = arith.divf %75, %78 : vector<24x24xf32>
    %cst_50 = arith.constant dense<0.000000e+00> : vector<24x8xf32>
    %80 = tpu.matmul %79, %64, %cst_50 {dimension_numbers = #tpu.dot_dimension_numbers<[1], [0], [0], [1], [0, 0, 1, 1], [], []>} : vector<24x24xf32>, vector<24x8xf32>, vector<24x8xf32> -> vector<24x8xf32>
    %81 = vector.extract_strided_slice %31 {offsets = [0, 0], sizes = [8, 32], strides = [1, 1]} : vector<32x32xf32> to vector<8x32xf32>
    %cst_51 = arith.constant dense<0.000000e+00> : vector<24x32xf32>
    %82 = tpu.matmul %80, %81, %cst_51 {dimension_numbers = #tpu.dot_dimension_numbers<[1], [0], [0], [1], [0, 0, 1, 1], [], []>} : vector<24x8xf32>, vector<8x32xf32>, vector<24x32xf32> -> vector<24x32xf32>
    %83 = arith.addf %61, %82 : vector<24x32xf32>
    %84 = vector.extract_strided_slice %60 {offsets = [0, 8], sizes = [24, 8], strides = [1, 1]} : vector<24x96xf32> to vector<24x8xf32>
    %85 = vector.extract_strided_slice %60 {offsets = [0, 40], sizes = [24, 8], strides = [1, 1]} : vector<24x96xf32> to vector<24x8xf32>
    %86 = vector.extract_strided_slice %60 {offsets = [0, 72], sizes = [24, 8], strides = [1, 1]} : vector<24x96xf32> to vector<24x8xf32>
    %87 = tpu.transpose %85, [1, 0] : vector<24x8xf32> -> vector<8x24xf32>
    %cst_52 = arith.constant dense<0.000000e+00> : vector<24x24xf32>
    %88 = tpu.matmul %84, %87, %cst_52 {dimension_numbers = #tpu.dot_dimension_numbers<[1], [0], [0], [1], [0, 0, 1, 1], [], []>} : vector<24x8xf32>, vector<8x24xf32>, vector<24x24xf32> -> vector<24x24xf32>
    %cst_53 = arith.constant 0.353553385 : f32
    %89 = vector.broadcast %cst_53 : f32 to vector<24x24xf32>
    %90 = arith.mulf %88, %89 : vector<24x24xf32>
    %91 = vector.broadcast %27 : vector<1x24xf32> to vector<24x24xf32>
    %92 = arith.addf %90, %91 : vector<24x24xf32>
    %cst_54 = arith.constant dense<0xFF800000> : vector<24xf32>
    %93 = vector.multi_reduction <maximumf>, %92, %cst_54 [1] : vector<24x24xf32> to vector<24xf32>
    %94 = vector.shape_cast %93 : vector<24xf32> to vector<24x1xf32>
    %95 = vector.broadcast %94 : vector<24x1xf32> to vector<24x24xf32>
    %96 = arith.subf %92, %95 : vector<24x24xf32>
    %97 = math.exp %96 : vector<24x24xf32>
    %cst_55 = arith.constant dense<0.000000e+00> : vector<24xf32>
    %98 = vector.multi_reduction <add>, %97, %cst_55 [1] : vector<24x24xf32> to vector<24xf32>
    %99 = vector.shape_cast %98 : vector<24xf32> to vector<24x1xf32>
    %100 = vector.broadcast %99 : vector<24x1xf32> to vector<24x24xf32>
    %101 = arith.divf %97, %100 : vector<24x24xf32>
    %cst_56 = arith.constant dense<0.000000e+00> : vector<24x8xf32>
    %102 = tpu.matmul %101, %86, %cst_56 {dimension_numbers = #tpu.dot_dimension_numbers<[1], [0], [0], [1], [0, 0, 1, 1], [], []>} : vector<24x24xf32>, vector<24x8xf32>, vector<24x8xf32> -> vector<24x8xf32>
    %103 = vector.extract_strided_slice %31 {offsets = [8, 0], sizes = [8, 32], strides = [1, 1]} : vector<32x32xf32> to vector<8x32xf32>
    %cst_57 = arith.constant dense<0.000000e+00> : vector<24x32xf32>
    %104 = tpu.matmul %102, %103, %cst_57 {dimension_numbers = #tpu.dot_dimension_numbers<[1], [0], [0], [1], [0, 0, 1, 1], [], []>} : vector<24x8xf32>, vector<8x32xf32>, vector<24x32xf32> -> vector<24x32xf32>
    %105 = arith.addf %83, %104 : vector<24x32xf32>
    %106 = vector.extract_strided_slice %60 {offsets = [0, 16], sizes = [24, 8], strides = [1, 1]} : vector<24x96xf32> to vector<24x8xf32>
    %107 = vector.extract_strided_slice %60 {offsets = [0, 48], sizes = [24, 8], strides = [1, 1]} : vector<24x96xf32> to vector<24x8xf32>
    %108 = vector.extract_strided_slice %60 {offsets = [0, 80], sizes = [24, 8], strides = [1, 1]} : vector<24x96xf32> to vector<24x8xf32>
    %109 = tpu.transpose %107, [1, 0] : vector<24x8xf32> -> vector<8x24xf32>
    %cst_58 = arith.constant dense<0.000000e+00> : vector<24x24xf32>
    %110 = tpu.matmul %106, %109, %cst_58 {dimension_numbers = #tpu.dot_dimension_numbers<[1], [0], [0], [1], [0, 0, 1, 1], [], []>} : vector<24x8xf32>, vector<8x24xf32>, vector<24x24xf32> -> vector<24x24xf32>
    %cst_59 = arith.constant 0.353553385 : f32
    %111 = vector.broadcast %cst_59 : f32 to vector<24x24xf32>
    %112 = arith.mulf %110, %111 : vector<24x24xf32>
    %113 = vector.broadcast %27 : vector<1x24xf32> to vector<24x24xf32>
    %114 = arith.addf %112, %113 : vector<24x24xf32>
    %cst_60 = arith.constant dense<0xFF800000> : vector<24xf32>
    %115 = vector.multi_reduction <maximumf>, %114, %cst_60 [1] : vector<24x24xf32> to vector<24xf32>
    %116 = vector.shape_cast %115 : vector<24xf32> to vector<24x1xf32>
    %117 = vector.broadcast %116 : vector<24x1xf32> to vector<24x24xf32>
    %118 = arith.subf %114, %117 : vector<24x24xf32>
    %119 = math.exp %118 : vector<24x24xf32>
    %cst_61 = arith.constant dense<0.000000e+00> : vector<24xf32>
    %120 = vector.multi_reduction <add>, %119, %cst_61 [1] : vector<24x24xf32> to vector<24xf32>
    %121 = vector.shape_cast %120 : vector<24xf32> to vector<24x1xf32>
    %122 = vector.broadcast %121 : vector<24x1xf32> to vector<24x24xf32>
    %123 = arith.divf %119, %122 : vector<24x24xf32>
    %cst_62 = arith.constant dense<0.000000e+00> : vector<24x8xf32>
    %124 = tpu.matmul %123, %108, %cst_62 {dimension_numbers = #tpu.dot_dimension_numbers<[1], [0], [0], [1], [0, 0, 1, 1], [], []>} : vector<24x24xf32>, vector<24x8xf32>, vector<24x8xf32> -> vector<24x8xf32>
    %125 = vector.extract_strided_slice %31 {offsets = [16, 0], sizes = [8, 32], strides = [1, 1]} : vector<32x32xf32> to vector<8x32xf32>
    %cst_63 = arith.constant dense<0.000000e+00> : vector<24x32xf32>
    %126 = tpu.matmul %124, %125, %cst_63 {dimension_numbers = #tpu.dot_dimension_numbers<[1], [0], [0], [1], [0, 0, 1, 1], [], []>} : vector<24x8xf32>, vector<8x32xf32>, vector<24x32xf32> -> vector<24x32xf32>
    %127 = arith.addf %105, %126 : vector<24x32xf32>
    %128 = vector.extract_strided_slice %60 {offsets = [0, 24], sizes = [24, 8], strides = [1, 1]} : vector<24x96xf32> to vector<24x8xf32>
    %129 = vector.extract_strided_slice %60 {offsets = [0, 56], sizes = [24, 8], strides = [1, 1]} : vector<24x96xf32> to vector<24x8xf32>
    %130 = vector.extract_strided_slice %60 {offsets = [0, 88], sizes = [24, 8], strides = [1, 1]} : vector<24x96xf32> to vector<24x8xf32>
    %131 = tpu.transpose %129, [1, 0] : vector<24x8xf32> -> vector<8x24xf32>
    %cst_64 = arith.constant dense<0.000000e+00> : vector<24x24xf32>
    %132 = tpu.matmul %128, %131, %cst_64 {dimension_numbers = #tpu.dot_dimension_numbers<[1], [0], [0], [1], [0, 0, 1, 1], [], []>} : vector<24x8xf32>, vector<8x24xf32>, vector<24x24xf32> -> vector<24x24xf32>
    %cst_65 = arith.constant 0.353553385 : f32
    %133 = vector.broadcast %cst_65 : f32 to vector<24x24xf32>
    %134 = arith.mulf %132, %133 : vector<24x24xf32>
    %135 = vector.broadcast %27 : vector<1x24xf32> to vector<24x24xf32>
    %136 = arith.addf %134, %135 : vector<24x24xf32>
    %cst_66 = arith.constant dense<0xFF800000> : vector<24xf32>
    %137 = vector.multi_reduction <maximumf>, %136, %cst_66 [1] : vector<24x24xf32> to vector<24xf32>
    %138 = vector.shape_cast %137 : vector<24xf32> to vector<24x1xf32>
    %139 = vector.broadcast %138 : vector<24x1xf32> to vector<24x24xf32>
    %140 = arith.subf %136, %139 : vector<24x24xf32>
    %141 = math.exp %140 : vector<24x24xf32>
    %cst_67 = arith.constant dense<0.000000e+00> : vector<24xf32>
    %142 = vector.multi_reduction <add>, %141, %cst_67 [1] : vector<24x24xf32> to vector<24xf32>
    %143 = vector.shape_cast %142 : vector<24xf32> to vector<24x1xf32>
    %144 = vector.broadcast %143 : vector<24x1xf32> to vector<24x24xf32>
    %145 = arith.divf %141, %144 : vector<24x24xf32>
    %cst_68 = arith.constant dense<0.000000e+00> : vector<24x8xf32>
    %146 = tpu.matmul %145, %130, %cst_68 {dimension_numbers = #tpu.dot_dimension_numbers<[1], [0], [0], [1], [0, 0, 1, 1], [], []>} : vector<24x24xf32>, vector<24x8xf32>, vector<24x8xf32> -> vector<24x8xf32>
    %147 = vector.extract_strided_slice %31 {offsets = [24, 0], sizes = [8, 32], strides = [1, 1]} : vector<32x32xf32> to vector<8x32xf32>
    %cst_69 = arith.constant dense<0.000000e+00> : vector<24x32xf32>
    %148 = tpu.matmul %146, %147, %cst_69 {dimension_numbers = #tpu.dot_dimension_numbers<[1], [0], [0], [1], [0, 0, 1, 1], [], []>} : vector<24x8xf32>, vector<8x32xf32>, vector<24x32xf32> -> vector<24x32xf32>
    %149 = arith.addf %127, %148 : vector<24x32xf32>
    %150 = vector.extract_strided_slice %40 {offsets = [0, 0], sizes = [24, 32], strides = [1, 1]} : vector<48x32xf32> to vector<24x32xf32>
    %151 = arith.addf %150, %149 : vector<24x32xf32>
    %c0_70 = arith.constant 0 : index
    %c0_71 = arith.constant 0 : index
    %152 = vector.load %arg16[%c0_70, %c0_71] : memref<48x32xf32, #tpu.memory_space<vmem>>, vector<24x32xf32>
    tpu.vector_store %arg16[%c0_70, %c0_71], %151 {strides = array<i32>} : memref<48x32xf32, #tpu.memory_space<vmem>>, vector<24x32xf32>,
    %153 = vector.extract_strided_slice %59 {offsets = [24, 0], sizes = [24, 96], strides = [1, 1]} : vector<48x96xf32> to vector<24x96xf32>
    %cst_72 = arith.constant 0.000000e+00 : f32
    %154 = vector.broadcast %cst_72 : f32 to vector<24x32xf32>
    %155 = vector.extract_strided_slice %153 {offsets = [0, 0], sizes = [24, 8], strides = [1, 1]} : vector<24x96xf32> to vector<24x8xf32>
    %156 = vector.extract_strided_slice %153 {offsets = [0, 32], sizes = [24, 8], strides = [1, 1]} : vector<24x96xf32> to vector<24x8xf32>
    %157 = vector.extract_strided_slice %153 {offsets = [0, 64], sizes = [24, 8], strides = [1, 1]} : vector<24x96xf32> to vector<24x8xf32>
    %158 = tpu.transpose %156, [1, 0] : vector<24x8xf32> -> vector<8x24xf32>
    %cst_73 = arith.constant dense<0.000000e+00> : vector<24x24xf32>
    %159 = tpu.matmul %155, %158, %cst_73 {dimension_numbers = #tpu.dot_dimension_numbers<[1], [0], [0], [1], [0, 0, 1, 1], [], []>} : vector<24x8xf32>, vector<8x24xf32>, vector<24x24xf32> -> vector<24x24xf32>
    %cst_74 = arith.constant 0.353553385 : f32
    %160 = vector.broadcast %cst_74 : f32 to vector<24x24xf32>
    %161 = arith.mulf %159, %160 : vector<24x24xf32>
    %162 = vector.broadcast %27 : vector<1x24xf32> to vector<24x24xf32>
    %163 = arith.addf %161, %162 : vector<24x24xf32>
    %cst_75 = arith.constant dense<0xFF800000> : vector<24xf32>
    %164 = vector.multi_reduction <maximumf>, %163, %cst_75 [1] : vector<24x24xf32> to vector<24xf32>
    %165 = vector.shape_cast %164 : vector<24xf32> to vector<24x1xf32>
    %166 = vector.broadcast %165 : vector<24x1xf32> to vector<24x24xf32>
    %167 = arith.subf %163, %166 : vector<24x24xf32>
    %168 = math.exp %167 : vector<24x24xf32>
    %cst_76 = arith.constant dense<0.000000e+00> : vector<24xf32>
    %169 = vector.multi_reduction <add>, %168, %cst_76 [1] : vector<24x24xf32> to vector<24xf32>
    %170 = vector.shape_cast %169 : vector<24xf32> to vector<24x1xf32>
    %171 = vector.broadcast %170 : vector<24x1xf32> to vector<24x24xf32>
    %172 = arith.divf %168, %171 : vector<24x24xf32>
    %cst_77 = arith.constant dense<0.000000e+00> : vector<24x8xf32>
    %173 = tpu.matmul %172, %157, %cst_77 {dimension_numbers = #tpu.dot_dimension_numbers<[1], [0], [0], [1], [0, 0, 1, 1], [], []>} : vector<24x24xf32>, vector<24x8xf32>, vector<24x8xf32> -> vector<24x8xf32>
    %174 = vector.extract_strided_slice %31 {offsets = [0, 0], sizes = [8, 32], strides = [1, 1]} : vector<32x32xf32> to vector<8x32xf32>
    %cst_78 = arith.constant dense<0.000000e+00> : vector<24x32xf32>
    %175 = tpu.matmul %173, %174, %cst_78 {dimension_numbers = #tpu.dot_dimension_numbers<[1], [0], [0], [1], [0, 0, 1, 1], [], []>} : vector<24x8xf32>, vector<8x32xf32>, vector<24x32xf32> -> vector<24x32xf32>
    %176 = arith.addf %154, %175 : vector<24x32xf32>
    %177 = vector.extract_strided_slice %153 {offsets = [0, 8], sizes = [24, 8], strides = [1, 1]} : vector<24x96xf32> to vector<24x8xf32>
    %178 = vector.extract_strided_slice %153 {offsets = [0, 40], sizes = [24, 8], strides = [1, 1]} : vector<24x96xf32> to vector<24x8xf32>
    %179 = vector.extract_strided_slice %153 {offsets = [0, 72], sizes = [24, 8], strides = [1, 1]} : vector<24x96xf32> to vector<24x8xf32>
    %180 = tpu.transpose %178, [1, 0] : vector<24x8xf32> -> vector<8x24xf32>
    %cst_79 = arith.constant dense<0.000000e+00> : vector<24x24xf32>
    %181 = tpu.matmul %177, %180, %cst_79 {dimension_numbers = #tpu.dot_dimension_numbers<[1], [0], [0], [1], [0, 0, 1, 1], [], []>} : vector<24x8xf32>, vector<8x24xf32>, vector<24x24xf32> -> vector<24x24xf32>
    %cst_80 = arith.constant 0.353553385 : f32
    %182 = vector.broadcast %cst_80 : f32 to vector<24x24xf32>
    %183 = arith.mulf %181, %182 : vector<24x24xf32>
    %184 = vector.broadcast %27 : vector<1x24xf32> to vector<24x24xf32>
    %185 = arith.addf %183, %184 : vector<24x24xf32>
    %cst_81 = arith.constant dense<0xFF800000> : vector<24xf32>
    %186 = vector.multi_reduction <maximumf>, %185, %cst_81 [1] : vector<24x24xf32> to vector<24xf32>
    %187 = vector.shape_cast %186 : vector<24xf32> to vector<24x1xf32>
    %188 = vector.broadcast %187 : vector<24x1xf32> to vector<24x24xf32>
    %189 = arith.subf %185, %188 : vector<24x24xf32>
    %190 = math.exp %189 : vector<24x24xf32>
    %cst_82 = arith.constant dense<0.000000e+00> : vector<24xf32>
    %191 = vector.multi_reduction <add>, %190, %cst_82 [1] : vector<24x24xf32> to vector<24xf32>
    %192 = vector.shape_cast %191 : vector<24xf32> to vector<24x1xf32>
    %193 = vector.broadcast %192 : vector<24x1xf32> to vector<24x24xf32>
    %194 = arith.divf %190, %193 : vector<24x24xf32>
    %cst_83 = arith.constant dense<0.000000e+00> : vector<24x8xf32>
    %195 = tpu.matmul %194, %179, %cst_83 {dimension_numbers = #tpu.dot_dimension_numbers<[1], [0], [0], [1], [0, 0, 1, 1], [], []>} : vector<24x24xf32>, vector<24x8xf32>, vector<24x8xf32> -> vector<24x8xf32>
    %196 = vector.extract_strided_slice %31 {offsets = [8, 0], sizes = [8, 32], strides = [1, 1]} : vector<32x32xf32> to vector<8x32xf32>
    %cst_84 = arith.constant dense<0.000000e+00> : vector<24x32xf32>
    %197 = tpu.matmul %195, %196, %cst_84 {dimension_numbers = #tpu.dot_dimension_numbers<[1], [0], [0], [1], [0, 0, 1, 1], [], []>} : vector<24x8xf32>, vector<8x32xf32>, vector<24x32xf32> -> vector<24x32xf32>
    %198 = arith.addf %176, %197 : vector<24x32xf32>
    %199 = vector.extract_strided_slice %153 {offsets = [0, 16], sizes = [24, 8], strides = [1, 1]} : vector<24x96xf32> to vector<24x8xf32>
    %200 = vector.extract_strided_slice %153 {offsets = [0, 48], sizes = [24, 8], strides = [1, 1]} : vector<24x96xf32> to vector<24x8xf32>
    %201 = vector.extract_strided_slice %153 {offsets = [0, 80], sizes = [24, 8], strides = [1, 1]} : vector<24x96xf32> to vector<24x8xf32>
    %202 = tpu.transpose %200, [1, 0] : vector<24x8xf32> -> vector<8x24xf32>
    %cst_85 = arith.constant dense<0.000000e+00> : vector<24x24xf32>
    %203 = tpu.matmul %199, %202, %cst_85 {dimension_numbers = #tpu.dot_dimension_numbers<[1], [0], [0], [1], [0, 0, 1, 1], [], []>} : vector<24x8xf32>, vector<8x24xf32>, vector<24x24xf32> -> vector<24x24xf32>
    %cst_86 = arith.constant 0.353553385 : f32
    %204 = vector.broadcast %cst_86 : f32 to vector<24x24xf32>
    %205 = arith.mulf %203, %204 : vector<24x24xf32>
    %206 = vector.broadcast %27 : vector<1x24xf32> to vector<24x24xf32>
    %207 = arith.addf %205, %206 : vector<24x24xf32>
    %cst_87 = arith.constant dense<0xFF800000> : vector<24xf32>
    %208 = vector.multi_reduction <maximumf>, %207, %cst_87 [1] : vector<24x24xf32> to vector<24xf32>
    %209 = vector.shape_cast %208 : vector<24xf32> to vector<24x1xf32>
    %210 = vector.broadcast %209 : vector<24x1xf32> to vector<24x24xf32>
    %211 = arith.subf %207, %210 : vector<24x24xf32>
    %212 = math.exp %211 : vector<24x24xf32>
    %cst_88 = arith.constant dense<0.000000e+00> : vector<24xf32>
    %213 = vector.multi_reduction <add>, %212, %cst_88 [1] : vector<24x24xf32> to vector<24xf32>
    %214 = vector.shape_cast %213 : vector<24xf32> to vector<24x1xf32>
    %215 = vector.broadcast %214 : vector<24x1xf32> to vector<24x24xf32>
    %216 = arith.divf %212, %215 : vector<24x24xf32>
    %cst_89 = arith.constant dense<0.000000e+00> : vector<24x8xf32>
    %217 = tpu.matmul %216, %201, %cst_89 {dimension_numbers = #tpu.dot_dimension_numbers<[1], [0], [0], [1], [0, 0, 1, 1], [], []>} : vector<24x24xf32>, vector<24x8xf32>, vector<24x8xf32> -> vector<24x8xf32>
    %218 = vector.extract_strided_slice %31 {offsets = [16, 0], sizes = [8, 32], strides = [1, 1]} : vector<32x32xf32> to vector<8x32xf32>
    %cst_90 = arith.constant dense<0.000000e+00> : vector<24x32xf32>
    %219 = tpu.matmul %217, %218, %cst_90 {dimension_numbers = #tpu.dot_dimension_numbers<[1], [0], [0], [1], [0, 0, 1, 1], [], []>} : vector<24x8xf32>, vector<8x32xf32>, vector<24x32xf32> -> vector<24x32xf32>
    %220 = arith.addf %198, %219 : vector<24x32xf32>
    %221 = vector.extract_strided_slice %153 {offsets = [0, 24], sizes = [24, 8], strides = [1, 1]} : vector<24x96xf32> to vector<24x8xf32>
    %222 = vector.extract_strided_slice %153 {offsets = [0, 56], sizes = [24, 8], strides = [1, 1]} : vector<24x96xf32> to vector<24x8xf32>
    %223 = vector.extract_strided_slice %153 {offsets = [0, 88], sizes = [24, 8], strides = [1, 1]} : vector<24x96xf32> to vector<24x8xf32>
    %224 = tpu.transpose %222, [1, 0] : vector<24x8xf32> -> vector<8x24xf32>
    %cst_91 = arith.constant dense<0.000000e+00> : vector<24x24xf32>
    %225 = tpu.matmul %221, %224, %cst_91 {dimension_numbers = #tpu.dot_dimension_numbers<[1], [0], [0], [1], [0, 0, 1, 1], [], []>} : vector<24x8xf32>, vector<8x24xf32>, vector<24x24xf32> -> vector<24x24xf32>
    %cst_92 = arith.constant 0.353553385 : f32
    %226 = vector.broadcast %cst_92 : f32 to vector<24x24xf32>
    %227 = arith.mulf %225, %226 : vector<24x24xf32>
    %228 = vector.broadcast %27 : vector<1x24xf32> to vector<24x24xf32>
    %229 = arith.addf %227, %228 : vector<24x24xf32>
    %cst_93 = arith.constant dense<0xFF800000> : vector<24xf32>
    %230 = vector.multi_reduction <maximumf>, %229, %cst_93 [1] : vector<24x24xf32> to vector<24xf32>
    %231 = vector.shape_cast %230 : vector<24xf32> to vector<24x1xf32>
    %232 = vector.broadcast %231 : vector<24x1xf32> to vector<24x24xf32>
    %233 = arith.subf %229, %232 : vector<24x24xf32>
    %234 = math.exp %233 : vector<24x24xf32>
    %cst_94 = arith.constant dense<0.000000e+00> : vector<24xf32>
    %235 = vector.multi_reduction <add>, %234, %cst_94 [1] : vector<24x24xf32> to vector<24xf32>
    %236 = vector.shape_cast %235 : vector<24xf32> to vector<24x1xf32>
    %237 = vector.broadcast %236 : vector<24x1xf32> to vector<24x24xf32>
    %238 = arith.divf %234, %237 : vector<24x24xf32>
    %cst_95 = arith.constant dense<0.000000e+00> : vector<24x8xf32>
    %239 = tpu.matmul %238, %223, %cst_95 {dimension_numbers = #tpu.dot_dimension_numbers<[1], [0], [0], [1], [0, 0, 1, 1], [], []>} : vector<24x24xf32>, vector<24x8xf32>, vector<24x8xf32> -> vector<24x8xf32>
    %240 = vector.extract_strided_slice %31 {offsets = [24, 0], sizes = [8, 32], strides = [1, 1]} : vector<32x32xf32> to vector<8x32xf32>
    %cst_96 = arith.constant dense<0.000000e+00> : vector<24x32xf32>
    %241 = tpu.matmul %239, %240, %cst_96 {dimension_numbers = #tpu.dot_dimension_numbers<[1], [0], [0], [1], [0, 0, 1, 1], [], []>} : vector<24x8xf32>, vector<8x32xf32>, vector<24x32xf32> -> vector<24x32xf32>
    %242 = arith.addf %220, %241 : vector<24x32xf32>
    %243 = vector.extract_strided_slice %40 {offsets = [24, 0], sizes = [24, 32], strides = [1, 1]} : vector<48x32xf32> to vector<24x32xf32>
    %244 = arith.addf %243, %242 : vector<24x32xf32>
    %c24_97 = arith.constant 24 : index
    %c0_98 = arith.constant 0 : index
    %245 = vector.load %arg16[%c24_97, %c0_98] : memref<48x32xf32, #tpu.memory_space<vmem>>, vector<24x32xf32>
    tpu.vector_store %arg16[%c24_97, %c0_98], %244 {strides = array<i32>} : memref<48x32xf32, #tpu.memory_space<vmem>>, vector<24x32xf32>,
    %c0_99 = arith.constant 0 : index
    %c0_100 = arith.constant 0 : index
    %246 = vector.load %arg16[%c0_99, %c0_100] : memref<48x32xf32, #tpu.memory_space<vmem>>, vector<48x32xf32>
    %cst_101 = arith.constant dense<0.000000e+00> : vector<48xf32>
    %247 = vector.multi_reduction <add>, %246, %cst_101 [1] : vector<48x32xf32> to vector<48xf32>
    %248 = vector.shape_cast %247 : vector<48xf32> to vector<48x1xf32>
    %cst_102 = arith.constant 3.200000e+01 : f32
    %249 = vector.broadcast %cst_102 : f32 to vector<48x1xf32>
    %250 = arith.divf %248, %249 : vector<48x1xf32>
    %251 = vector.broadcast %250 : vector<48x1xf32> to vector<48x32xf32>
    %252 = arith.subf %246, %251 : vector<48x32xf32>
    %253 = arith.mulf %252, %252 : vector<48x32xf32>
    %cst_103 = arith.constant dense<0.000000e+00> : vector<48xf32>
    %254 = vector.multi_reduction <add>, %253, %cst_103 [1] : vector<48x32xf32> to vector<48xf32>
    %255 = vector.shape_cast %254 : vector<48xf32> to vector<48x1xf32>
    %cst_104 = arith.constant 3.200000e+01 : f32
    %256 = vector.broadcast %cst_104 : f32 to vector<48x1xf32>
    %257 = arith.divf %255, %256 : vector<48x1xf32>
    %258 = vector.broadcast %250 : vector<48x1xf32> to vector<48x32xf32>
    %259 = arith.subf %246, %258 : vector<48x32xf32>
    %cst_105 = arith.constant 9.99999974E-6 : f32
    %260 = vector.broadcast %cst_105 : f32 to vector<48x1xf32>
    %261 = arith.addf %257, %260 : vector<48x1xf32>
    %262 = math.rsqrt %261 : vector<48x1xf32>
    %263 = vector.broadcast %262 : vector<48x1xf32> to vector<48x32xf32>
    %264 = arith.mulf %259, %263 : vector<48x32xf32>
    %cst_106 = arith.constant dense<0.000000e+00> : vector<48x128xf32>
    %265 = tpu.matmul %264, %33, %cst_106 {dimension_numbers = #tpu.dot_dimension_numbers<[1], [0], [0], [1], [0, 0, 1, 1], [], []>} : vector<48x32xf32>, vector<32x128xf32>, vector<48x128xf32> -> vector<48x128xf32>
    %266 = vector.broadcast %35 : vector<1x128xf32> to vector<48x128xf32>
    %267 = arith.addf %265, %266 : vector<48x128xf32>
    %cst_107 = arith.constant 5.000000e-01 : f32
    %268 = vector.broadcast %cst_107 : f32 to vector<48x128xf32>
    %269 = arith.mulf %268, %267 : vector<48x128xf32>
    %cst_108 = arith.constant 4.471500e-02 : f32
    %270 = vector.broadcast %cst_108 : f32 to vector<48x128xf32>
    %271 = arith.mulf %270, %267 : vector<48x128xf32>
    %272 = arith.mulf %271, %267 : vector<48x128xf32>
    %273 = arith.mulf %272, %267 : vector<48x128xf32>
    %274 = arith.addf %267, %273 : vector<48x128xf32>
    %cst_109 = arith.constant 0.797884583 : f32
    %275 = vector.broadcast %cst_109 : f32 to vector<48x128xf32>
    %276 = arith.mulf %275, %274 : vector<48x128xf32>
    %277 = math.tanh %276 : vector<48x128xf32>
    %cst_110 = arith.constant 1.000000e+00 : f32
    %278 = vector.broadcast %cst_110 : f32 to vector<48x128xf32>
    %279 = arith.addf %278, %277 : vector<48x128xf32>
    %280 = arith.mulf %269, %279 : vector<48x128xf32>
    %cst_111 = arith.constant dense<0.000000e+00> : vector<48x32xf32>
    %281 = tpu.matmul %280, %37, %cst_111 {dimension_numbers = #tpu.dot_dimension_numbers<[1], [0], [0], [1], [0, 0, 1, 1], [], []>} : vector<48x128xf32>, vector<128x32xf32>, vector<48x32xf32> -> vector<48x32xf32>
    %282 = vector.broadcast %39 : vector<1x32xf32> to vector<48x32xf32>
    %283 = arith.addf %281, %282 : vector<48x32xf32>
    %284 = arith.addf %246, %283 : vector<48x32xf32>
    %c0_112 = arith.constant 0 : index
    %c0_113 = arith.constant 0 : index
    %285 = vector.load %arg16[%c0_112, %c0_113] : memref<48x32xf32, #tpu.memory_space<vmem>>, vector<48x32xf32>
    tpu.vector_store %arg16[%c0_112, %c0_113], %284 {strides = array<i32>} : memref<48x32xf32, #tpu.memory_space<vmem>>, vector<48x32xf32>,
    %c1_114 = arith.constant 1 : index
    %c0_115 = arith.constant 0 : index
    %c0_116 = arith.constant 0 : index
    %286 = vector.load %arg5[%c1_114, %c0_115, %c0_116] : memref<2x32x96xf32, #tpu.memory_space<vmem>>, vector<1x32x96xf32>
    %287 = vector.shape_cast %286 : vector<1x32x96xf32> to vector<32x96xf32>
    %c1_117 = arith.constant 1 : index
    %c0_118 = arith.constant 0 : index
    %c0_119 = arith.constant 0 : index
    %288 = vector.load %arg6[%c1_117, %c0_118, %c0_119] : memref<2x32x32xf32, #tpu.memory_space<vmem>>, vector<1x32x32xf32>
    %289 = vector.shape_cast %288 : vector<1x32x32xf32> to vector<32x32xf32>
    %c1_120 = arith.constant 1 : index
    %c0_121 = arith.constant 0 : index
    %c0_122 = arith.constant 0 : index
    %290 = vector.load %arg7[%c1_120, %c0_121, %c0_122] : memref<2x32x128xf32, #tpu.memory_space<vmem>>, vector<1x32x128xf32>
    %291 = vector.shape_cast %290 : vector<1x32x128xf32> to vector<32x128xf32>
    %c1_123 = arith.constant 1 : index
    %c0_124 = arith.constant 0 : index
    %c0_125 = arith.constant 0 : index
    %292 = vector.load %arg8[%c1_123, %c0_124, %c0_125] : memref<2x1x128xf32, #tpu.memory_space<vmem>>, vector<1x1x128xf32>
    %293 = vector.shape_cast %292 : vector<1x1x128xf32> to vector<1x128xf32>
    %c1_126 = arith.constant 1 : index
    %c0_127 = arith.constant 0 : index
    %c0_128 = arith.constant 0 : index
    %294 = vector.load %arg9[%c1_126, %c0_127, %c0_128] : memref<2x128x32xf32, #tpu.memory_space<vmem>>, vector<1x128x32xf32>
    %295 = vector.shape_cast %294 : vector<1x128x32xf32> to vector<128x32xf32>
    %c1_129 = arith.constant 1 : index
    %c0_130 = arith.constant 0 : index
    %c0_131 = arith.constant 0 : index
    %296 = vector.load %arg10[%c1_129, %c0_130, %c0_131] : memref<2x1x32xf32, #tpu.memory_space<vmem>>, vector<1x1x32xf32>
    %297 = vector.shape_cast %296 : vector<1x1x32xf32> to vector<1x32xf32>
    %c0_132 = arith.constant 0 : index
    %c0_133 = arith.constant 0 : index
    %298 = vector.load %arg16[%c0_132, %c0_133] : memref<48x32xf32, #tpu.memory_space<vmem>>, vector<48x32xf32>
    %cst_134 = arith.constant dense<0.000000e+00> : vector<48xf32>
    %299 = vector.multi_reduction <add>, %298, %cst_134 [1] : vector<48x32xf32> to vector<48xf32>
    %300 = vector.shape_cast %299 : vector<48xf32> to vector<48x1xf32>
    %cst_135 = arith.constant 3.200000e+01 : f32
    %301 = vector.broadcast %cst_135 : f32 to vector<48x1xf32>
    %302 = arith.divf %300, %301 : vector<48x1xf32>
    %303 = vector.broadcast %302 : vector<48x1xf32> to vector<48x32xf32>
    %304 = arith.subf %298, %303 : vector<48x32xf32>
    %305 = arith.mulf %304, %304 : vector<48x32xf32>
    %cst_136 = arith.constant dense<0.000000e+00> : vector<48xf32>
    %306 = vector.multi_reduction <add>, %305, %cst_136 [1] : vector<48x32xf32> to vector<48xf32>
    %307 = vector.shape_cast %306 : vector<48xf32> to vector<48x1xf32>
    %cst_137 = arith.constant 3.200000e+01 : f32
    %308 = vector.broadcast %cst_137 : f32 to vector<48x1xf32>
    %309 = arith.divf %307, %308 : vector<48x1xf32>
    %310 = vector.broadcast %302 : vector<48x1xf32> to vector<48x32xf32>
    %311 = arith.subf %298, %310 : vector<48x32xf32>
    %cst_138 = arith.constant 9.99999974E-6 : f32
    %312 = vector.broadcast %cst_138 : f32 to vector<48x1xf32>
    %313 = arith.addf %309, %312 : vector<48x1xf32>
    %314 = math.rsqrt %313 : vector<48x1xf32>
    %315 = vector.broadcast %314 : vector<48x1xf32> to vector<48x32xf32>
    %316 = arith.mulf %311, %315 : vector<48x32xf32>
    %cst_139 = arith.constant dense<0.000000e+00> : vector<48x96xf32>
    %317 = tpu.matmul %316, %287, %cst_139 {dimension_numbers = #tpu.dot_dimension_numbers<[1], [0], [0], [1], [0, 0, 1, 1], [], []>} : vector<48x32xf32>, vector<32x96xf32>, vector<48x96xf32> -> vector<48x96xf32>
    %318 = vector.extract_strided_slice %317 {offsets = [0, 0], sizes = [24, 96], strides = [1, 1]} : vector<48x96xf32> to vector<24x96xf32>
    %cst_140 = arith.constant 0.000000e+00 : f32
    %319 = vector.broadcast %cst_140 : f32 to vector<24x32xf32>
    %320 = vector.extract_strided_slice %318 {offsets = [0, 0], sizes = [24, 8], strides = [1, 1]} : vector<24x96xf32> to vector<24x8xf32>
    %321 = vector.extract_strided_slice %318 {offsets = [0, 32], sizes = [24, 8], strides = [1, 1]} : vector<24x96xf32> to vector<24x8xf32>
    %322 = vector.extract_strided_slice %318 {offsets = [0, 64], sizes = [24, 8], strides = [1, 1]} : vector<24x96xf32> to vector<24x8xf32>
    %323 = tpu.transpose %321, [1, 0] : vector<24x8xf32> -> vector<8x24xf32>
    %cst_141 = arith.constant dense<0.000000e+00> : vector<24x24xf32>
    %324 = tpu.matmul %320, %323, %cst_141 {dimension_numbers = #tpu.dot_dimension_numbers<[1], [0], [0], [1], [0, 0, 1, 1], [], []>} : vector<24x8xf32>, vector<8x24xf32>, vector<24x24xf32> -> vector<24x24xf32>
    %cst_142 = arith.constant 0.353553385 : f32
    %325 = vector.broadcast %cst_142 : f32 to vector<24x24xf32>
    %326 = arith.mulf %324, %325 : vector<24x24xf32>
    %327 = vector.broadcast %27 : vector<1x24xf32> to vector<24x24xf32>
    %328 = arith.addf %326, %327 : vector<24x24xf32>
    %cst_143 = arith.constant dense<0xFF800000> : vector<24xf32>
    %329 = vector.multi_reduction <maximumf>, %328, %cst_143 [1] : vector<24x24xf32> to vector<24xf32>
    %330 = vector.shape_cast %329 : vector<24xf32> to vector<24x1xf32>
    %331 = vector.broadcast %330 : vector<24x1xf32> to vector<24x24xf32>
    %332 = arith.subf %328, %331 : vector<24x24xf32>
    %333 = math.exp %332 : vector<24x24xf32>
    %cst_144 = arith.constant dense<0.000000e+00> : vector<24xf32>
    %334 = vector.multi_reduction <add>, %333, %cst_144 [1] : vector<24x24xf32> to vector<24xf32>
    %335 = vector.shape_cast %334 : vector<24xf32> to vector<24x1xf32>
    %336 = vector.broadcast %335 : vector<24x1xf32> to vector<24x24xf32>
    %337 = arith.divf %333, %336 : vector<24x24xf32>
    %cst_145 = arith.constant dense<0.000000e+00> : vector<24x8xf32>
    %338 = tpu.matmul %337, %322, %cst_145 {dimension_numbers = #tpu.dot_dimension_numbers<[1], [0], [0], [1], [0, 0, 1, 1], [], []>} : vector<24x24xf32>, vector<24x8xf32>, vector<24x8xf32> -> vector<24x8xf32>
    %339 = vector.extract_strided_slice %289 {offsets = [0, 0], sizes = [8, 32], strides = [1, 1]} : vector<32x32xf32> to vector<8x32xf32>
    %cst_146 = arith.constant dense<0.000000e+00> : vector<24x32xf32>
    %340 = tpu.matmul %338, %339, %cst_146 {dimension_numbers = #tpu.dot_dimension_numbers<[1], [0], [0], [1], [0, 0, 1, 1], [], []>} : vector<24x8xf32>, vector<8x32xf32>, vector<24x32xf32> -> vector<24x32xf32>
    %341 = arith.addf %319, %340 : vector<24x32xf32>
    %342 = vector.extract_strided_slice %318 {offsets = [0, 8], sizes = [24, 8], strides = [1, 1]} : vector<24x96xf32> to vector<24x8xf32>
    %343 = vector.extract_strided_slice %318 {offsets = [0, 40], sizes = [24, 8], strides = [1, 1]} : vector<24x96xf32> to vector<24x8xf32>
    %344 = vector.extract_strided_slice %318 {offsets = [0, 72], sizes = [24, 8], strides = [1, 1]} : vector<24x96xf32> to vector<24x8xf32>
    %345 = tpu.transpose %343, [1, 0] : vector<24x8xf32> -> vector<8x24xf32>
    %cst_147 = arith.constant dense<0.000000e+00> : vector<24x24xf32>
    %346 = tpu.matmul %342, %345, %cst_147 {dimension_numbers = #tpu.dot_dimension_numbers<[1], [0], [0], [1], [0, 0, 1, 1], [], []>} : vector<24x8xf32>, vector<8x24xf32>, vector<24x24xf32> -> vector<24x24xf32>
    %cst_148 = arith.constant 0.353553385 : f32
    %347 = vector.broadcast %cst_148 : f32 to vector<24x24xf32>
    %348 = arith.mulf %346, %347 : vector<24x24xf32>
    %349 = vector.broadcast %27 : vector<1x24xf32> to vector<24x24xf32>
    %350 = arith.addf %348, %349 : vector<24x24xf32>
    %cst_149 = arith.constant dense<0xFF800000> : vector<24xf32>
    %351 = vector.multi_reduction <maximumf>, %350, %cst_149 [1] : vector<24x24xf32> to vector<24xf32>
    %352 = vector.shape_cast %351 : vector<24xf32> to vector<24x1xf32>
    %353 = vector.broadcast %352 : vector<24x1xf32> to vector<24x24xf32>
    %354 = arith.subf %350, %353 : vector<24x24xf32>
    %355 = math.exp %354 : vector<24x24xf32>
    %cst_150 = arith.constant dense<0.000000e+00> : vector<24xf32>
    %356 = vector.multi_reduction <add>, %355, %cst_150 [1] : vector<24x24xf32> to vector<24xf32>
    %357 = vector.shape_cast %356 : vector<24xf32> to vector<24x1xf32>
    %358 = vector.broadcast %357 : vector<24x1xf32> to vector<24x24xf32>
    %359 = arith.divf %355, %358 : vector<24x24xf32>
    %cst_151 = arith.constant dense<0.000000e+00> : vector<24x8xf32>
    %360 = tpu.matmul %359, %344, %cst_151 {dimension_numbers = #tpu.dot_dimension_numbers<[1], [0], [0], [1], [0, 0, 1, 1], [], []>} : vector<24x24xf32>, vector<24x8xf32>, vector<24x8xf32> -> vector<24x8xf32>
    %361 = vector.extract_strided_slice %289 {offsets = [8, 0], sizes = [8, 32], strides = [1, 1]} : vector<32x32xf32> to vector<8x32xf32>
    %cst_152 = arith.constant dense<0.000000e+00> : vector<24x32xf32>
    %362 = tpu.matmul %360, %361, %cst_152 {dimension_numbers = #tpu.dot_dimension_numbers<[1], [0], [0], [1], [0, 0, 1, 1], [], []>} : vector<24x8xf32>, vector<8x32xf32>, vector<24x32xf32> -> vector<24x32xf32>
    %363 = arith.addf %341, %362 : vector<24x32xf32>
    %364 = vector.extract_strided_slice %318 {offsets = [0, 16], sizes = [24, 8], strides = [1, 1]} : vector<24x96xf32> to vector<24x8xf32>
    %365 = vector.extract_strided_slice %318 {offsets = [0, 48], sizes = [24, 8], strides = [1, 1]} : vector<24x96xf32> to vector<24x8xf32>
    %366 = vector.extract_strided_slice %318 {offsets = [0, 80], sizes = [24, 8], strides = [1, 1]} : vector<24x96xf32> to vector<24x8xf32>
    %367 = tpu.transpose %365, [1, 0] : vector<24x8xf32> -> vector<8x24xf32>
    %cst_153 = arith.constant dense<0.000000e+00> : vector<24x24xf32>
    %368 = tpu.matmul %364, %367, %cst_153 {dimension_numbers = #tpu.dot_dimension_numbers<[1], [0], [0], [1], [0, 0, 1, 1], [], []>} : vector<24x8xf32>, vector<8x24xf32>, vector<24x24xf32> -> vector<24x24xf32>
    %cst_154 = arith.constant 0.353553385 : f32
    %369 = vector.broadcast %cst_154 : f32 to vector<24x24xf32>
    %370 = arith.mulf %368, %369 : vector<24x24xf32>
    %371 = vector.broadcast %27 : vector<1x24xf32> to vector<24x24xf32>
    %372 = arith.addf %370, %371 : vector<24x24xf32>
    %cst_155 = arith.constant dense<0xFF800000> : vector<24xf32>
    %373 = vector.multi_reduction <maximumf>, %372, %cst_155 [1] : vector<24x24xf32> to vector<24xf32>
    %374 = vector.shape_cast %373 : vector<24xf32> to vector<24x1xf32>
    %375 = vector.broadcast %374 : vector<24x1xf32> to vector<24x24xf32>
    %376 = arith.subf %372, %375 : vector<24x24xf32>
    %377 = math.exp %376 : vector<24x24xf32>
    %cst_156 = arith.constant dense<0.000000e+00> : vector<24xf32>
    %378 = vector.multi_reduction <add>, %377, %cst_156 [1] : vector<24x24xf32> to vector<24xf32>
    %379 = vector.shape_cast %378 : vector<24xf32> to vector<24x1xf32>
    %380 = vector.broadcast %379 : vector<24x1xf32> to vector<24x24xf32>
    %381 = arith.divf %377, %380 : vector<24x24xf32>
    %cst_157 = arith.constant dense<0.000000e+00> : vector<24x8xf32>
    %382 = tpu.matmul %381, %366, %cst_157 {dimension_numbers = #tpu.dot_dimension_numbers<[1], [0], [0], [1], [0, 0, 1, 1], [], []>} : vector<24x24xf32>, vector<24x8xf32>, vector<24x8xf32> -> vector<24x8xf32>
    %383 = vector.extract_strided_slice %289 {offsets = [16, 0], sizes = [8, 32], strides = [1, 1]} : vector<32x32xf32> to vector<8x32xf32>
    %cst_158 = arith.constant dense<0.000000e+00> : vector<24x32xf32>
    %384 = tpu.matmul %382, %383, %cst_158 {dimension_numbers = #tpu.dot_dimension_numbers<[1], [0], [0], [1], [0, 0, 1, 1], [], []>} : vector<24x8xf32>, vector<8x32xf32>, vector<24x32xf32> -> vector<24x32xf32>
    %385 = arith.addf %363, %384 : vector<24x32xf32>
    %386 = vector.extract_strided_slice %318 {offsets = [0, 24], sizes = [24, 8], strides = [1, 1]} : vector<24x96xf32> to vector<24x8xf32>
    %387 = vector.extract_strided_slice %318 {offsets = [0, 56], sizes = [24, 8], strides = [1, 1]} : vector<24x96xf32> to vector<24x8xf32>
    %388 = vector.extract_strided_slice %318 {offsets = [0, 88], sizes = [24, 8], strides = [1, 1]} : vector<24x96xf32> to vector<24x8xf32>
    %389 = tpu.transpose %387, [1, 0] : vector<24x8xf32> -> vector<8x24xf32>
    %cst_159 = arith.constant dense<0.000000e+00> : vector<24x24xf32>
    %390 = tpu.matmul %386, %389, %cst_159 {dimension_numbers = #tpu.dot_dimension_numbers<[1], [0], [0], [1], [0, 0, 1, 1], [], []>} : vector<24x8xf32>, vector<8x24xf32>, vector<24x24xf32> -> vector<24x24xf32>
    %cst_160 = arith.constant 0.353553385 : f32
    %391 = vector.broadcast %cst_160 : f32 to vector<24x24xf32>
    %392 = arith.mulf %390, %391 : vector<24x24xf32>
    %393 = vector.broadcast %27 : vector<1x24xf32> to vector<24x24xf32>
    %394 = arith.addf %392, %393 : vector<24x24xf32>
    %cst_161 = arith.constant dense<0xFF800000> : vector<24xf32>
    %395 = vector.multi_reduction <maximumf>, %394, %cst_161 [1] : vector<24x24xf32> to vector<24xf32>
    %396 = vector.shape_cast %395 : vector<24xf32> to vector<24x1xf32>
    %397 = vector.broadcast %396 : vector<24x1xf32> to vector<24x24xf32>
    %398 = arith.subf %394, %397 : vector<24x24xf32>
    %399 = math.exp %398 : vector<24x24xf32>
    %cst_162 = arith.constant dense<0.000000e+00> : vector<24xf32>
    %400 = vector.multi_reduction <add>, %399, %cst_162 [1] : vector<24x24xf32> to vector<24xf32>
    %401 = vector.shape_cast %400 : vector<24xf32> to vector<24x1xf32>
    %402 = vector.broadcast %401 : vector<24x1xf32> to vector<24x24xf32>
    %403 = arith.divf %399, %402 : vector<24x24xf32>
    %cst_163 = arith.constant dense<0.000000e+00> : vector<24x8xf32>
    %404 = tpu.matmul %403, %388, %cst_163 {dimension_numbers = #tpu.dot_dimension_numbers<[1], [0], [0], [1], [0, 0, 1, 1], [], []>} : vector<24x24xf32>, vector<24x8xf32>, vector<24x8xf32> -> vector<24x8xf32>
    %405 = vector.extract_strided_slice %289 {offsets = [24, 0], sizes = [8, 32], strides = [1, 1]} : vector<32x32xf32> to vector<8x32xf32>
    %cst_164 = arith.constant dense<0.000000e+00> : vector<24x32xf32>
    %406 = tpu.matmul %404, %405, %cst_164 {dimension_numbers = #tpu.dot_dimension_numbers<[1], [0], [0], [1], [0, 0, 1, 1], [], []>} : vector<24x8xf32>, vector<8x32xf32>, vector<24x32xf32> -> vector<24x32xf32>
    %407 = arith.addf %385, %406 : vector<24x32xf32>
    %408 = vector.extract_strided_slice %298 {offsets = [0, 0], sizes = [24, 32], strides = [1, 1]} : vector<48x32xf32> to vector<24x32xf32>
    %409 = arith.addf %408, %407 : vector<24x32xf32>
    %c0_165 = arith.constant 0 : index
    %c0_166 = arith.constant 0 : index
    %410 = vector.load %arg16[%c0_165, %c0_166] : memref<48x32xf32, #tpu.memory_space<vmem>>, vector<24x32xf32>
    tpu.vector_store %arg16[%c0_165, %c0_166], %409 {strides = array<i32>} : memref<48x32xf32, #tpu.memory_space<vmem>>, vector<24x32xf32>,
    %411 = vector.extract_strided_slice %317 {offsets = [24, 0], sizes = [24, 96], strides = [1, 1]} : vector<48x96xf32> to vector<24x96xf32>
    %cst_167 = arith.constant 0.000000e+00 : f32
    %412 = vector.broadcast %cst_167 : f32 to vector<24x32xf32>
    %413 = vector.extract_strided_slice %411 {offsets = [0, 0], sizes = [24, 8], strides = [1, 1]} : vector<24x96xf32> to vector<24x8xf32>
    %414 = vector.extract_strided_slice %411 {offsets = [0, 32], sizes = [24, 8], strides = [1, 1]} : vector<24x96xf32> to vector<24x8xf32>
    %415 = vector.extract_strided_slice %411 {offsets = [0, 64], sizes = [24, 8], strides = [1, 1]} : vector<24x96xf32> to vector<24x8xf32>
    %416 = tpu.transpose %414, [1, 0] : vector<24x8xf32> -> vector<8x24xf32>
    %cst_168 = arith.constant dense<0.000000e+00> : vector<24x24xf32>
    %417 = tpu.matmul %413, %416, %cst_168 {dimension_numbers = #tpu.dot_dimension_numbers<[1], [0], [0], [1], [0, 0, 1, 1], [], []>} : vector<24x8xf32>, vector<8x24xf32>, vector<24x24xf32> -> vector<24x24xf32>
    %cst_169 = arith.constant 0.353553385 : f32
    %418 = vector.broadcast %cst_169 : f32 to vector<24x24xf32>
    %419 = arith.mulf %417, %418 : vector<24x24xf32>
    %420 = vector.broadcast %27 : vector<1x24xf32> to vector<24x24xf32>
    %421 = arith.addf %419, %420 : vector<24x24xf32>
    %cst_170 = arith.constant dense<0xFF800000> : vector<24xf32>
    %422 = vector.multi_reduction <maximumf>, %421, %cst_170 [1] : vector<24x24xf32> to vector<24xf32>
    %423 = vector.shape_cast %422 : vector<24xf32> to vector<24x1xf32>
    %424 = vector.broadcast %423 : vector<24x1xf32> to vector<24x24xf32>
    %425 = arith.subf %421, %424 : vector<24x24xf32>
    %426 = math.exp %425 : vector<24x24xf32>
    %cst_171 = arith.constant dense<0.000000e+00> : vector<24xf32>
    %427 = vector.multi_reduction <add>, %426, %cst_171 [1] : vector<24x24xf32> to vector<24xf32>
    %428 = vector.shape_cast %427 : vector<24xf32> to vector<24x1xf32>
    %429 = vector.broadcast %428 : vector<24x1xf32> to vector<24x24xf32>
    %430 = arith.divf %426, %429 : vector<24x24xf32>
    %cst_172 = arith.constant dense<0.000000e+00> : vector<24x8xf32>
    %431 = tpu.matmul %430, %415, %cst_172 {dimension_numbers = #tpu.dot_dimension_numbers<[1], [0], [0], [1], [0, 0, 1, 1], [], []>} : vector<24x24xf32>, vector<24x8xf32>, vector<24x8xf32> -> vector<24x8xf32>
    %432 = vector.extract_strided_slice %289 {offsets = [0, 0], sizes = [8, 32], strides = [1, 1]} : vector<32x32xf32> to vector<8x32xf32>
    %cst_173 = arith.constant dense<0.000000e+00> : vector<24x32xf32>
    %433 = tpu.matmul %431, %432, %cst_173 {dimension_numbers = #tpu.dot_dimension_numbers<[1], [0], [0], [1], [0, 0, 1, 1], [], []>} : vector<24x8xf32>, vector<8x32xf32>, vector<24x32xf32> -> vector<24x32xf32>
    %434 = arith.addf %412, %433 : vector<24x32xf32>
    %435 = vector.extract_strided_slice %411 {offsets = [0, 8], sizes = [24, 8], strides = [1, 1]} : vector<24x96xf32> to vector<24x8xf32>
    %436 = vector.extract_strided_slice %411 {offsets = [0, 40], sizes = [24, 8], strides = [1, 1]} : vector<24x96xf32> to vector<24x8xf32>
    %437 = vector.extract_strided_slice %411 {offsets = [0, 72], sizes = [24, 8], strides = [1, 1]} : vector<24x96xf32> to vector<24x8xf32>
    %438 = tpu.transpose %436, [1, 0] : vector<24x8xf32> -> vector<8x24xf32>
    %cst_174 = arith.constant dense<0.000000e+00> : vector<24x24xf32>
    %439 = tpu.matmul %435, %438, %cst_174 {dimension_numbers = #tpu.dot_dimension_numbers<[1], [0], [0], [1], [0, 0, 1, 1], [], []>} : vector<24x8xf32>, vector<8x24xf32>, vector<24x24xf32> -> vector<24x24xf32>
    %cst_175 = arith.constant 0.353553385 : f32
    %440 = vector.broadcast %cst_175 : f32 to vector<24x24xf32>
    %441 = arith.mulf %439, %440 : vector<24x24xf32>
    %442 = vector.broadcast %27 : vector<1x24xf32> to vector<24x24xf32>
    %443 = arith.addf %441, %442 : vector<24x24xf32>
    %cst_176 = arith.constant dense<0xFF800000> : vector<24xf32>
    %444 = vector.multi_reduction <maximumf>, %443, %cst_176 [1] : vector<24x24xf32> to vector<24xf32>
    %445 = vector.shape_cast %444 : vector<24xf32> to vector<24x1xf32>
    %446 = vector.broadcast %445 : vector<24x1xf32> to vector<24x24xf32>
    %447 = arith.subf %443, %446 : vector<24x24xf32>
    %448 = math.exp %447 : vector<24x24xf32>
    %cst_177 = arith.constant dense<0.000000e+00> : vector<24xf32>
    %449 = vector.multi_reduction <add>, %448, %cst_177 [1] : vector<24x24xf32> to vector<24xf32>
    %450 = vector.shape_cast %449 : vector<24xf32> to vector<24x1xf32>
    %451 = vector.broadcast %450 : vector<24x1xf32> to vector<24x24xf32>
    %452 = arith.divf %448, %451 : vector<24x24xf32>
    %cst_178 = arith.constant dense<0.000000e+00> : vector<24x8xf32>
    %453 = tpu.matmul %452, %437, %cst_178 {dimension_numbers = #tpu.dot_dimension_numbers<[1], [0], [0], [1], [0, 0, 1, 1], [], []>} : vector<24x24xf32>, vector<24x8xf32>, vector<24x8xf32> -> vector<24x8xf32>
    %454 = vector.extract_strided_slice %289 {offsets = [8, 0], sizes = [8, 32], strides = [1, 1]} : vector<32x32xf32> to vector<8x32xf32>
    %cst_179 = arith.constant dense<0.000000e+00> : vector<24x32xf32>
    %455 = tpu.matmul %453, %454, %cst_179 {dimension_numbers = #tpu.dot_dimension_numbers<[1], [0], [0], [1], [0, 0, 1, 1], [], []>} : vector<24x8xf32>, vector<8x32xf32>, vector<24x32xf32> -> vector<24x32xf32>
    %456 = arith.addf %434, %455 : vector<24x32xf32>
    %457 = vector.extract_strided_slice %411 {offsets = [0, 16], sizes = [24, 8], strides = [1, 1]} : vector<24x96xf32> to vector<24x8xf32>
    %458 = vector.extract_strided_slice %411 {offsets = [0, 48], sizes = [24, 8], strides = [1, 1]} : vector<24x96xf32> to vector<24x8xf32>
    %459 = vector.extract_strided_slice %411 {offsets = [0, 80], sizes = [24, 8], strides = [1, 1]} : vector<24x96xf32> to vector<24x8xf32>
    %460 = tpu.transpose %458, [1, 0] : vector<24x8xf32> -> vector<8x24xf32>
    %cst_180 = arith.constant dense<0.000000e+00> : vector<24x24xf32>
    %461 = tpu.matmul %457, %460, %cst_180 {dimension_numbers = #tpu.dot_dimension_numbers<[1], [0], [0], [1], [0, 0, 1, 1], [], []>} : vector<24x8xf32>, vector<8x24xf32>, vector<24x24xf32> -> vector<24x24xf32>
    %cst_181 = arith.constant 0.353553385 : f32
    %462 = vector.broadcast %cst_181 : f32 to vector<24x24xf32>
    %463 = arith.mulf %461, %462 : vector<24x24xf32>
    %464 = vector.broadcast %27 : vector<1x24xf32> to vector<24x24xf32>
    %465 = arith.addf %463, %464 : vector<24x24xf32>
    %cst_182 = arith.constant dense<0xFF800000> : vector<24xf32>
    %466 = vector.multi_reduction <maximumf>, %465, %cst_182 [1] : vector<24x24xf32> to vector<24xf32>
    %467 = vector.shape_cast %466 : vector<24xf32> to vector<24x1xf32>
    %468 = vector.broadcast %467 : vector<24x1xf32> to vector<24x24xf32>
    %469 = arith.subf %465, %468 : vector<24x24xf32>
    %470 = math.exp %469 : vector<24x24xf32>
    %cst_183 = arith.constant dense<0.000000e+00> : vector<24xf32>
    %471 = vector.multi_reduction <add>, %470, %cst_183 [1] : vector<24x24xf32> to vector<24xf32>
    %472 = vector.shape_cast %471 : vector<24xf32> to vector<24x1xf32>
    %473 = vector.broadcast %472 : vector<24x1xf32> to vector<24x24xf32>
    %474 = arith.divf %470, %473 : vector<24x24xf32>
    %cst_184 = arith.constant dense<0.000000e+00> : vector<24x8xf32>
    %475 = tpu.matmul %474, %459, %cst_184 {dimension_numbers = #tpu.dot_dimension_numbers<[1], [0], [0], [1], [0, 0, 1, 1], [], []>} : vector<24x24xf32>, vector<24x8xf32>, vector<24x8xf32> -> vector<24x8xf32>
    %476 = vector.extract_strided_slice %289 {offsets = [16, 0], sizes = [8, 32], strides = [1, 1]} : vector<32x32xf32> to vector<8x32xf32>
    %cst_185 = arith.constant dense<0.000000e+00> : vector<24x32xf32>
    %477 = tpu.matmul %475, %476, %cst_185 {dimension_numbers = #tpu.dot_dimension_numbers<[1], [0], [0], [1], [0, 0, 1, 1], [], []>} : vector<24x8xf32>, vector<8x32xf32>, vector<24x32xf32> -> vector<24x32xf32>
    %478 = arith.addf %456, %477 : vector<24x32xf32>
    %479 = vector.extract_strided_slice %411 {offsets = [0, 24], sizes = [24, 8], strides = [1, 1]} : vector<24x96xf32> to vector<24x8xf32>
    %480 = vector.extract_strided_slice %411 {offsets = [0, 56], sizes = [24, 8], strides = [1, 1]} : vector<24x96xf32> to vector<24x8xf32>
    %481 = vector.extract_strided_slice %411 {offsets = [0, 88], sizes = [24, 8], strides = [1, 1]} : vector<24x96xf32> to vector<24x8xf32>
    %482 = tpu.transpose %480, [1, 0] : vector<24x8xf32> -> vector<8x24xf32>
    %cst_186 = arith.constant dense<0.000000e+00> : vector<24x24xf32>
    %483 = tpu.matmul %479, %482, %cst_186 {dimension_numbers = #tpu.dot_dimension_numbers<[1], [0], [0], [1], [0, 0, 1, 1], [], []>} : vector<24x8xf32>, vector<8x24xf32>, vector<24x24xf32> -> vector<24x24xf32>
    %cst_187 = arith.constant 0.353553385 : f32
    %484 = vector.broadcast %cst_187 : f32 to vector<24x24xf32>
    %485 = arith.mulf %483, %484 : vector<24x24xf32>
    %486 = vector.broadcast %27 : vector<1x24xf32> to vector<24x24xf32>
    %487 = arith.addf %485, %486 : vector<24x24xf32>
    %cst_188 = arith.constant dense<0xFF800000> : vector<24xf32>
    %488 = vector.multi_reduction <maximumf>, %487, %cst_188 [1] : vector<24x24xf32> to vector<24xf32>
    %489 = vector.shape_cast %488 : vector<24xf32> to vector<24x1xf32>
    %490 = vector.broadcast %489 : vector<24x1xf32> to vector<24x24xf32>
    %491 = arith.subf %487, %490 : vector<24x24xf32>
    %492 = math.exp %491 : vector<24x24xf32>
    %cst_189 = arith.constant dense<0.000000e+00> : vector<24xf32>
    %493 = vector.multi_reduction <add>, %492, %cst_189 [1] : vector<24x24xf32> to vector<24xf32>
    %494 = vector.shape_cast %493 : vector<24xf32> to vector<24x1xf32>
    %495 = vector.broadcast %494 : vector<24x1xf32> to vector<24x24xf32>
    %496 = arith.divf %492, %495 : vector<24x24xf32>
    %cst_190 = arith.constant dense<0.000000e+00> : vector<24x8xf32>
    %497 = tpu.matmul %496, %481, %cst_190 {dimension_numbers = #tpu.dot_dimension_numbers<[1], [0], [0], [1], [0, 0, 1, 1], [], []>} : vector<24x24xf32>, vector<24x8xf32>, vector<24x8xf32> -> vector<24x8xf32>
    %498 = vector.extract_strided_slice %289 {offsets = [24, 0], sizes = [8, 32], strides = [1, 1]} : vector<32x32xf32> to vector<8x32xf32>
    %cst_191 = arith.constant dense<0.000000e+00> : vector<24x32xf32>
    %499 = tpu.matmul %497, %498, %cst_191 {dimension_numbers = #tpu.dot_dimension_numbers<[1], [0], [0], [1], [0, 0, 1, 1], [], []>} : vector<24x8xf32>, vector<8x32xf32>, vector<24x32xf32> -> vector<24x32xf32>
    %500 = arith.addf %478, %499 : vector<24x32xf32>
    %501 = vector.extract_strided_slice %298 {offsets = [24, 0], sizes = [24, 32], strides = [1, 1]} : vector<48x32xf32> to vector<24x32xf32>
    %502 = arith.addf %501, %500 : vector<24x32xf32>
    %c24_192 = arith.constant 24 : index
    %c0_193 = arith.constant 0 : index
    %503 = vector.load %arg16[%c24_192, %c0_193] : memref<48x32xf32, #tpu.memory_space<vmem>>, vector<24x32xf32>
    tpu.vector_store %arg16[%c24_192, %c0_193], %502 {strides = array<i32>} : memref<48x32xf32, #tpu.memory_space<vmem>>, vector<24x32xf32>,
    %c0_194 = arith.constant 0 : index
    %c0_195 = arith.constant 0 : index
    %504 = vector.load %arg16[%c0_194, %c0_195] : memref<48x32xf32, #tpu.memory_space<vmem>>, vector<48x32xf32>
    %cst_196 = arith.constant dense<0.000000e+00> : vector<48xf32>
    %505 = vector.multi_reduction <add>, %504, %cst_196 [1] : vector<48x32xf32> to vector<48xf32>
    %506 = vector.shape_cast %505 : vector<48xf32> to vector<48x1xf32>
    %cst_197 = arith.constant 3.200000e+01 : f32
    %507 = vector.broadcast %cst_197 : f32 to vector<48x1xf32>
    %508 = arith.divf %506, %507 : vector<48x1xf32>
    %509 = vector.broadcast %508 : vector<48x1xf32> to vector<48x32xf32>
    %510 = arith.subf %504, %509 : vector<48x32xf32>
    %511 = arith.mulf %510, %510 : vector<48x32xf32>
    %cst_198 = arith.constant dense<0.000000e+00> : vector<48xf32>
    %512 = vector.multi_reduction <add>, %511, %cst_198 [1] : vector<48x32xf32> to vector<48xf32>
    %513 = vector.shape_cast %512 : vector<48xf32> to vector<48x1xf32>
    %cst_199 = arith.constant 3.200000e+01 : f32
    %514 = vector.broadcast %cst_199 : f32 to vector<48x1xf32>
    %515 = arith.divf %513, %514 : vector<48x1xf32>
    %516 = vector.broadcast %508 : vector<48x1xf32> to vector<48x32xf32>
    %517 = arith.subf %504, %516 : vector<48x32xf32>
    %cst_200 = arith.constant 9.99999974E-6 : f32
    %518 = vector.broadcast %cst_200 : f32 to vector<48x1xf32>
    %519 = arith.addf %515, %518 : vector<48x1xf32>
    %520 = math.rsqrt %519 : vector<48x1xf32>
    %521 = vector.broadcast %520 : vector<48x1xf32> to vector<48x32xf32>
    %522 = arith.mulf %517, %521 : vector<48x32xf32>
    %cst_201 = arith.constant dense<0.000000e+00> : vector<48x128xf32>
    %523 = tpu.matmul %522, %291, %cst_201 {dimension_numbers = #tpu.dot_dimension_numbers<[1], [0], [0], [1], [0, 0, 1, 1], [], []>} : vector<48x32xf32>, vector<32x128xf32>, vector<48x128xf32> -> vector<48x128xf32>
    %524 = vector.broadcast %293 : vector<1x128xf32> to vector<48x128xf32>
    %525 = arith.addf %523, %524 : vector<48x128xf32>
    %cst_202 = arith.constant 5.000000e-01 : f32
    %526 = vector.broadcast %cst_202 : f32 to vector<48x128xf32>
    %527 = arith.mulf %526, %525 : vector<48x128xf32>
    %cst_203 = arith.constant 4.471500e-02 : f32
    %528 = vector.broadcast %cst_203 : f32 to vector<48x128xf32>
    %529 = arith.mulf %528, %525 : vector<48x128xf32>
    %530 = arith.mulf %529, %525 : vector<48x128xf32>
    %531 = arith.mulf %530, %525 : vector<48x128xf32>
    %532 = arith.addf %525, %531 : vector<48x128xf32>
    %cst_204 = arith.constant 0.797884583 : f32
    %533 = vector.broadcast %cst_204 : f32 to vector<48x128xf32>
    %534 = arith.mulf %533, %532 : vector<48x128xf32>
    %535 = math.tanh %534 : vector<48x128xf32>
    %cst_205 = arith.constant 1.000000e+00 : f32
    %536 = vector.broadcast %cst_205 : f32 to vector<48x128xf32>
    %537 = arith.addf %536, %535 : vector<48x128xf32>
    %538 = arith.mulf %527, %537 : vector<48x128xf32>
    %cst_206 = arith.constant dense<0.000000e+00> : vector<48x32xf32>
    %539 = tpu.matmul %538, %295, %cst_206 {dimension_numbers = #tpu.dot_dimension_numbers<[1], [0], [0], [1], [0, 0, 1, 1], [], []>} : vector<48x128xf32>, vector<128x32xf32>, vector<48x32xf32> -> vector<48x32xf32>
    %540 = vector.broadcast %297 : vector<1x32xf32> to vector<48x32xf32>
    %541 = arith.addf %539, %540 : vector<48x32xf32>
    %542 = arith.addf %504, %541 : vector<48x32xf32>
    %c0_207 = arith.constant 0 : index
    %c0_208 = arith.constant 0 : index
    %543 = vector.load %arg16[%c0_207, %c0_208] : memref<48x32xf32, #tpu.memory_space<vmem>>, vector<48x32xf32>
    tpu.vector_store %arg16[%c0_207, %c0_208], %542 {strides = array<i32>} : memref<48x32xf32, #tpu.memory_space<vmem>>, vector<48x32xf32>,
    %c0_209 = arith.constant 0 : index
    %c0_210 = arith.constant 0 : index
    %544 = vector.load %arg16[%c0_209, %c0_210] : memref<48x32xf32, #tpu.memory_space<vmem>>, vector<48x32xf32>
    %cst_211 = arith.constant dense<0.000000e+00> : vector<48xf32>
    %545 = vector.multi_reduction <add>, %544, %cst_211 [1] : vector<48x32xf32> to vector<48xf32>
    %546 = vector.shape_cast %545 : vector<48xf32> to vector<48x1xf32>
    %cst_212 = arith.constant 3.200000e+01 : f32
    %547 = vector.broadcast %cst_212 : f32 to vector<48x1xf32>
    %548 = arith.divf %546, %547 : vector<48x1xf32>
    %549 = vector.broadcast %548 : vector<48x1xf32> to vector<48x32xf32>
    %550 = arith.subf %544, %549 : vector<48x32xf32>
    %551 = arith.mulf %550, %550 : vector<48x32xf32>
    %cst_213 = arith.constant dense<0.000000e+00> : vector<48xf32>
    %552 = vector.multi_reduction <add>, %551, %cst_213 [1] : vector<48x32xf32> to vector<48xf32>
    %553 = vector.shape_cast %552 : vector<48xf32> to vector<48x1xf32>
    %cst_214 = arith.constant 3.200000e+01 : f32
    %554 = vector.broadcast %cst_214 : f32 to vector<48x1xf32>
    %555 = arith.divf %553, %554 : vector<48x1xf32>
    %556 = vector.broadcast %548 : vector<48x1xf32> to vector<48x32xf32>
    %557 = arith.subf %544, %556 : vector<48x32xf32>
    %cst_215 = arith.constant 9.99999974E-6 : f32
    %558 = vector.broadcast %cst_215 : f32 to vector<48x1xf32>
    %559 = arith.addf %555, %558 : vector<48x1xf32>
    %560 = math.rsqrt %559 : vector<48x1xf32>
    %561 = vector.broadcast %560 : vector<48x1xf32> to vector<48x32xf32>
    %562 = arith.mulf %557, %561 : vector<48x32xf32>
    %c0_216 = arith.constant 0 : index
    %c0_217 = arith.constant 0 : index
    %563 = vector.load %arg11[%c0_216, %c0_217] : memref<1x32xf32, #tpu.memory_space<vmem>>, vector<1x32xf32>
    %564 = vector.broadcast %563 : vector<1x32xf32> to vector<48x32xf32>
    %565 = arith.mulf %562, %564 : vector<48x32xf32>
    %c0_218 = arith.constant 0 : index
    %c0_219 = arith.constant 0 : index
    %566 = vector.load %arg12[%c0_218, %c0_219] : memref<1x32xf32, #tpu.memory_space<vmem>>, vector<1x32xf32>
    %567 = vector.broadcast %566 : vector<1x32xf32> to vector<48x32xf32>
    %568 = arith.addf %565, %567 : vector<48x32xf32>
    %c0_220 = arith.constant 0 : index
    %c0_221 = arith.constant 0 : index
    %569 = vector.load %arg13[%c0_220, %c0_221] : memref<32x10xf32, #tpu.memory_space<vmem>>, vector<32x10xf32>
    %cst_222 = arith.constant dense<0.000000e+00> : vector<48x10xf32>
    %570 = tpu.matmul %568, %569, %cst_222 {dimension_numbers = #tpu.dot_dimension_numbers<[1], [0], [0], [1], [0, 0, 1, 1], [], []>} : vector<48x32xf32>, vector<32x10xf32>, vector<48x10xf32> -> vector<48x10xf32>
    %c0_223 = arith.constant 0 : index
    %c0_224 = arith.constant 0 : index
    %571 = vector.load %arg14[%c0_223, %c0_224] : memref<1x10xf32, #tpu.memory_space<vmem>>, vector<1x10xf32>
    %572 = vector.broadcast %571 : vector<1x10xf32> to vector<48x10xf32>
    %573 = arith.addf %570, %572 : vector<48x10xf32>
    %574 = vector.extract_strided_slice %573 {offsets = [0, 0], sizes = [1, 10], strides = [1, 1]} : vector<48x10xf32> to vector<1x10xf32>
    %c0_225 = arith.constant 0 : index
    %c0_226 = arith.constant 0 : index
    %575 = vector.load %arg15[%c0_225, %c0_226] : memref<2x10xf32, #tpu.memory_space<vmem>>, vector<1x10xf32>
    tpu.vector_store %arg15[%c0_225, %c0_226], %574 {strides = array<i32>} : memref<2x10xf32, #tpu.memory_space<vmem>>, vector<1x10xf32>,
    %576 = vector.extract_strided_slice %573 {offsets = [24, 0], sizes = [1, 10], strides = [1, 1]} : vector<48x10xf32> to vector<1x10xf32>
    %c1_227 = arith.constant 1 : index
    %c0_228 = arith.constant 0 : index
    %577 = vector.load %arg15[%c1_227, %c0_228] : memref<2x10xf32, #tpu.memory_space<vmem>>, vector<1x10xf32>
    tpu.vector_store %arg15[%c1_227, %c0_228], %576 {strides = array<i32>} : memref<2x10xf32, #tpu.memory_space<vmem>>, vector<1x10xf32>,
    return
  }
}

</mosaic_0001>

<bundles_post_ra>
// kernel: tpu_custom_call.1
= control target key start
LH: loop header
LB: loop body
LE: loop exit
PB: predicated region body
PF: predicated region fallthrough
CT: control target
= control target key end

     0   :  { %vm68_vm0 = vcmask 392192   ;;  %s10587_s0 = inlined_call_operand.vmem [shape: f32[32,48], index: 0, kind: input, shape index: {}]   ;;  %s10588_s1 = inlined_call_operand.vmem [shape: f32[48,32], index: 1, kind: input, shape index: {}]   ;;  %s10589_s2 = inlined_call_operand.vmem [shape: f32[1,32], index: 2, kind: input, shape index: {}]   ;;  %s10590_s3 = inlined_call_operand.vmem [shape: f32[1,32], index: 3, kind: input, shape index: {}]   ;;  %s10591_s4 = inlined_call_operand.vmem [shape: f32[17,32], index: 4, kind: input, shape index: {}]   ;;  %s10592_s5 = inlined_call_operand.vmem [shape: f32[2,32,96], index: 5, kind: input, shape index: {}]   ;;  %s10593_s6 = inlined_call_operand.vmem [shape: f32[2,32,32], index: 6, kind: input, shape index: {}]   ;;  %s10594_s7 = inlined_call_operand.vmem [shape: f32[2,32,128], index: 7, kind: input, shape index: {}]   ;;  %s10595_s8 = inlined_call_operand.vmem [shape: f32[2,1,128], index: 8, kind: input, shape index: {}]   ;;  %s10596_s9 = inlined_call_operand.vmem [shape: f32[2,128,32], index: 9, kind: input, shape index: {}]   ;;  %s10597_s10 = inlined_call_operand.vmem [shape: f32[2,1,32], index: 10, kind: input, shape index: {}]   ;;  %s10598_s11 = inlined_call_operand.vmem [shape: f32[1,32], index: 11, kind: input, shape index: {}]   ;;  %s10599_s12 = inlined_call_operand.vmem [shape: f32[1,32], index: 12, kind: input, shape index: {}]   ;;  %s10600_s13 = inlined_call_operand.vmem [shape: f32[32,10], index: 13, kind: input, shape index: {}]   ;;  %s10601_s14 = inlined_call_operand.vmem [shape: f32[1,10], index: 14, kind: input, shape index: {}]   ;;  %s10602_s15 = inlined_call_operand.hbm [shape: f32[2,10], index: 15, kind: output, shape index: {}]  }
   0x1   :  { %v60_v0 = vld [vmem:[%s10588_s1 + $0x28] sm:$0xff]  ;;  %v59_v1 = vld [vmem:[%s10588_s1 + $0x20] sm:$0xff]  ;;  %v58_v2 = vld [vmem:[%s10588_s1 + $0x18] sm:$0xff] }
   0x2   :  { %7594 = vmatprep.subr.mxu0 %v60_v0  ;;  %v51_v3 = vld [vmem:[%s10587_s0] sm:$0xff] }
   0x3   :  { %7595 = vmatpush3.msra.mxu0 %v60_v0  ;;  %7606 = vmatprep.mubr.msk.f32.mxu0 %vm68_vm0, %v51_v3 }
   0x4   :  { %7596 = vmatprep.subr.mxu0 %v59_v1 }
   0x5   :  { %20 = vsyncpa [#allocation4], 0  ;;  %7597 = vmatpush3.msra.mxu0 %v59_v1  ;;  %v57_v4 = vld [vmem:[%s10588_s1 + $0x10] sm:$0xff]  ;;  %v56_v5 = vld [vmem:[%s10588_s1 + $0x8] sm:$0xff]  ;;  %vm171_vm1 = vcmask 261120   ;;  %v8766_v10 = vmov 0.0  }
   0x6   :  { %7598 = vmatprep.subr.mxu0 %v58_v2  ;;  %v55_v6 = vld [vmem:[%s10588_s1] sm:$0xff]  ;;  %v52_v7 = vld [vmem:[%s10587_s0 + $0x8] sm:$0xff]  ;;  %v53_v8 = vld [vmem:[%s10587_s0 + $0x10] sm:$0xff]  ;;  %173 = vst.msk [vmem:[#allocation2 + $0x8] sm:$0xff] %vm171_vm1, %v8766_v10  ;;  %vm178_vm2 = vcmask 253952   ;;  %vm183_vm3 = vcmask 1046528  }
   0x7   :  { %7599 = vmatpush3.msra.mxu0 %v58_v2  ;;  %v54_v9 = vld [vmem:[%s10587_s0 + $0x18] sm:$0xff]  ;;  %174 = vst.msk [vmem:[#allocation2 + $0x10] sm:$0xff] %vm171_vm1, %v8766_v10  ;;  %172 = vst.msk [vmem:[#allocation2] sm:$0xff] %vm171_vm1, %v8766_v10  ;;  %v166_v11 = vld [vmem:[%s10591_s4] sm:$0xff]  ;;  %s8767_s21 = smov 96   ;;  %vm8768_vm4 = vmmov 0  }
   0x8   :  { %7600 = vmatprep.subr.mxu0 %v57_v4  ;;  %175 = vst.msk [vmem:[#allocation2 + $0x18] sm:$0xff] %vm171_vm1, %v8766_v10  ;;  %176 = vst.msk [vmem:[#allocation2 + $0x20] sm:$0xff] %vm171_vm1, %v8766_v10  ;;  %v169_v12 = vld [vmem:[%s10590_s3] sm:$0x1]  ;;  %v167_v14 = vld [vmem:[%s10591_s4 + $0x8] sm:$0xff]  ;;  %v184_v19 = vrot.slane %v166_v11, 1 }
   0x9   :  { %7601 = vmatpush3.msra.mxu0 %v57_v4  ;;  %177 = vst.msk [vmem:[#allocation2 + $0x28] sm:$0xff] %vm171_vm1, %v8766_v10  ;;  %v170_v13 = vadd.f32 %v169_v12, %v166_v11  ;;  %v168_v15 = vld [vmem:[%s10591_s4 + $0x10] sm:$0x1]  ;;  %v185_v16 = vrot.slane %v167_v14, 1  ;;  %v6970_v18 = vld [vmem:[%s10589_s2] ss:$0 sm:$0xff] }
   0xa   :  { %7602 = vmatprep.subr.mxu0 %v56_v5  ;;  %v187_v17 = vrot.slane %v168_v15, 1  ;;  %v207_v2 = vld [vmem:[%s10592_s5 + $0x18] sm:$0xff]  ;;  %v206_v3 = vld [vmem:[%s10592_s5 + $0x10] sm:$0xff]  ;;  %v205_v4 = vld [vmem:[%s10592_s5 + $0x8] sm:$0xff]  ;;  %vm441_vm5 = vcmask 64512   ;;  %vm540_vm7 = vcmask 195584  }
   0xb   :  { %7603 = vmatpush3.msra.mxu0 %v56_v5  ;;  %179 = vst.msk [vmem:[#allocation2] sm:$0x1] %vm178_vm2, %v170_v13  ;;  %195 = vst.msk [vmem:[#allocation2 + $0x18] sm:$0x1] %vm178_vm2, %v170_v13  ;;  %v186_v24 = vsel %vm183_vm3, %v184_v19, %v185_v16  ;;  %7612 = vmatprep.subr.mxu1 %v207_v2  ;;  %v204_v5 = vld [vmem:[%s10592_s5] sm:$0xff]  ;;  %s8770_s22 = smov 64  }
   0xc   :  { %7604 = vmatprep.subr.mxu0 %v55_v6  ;;  %v188_v21 = vsel %vm183_vm3, %v185_v16, %v187_v17  ;;  %7613 = vmatpush3.msra.mxu1 %v207_v2  ;;  %s8771_s0 = smov 88   ;;  %s8772_s1 = smov 120   ;;  %vm6953_vm8 = vcmask 73728  }
   0xd   :  { %7605 = vmatpush3.msra.mxu0 %v55_v6  ;;  %7614 = vmatprep.subr.mxu1 %v206_v3  ;;  %s8773_s23 = smov 56   ;;  %s8774_s24 = smov 80  }
   0xe   :  { %7607 = vmatmul.mubr.msk.f32.vlgmr.msra.gmra.mxu0 %vm68_vm0, %v52_v7  ;;  %7644 = vmatprep.subr.mxu0 %v8766_v10  ;;  %s8775_s25 = smov 112   ;;  %s8776_s30 = smov 48  }
   0xf   :  { %7609 = vmatprep.mubr.msk.f32.mxu0 %vm68_vm0, %v53_v8  ;;  %7615 = vmatpush3.msra.mxu1 %v206_v3  ;;  %s8777_s2 = smov 72   ;;  %s8778_s3 = smov 104  }
  0x10   :  { %7616 = vmatprep.subr.mxu1 %v205_v4  ;;  %s8779_s17 = smov 40  }
  0x11   :  { %7617 = vmatpush3.msra.mxu1 %v205_v4 }
  0x12   :  { %7610 = vmatmul.mubr.msk.f32.gmra.mxu0 %vm68_vm0, %v54_v9  ;;  %7618 = vmatprep.subr.mxu1 %v204_v5 }
  0x13   :  { %7619 = vmatpush3.msra.mxu1 %v204_v5  ;;  %7650 = vmatprep.mubr.msk.f32.mxu0 %vm8768_vm4, %v8766_v10 }
  0x14   :  { %7629 = vmatprep.subr.mxu1 %v8766_v10 }
  0xce   :  { %v7608_v20 = vpop.f32.mrf.mxu0 }
  0xcf   :  { %v153_v22 = vadd.f32 %v7608_v20, %v6970_v18 }
  0xd0   :  { %v147_v23 = vpop.f32.mrf.mxu0 }
  0xd1   :  { %v192_v25 = vadd.f32 %v188_v21, %v153_v22  ;;  %v148_v26 = vadd.f32 %v6970_v18, %v147_v23 }
  0xd2   :  { %v7611_v27 = vpop.f32.mrf.mxu0 }
  0xd3   :  { %194 = vst.msk [vmem:[#allocation2 + $0x9] sm:$0xff] %vm171_vm1, %v192_v25  ;;  %v191_v28 = vadd.f32 %v186_v24, %v148_v26  ;;  %v163_v29 = vadd.f32 %v7611_v27, %v6970_v18 }
  0xd4   :  { %v157_v30 = vpop.f32.mrf.mxu0 }
  0xd5   :  { %193 = vst.msk [vmem:[#allocation2 + $0x1] sm:$0xff] %vm171_vm1, %v191_v28  ;;  %v197_v31 = vadd.f32 %v188_v21, %v163_v29  ;;  %v158_v32 = vadd.f32 %v6970_v18, %v157_v30 }
  0xd7   :  { %199 = vst.msk [vmem:[#allocation2 + $0x21] sm:$0xff] %vm171_vm1, %v197_v31  ;;  %v196_v33 = vadd.f32 %v186_v24, %v158_v32 }
  0xd9   :  { %198 = vst.msk [vmem:[#allocation2 + $0x19] sm:$0xff] %vm171_vm1, %v196_v33 }
  0xda   :  { %v236_v34 = vld [vmem:[#allocation2 + $0x10] sm:$0xff] }
  0xdb   :  { %v246_v35 = vsel %vm171_vm1, %v236_v34, 0.0 }
  0xdc   :  { %247 = vadd.xlane.f32.xlu1 %v246_v35  ;;  %v234_v36 = vld [vmem:[#allocation2] sm:$0xff]  ;;  %v235_v38 = vld [vmem:[#allocation2 + $0x8] sm:$0xff] }
  0xdd   :  { %v240_v37 = vsel %vm171_vm1, %v234_v36, 0.0  ;;  %v243_v41 = vsel %vm171_vm1, %v235_v38, 0.0 }
  0xde   :  { %241 = vadd.xlane.f32.xlu0 %v240_v37  ;;  %v239_v0 = vld [vmem:[#allocation2 + $0x28] sm:$0xff] }
  0xdf   :  { %v255_v1 = vsel %vm171_vm1, %v239_v0, 0.0 }
  0xe0   :  { %v237_v39 = vld [vmem:[#allocation2 + $0x18] sm:$0xff]  ;;  %v238_v61 = vld [vmem:[#allocation2 + $0x20] sm:$0xff] }
  0xe1   :  { %v249_v40 = vsel %vm171_vm1, %v237_v39, 0.0  ;;  %v252_v62 = vsel %vm171_vm1, %v238_v61, 0.0 }
  0xe2   :  { %250 = vadd.xlane.f32.xlu1 %v249_v40  ;;  %244 = vadd.xlane.f32.xlu0 %v243_v41 }
 0x165   :  { %v248_v42 = vpop.xlane.xlu1 %247 }
 0x166   :  { %v261_v43 = vmul.f32 0.03125, %v248_v42 }
 0x167   :  { %v242_v44 = vpop.xlane.xlu0 %241 }
 0x168   :  { %v259_v45 = vmul.f32 0.03125, %v242_v44  ;;  %v8931_v46 = vsub.f32 %v236_v34, %v261_v43 }
 0x16a   :  { %v8933_v47 = vsub.f32 %v234_v36, %v259_v45  ;;  %v273_v56 = vmul.f32 %v8931_v46, %v8931_v46 }
 0x16b   :  { %v251_v48 = vpop.xlane.xlu1 %250  ;;  %v245_v49 = vpop.xlane.xlu0 %244 }
 0x16c   :  { %v262_v50 = vmul.f32 0.03125, %v251_v48  ;;  %v260_v51 = vmul.f32 0.03125, %v245_v49  ;;  %v271_v52 = vmul.f32 %v8933_v47, %v8933_v47  ;;  %v283_v58 = vsel %vm171_vm1, %v273_v56, 0.0 }
 0x16e   :  { %v8937_v53 = vsub.f32 %v237_v39, %v262_v50  ;;  %v8939_v54 = vsub.f32 %v235_v38, %v260_v51  ;;  %v277_v55 = vsel %vm171_vm1, %v271_v52, 0.0 }
 0x16f   :  { %278 = vadd.xlane.f32.xlu0 %v277_v55 }
 0x170   :  { %v272_v57 = vmul.f32 %v8939_v54, %v8939_v54  ;;  %v274_v60 = vmul.f32 %v8937_v53, %v8937_v53 }
 0x172   :  { %v280_v59 = vsel %vm171_vm1, %v272_v57, 0.0  ;;  %v286_v63 = vsel %vm171_vm1, %v274_v60, 0.0 }
 0x173   :  { %284 = vadd.xlane.f32.xlu0 %v283_v58  ;;  %281 = vadd.xlane.f32.xlu1 %v280_v59  ;;  %v8769_v59 = vmov -1e+30  }
 0x177   :  { %253 = vadd.xlane.f32.xlu0 %v252_v62  ;;  %287 = vadd.xlane.f32.xlu1 %v286_v63 }
 0x17b   :  { %256 = vadd.xlane.f32.xlu1 %v255_v1 }
 0x1f8   :  { %v279_v6 = vpop.xlane.xlu0 %278 }
 0x1f9   :  { %v295_v7 = vmul.f32 0.03125, %v279_v6 }
 0x1fb   :  { %v301_v8 = vadd.f32 1e-05, %v295_v7 }
 0x1fc   :  { %v282_v9 = vpop.xlane.xlu1 %281  ;;  %v285_v11 = vpop.xlane.xlu0 %284 }
 0x1fd   :  { %8456 = vrsqrt.f32 %v301_v8  ;;  %v296_v12 = vmul.f32 0.03125, %v282_v9  ;;  %v297_v13 = vmul.f32 0.03125, %v285_v11 }
 0x1ff   :  { %v302_v14 = vadd.f32 1e-05, %v296_v12  ;;  %v303_v15 = vadd.f32 1e-05, %v297_v13 }
 0x200   :  { %v288_v16 = vpop.xlane.xlu1 %287  ;;  %v254_v17 = vpop.xlane.xlu0 %253 }
 0x201   :  { %8458 = vrsqrt.f32 %v302_v14  ;;  %v298_v18 = vmul.f32 0.03125, %v288_v16  ;;  %v263_v19 = vmul.f32 0.03125, %v254_v17 }
 0x202   :  { %8460 = vrsqrt.f32 %v303_v15 }
 0x203   :  { %v304_v20 = vadd.f32 1e-05, %v298_v18  ;;  %v269_v21 = vsub.f32 %v238_v61, %v263_v19 }
 0x204   :  { %v257_v22 = vpop.xlane.xlu1 %256 }
 0x205   :  { %8462 = vrsqrt.f32 %v304_v20  ;;  %v264_v23 = vmul.f32 0.03125, %v257_v22  ;;  %v275_v24 = vmul.f32 %v269_v21, %v269_v21 }
 0x207   :  { %v270_v25 = vsub.f32 %v239_v0, %v264_v23  ;;  %v289_v26 = vsel %vm171_vm1, %v275_v24, 0.0 }
 0x208   :  { %290 = vadd.xlane.f32.xlu0 %v289_v26 }
 0x209   :  { %v276_v27 = vmul.f32 %v270_v25, %v270_v25 }
 0x20a   :  { %v8457_v28 = vpop.eup %8456 }
 0x20b   :  { %v292_v29 = vsel %vm171_vm1, %v276_v27, 0.0  ;;  %v313_v30 = vmul.f32 %v8457_v28, %v8933_v47 }
 0x20c   :  { %293 = vadd.xlane.f32.xlu1 %v292_v29 }
 0x20d   :  { %7620 = vmatprep.mubr.msk.f32.mxu1 %vm171_vm1, %v313_v30 }
 0x20e   :  { %v8459_v31 = vpop.eup %8458 }
 0x20f   :  { %v8461_v32 = vpop.eup %8460  ;;  %v314_v33 = vmul.f32 %v8459_v31, %v8939_v54  ;;  %v200_v54 = vlaneseq }
 0x210   :  { %v315_v34 = vmul.f32 %v8461_v32, %v8931_v46 }
 0x211   :  { %7621 = vmatmul.mubr.msk.f32.vlgmr.msra.gmra.mxu1 %vm171_vm1, %v314_v33  ;;  %v201_v55 = vand.u32 127, %v200_v54 }
 0x212   :  { %v8463_v35 = vpop.eup %8462  ;;  %7623 = vmatprep.mubr.msk.f32.mxu1 %vm171_vm1, %v315_v34 }
 0x213   :  { %v316_v36 = vmul.f32 %v8463_v35, %v8937_v53  ;;  %vm202_vm6 = vcmp.lt.s32.totalorder %v201_v55, 17 }
 0x214   :  { %v9018_v60 = vsel %vm202_vm6, 0.0, %v8769_v59 }
 0x215   :  { %7624 = vmatmul.mubr.msk.f32.gmra.mxu1 %vm171_vm1, %v316_v36 }
 0x291   :  { %v291_v37 = vpop.xlane.xlu0 %290 }
 0x292   :  { %v299_v38 = vmul.f32 0.03125, %v291_v37 }
 0x294   :  { %v305_v39 = vadd.f32 1e-05, %v299_v38 }
 0x295   :  { %v294_v40 = vpop.xlane.xlu1 %293 }
 0x296   :  { %8464 = vrsqrt.f32 %v305_v39  ;;  %v300_v41 = vmul.f32 0.03125, %v294_v40 }
 0x298   :  { %v306_v42 = vadd.f32 1e-05, %v300_v41 }
 0x29a   :  { %8466 = vrsqrt.f32 %v306_v42 }
 0x2a3   :  { %v8465_v43 = vpop.eup %8464 }
 0x2a4   :  { %v317_v44 = vmul.f32 %v8465_v43, %v269_v21 }
 0x2a6   :  { %7626 = vmatprep.mubr.msk.f32.mxu1 %vm171_vm1, %v317_v44 }
 0x2a7   :  { %v8467_v45 = vpop.eup %8466 }
 0x2a8   :  { %v318_v46 = vmul.f32 %v8467_v45, %v270_v25 }
 0x2aa   :  { %7627 = vmatmul.mubr.msk.f32.gmra.mxu1 %vm171_vm1, %v318_v46 }
 0x2ab   :  { %7635 = vmatprep.mubr.msk.f32.mxu1 %vm8768_vm4, %v8766_v10 }
 0x2d1   :  { %v8978_v47 = vpop.f32.mrf.mxu1 }
 0x2d2   :  { %437 = vrot.lane.b32.xlu1 %v8978_v47, %s8767_s21 }
 0x2d3   :  { %v8982_v48 = vpop.f32.mrf.mxu1 }
 0x2d5   :  { %v8988_v49 = vpop.f32.mrf.mxu1 }
 0x2d6   :  { %435 = vrot.lane.b32.xlu1 %v8982_v48, %s8767_s21 }
 0x2d7   :  { %v8992_v50 = vpop.f32.mrf.mxu1 }
 0x2d8   :  { %439 = vrot.lane.b32.xlu0 %v8992_v50, %s8767_s21 }
 0x344   :  { %v438_v52 = vpop.permute.xlu1 %437 }
 0x348   :  { %v436_v53 = vpop.permute.xlu1 %435 }
 0x34a   :  { %v440_v51 = vpop.permute.xlu0 %439 }
 0x34b   :  { %7630 = vmatpush3.xpose.msk.msra.mxu1 %vm441_vm5, %v440_v51 }
 0x34c   :  { %7631 = vmatprep.subr.mxu1 %v8766_v10 }
 0x34f   :  { %7632 = vmatpush3.xpose.msk.msra.mxu1 %vm441_vm5, %v438_v52 }
 0x350   :  { %7633 = vmatprep.subr.mxu1 %v8766_v10 }
 0x353   :  { %7634 = vmatpush3.xpose.msk.msra.mxu1 %vm441_vm5, %v436_v53 }
 0x354   :  { %8435 = vmatprep.subr.mxu1 %v8766_v10 }
 0x356   :  { %7636 = vmatmul.mubr.msk.f32.vlgmr.msra.gmra.mxu1 %vm441_vm5, %v8982_v48 }
 0x357   :  { %7638 = vmatprep.mubr.msk.f32.mxu1 %vm8768_vm4, %v8766_v10 }
 0x35a   :  { %7639 = vmatmul.mubr.msk.f32.gmra.mxu1 %vm441_vm5, %v8978_v47 }
 0x35b   :  { %7641 = vmatprep.mubr.msk.f32.mxu1 %vm8768_vm4, %v8766_v10 }
 0x35e   :  { %7642 = vmatmul.mubr.msk.f32.gmra.mxu1 %vm441_vm5, %v8992_v50 }
 0x35f   :  { %7686 = vmatprep.mubr.msk.f32.mxu1 %vm8768_vm4, %v8766_v10 }
 0x36a   :  { %v9014_v56 = vpop.f32.mrf.mxu1 }
 0x36c   :  { %v9016_v57 = vpop.f32.mrf.mxu1 }
 0x416   :  { %v520_v58 = vpop.f32.mrf.mxu1 }
 0x417   :  { %v534_v61 = vmul.f32 0.35355338, %v520_v58 }
 0x418   :  { %v7637_v62 = vpop.f32.mrf.mxu1 }
 0x419   :  { %v537_v63 = vadd.f32 %v534_v61, %v9018_v60 }
 0x41a   :  { %v525_v0 = vpop.f32.mrf.mxu1 }
 0x41b   :  { %v535_v1 = vmul.f32 0.35355338, %v525_v0  ;;  %v541_v2 = vsel %vm540_vm7, %v537_v63, -inf }
 0x41c   :  { %542 = vmax.xlane.f32.xlu1 %v541_v2  ;;  %v7640_v3 = vpop.f32.mrf.mxu1 }
 0x41d   :  { %v538_v4 = vadd.f32 %v535_v1, %v9018_v60 }
 0x41e   :  { %v530_v5 = vpop.f32.mrf.mxu1 }
 0x41f   :  { %v536_v6 = vmul.f32 0.35355338, %v530_v5  ;;  %v544_v7 = vsel %vm540_vm7, %v538_v4, -inf }
 0x420   :  { %545 = vmax.xlane.f32.xlu0 %v544_v7  ;;  %v7643_v8 = vpop.f32.mrf.mxu1 }
 0x421   :  { %v539_v9 = vadd.f32 %v536_v6, %v9018_v60 }
 0x423   :  { %v547_v11 = vsel %vm540_vm7, %v539_v9, -inf }
 0x424   :  { %548 = vmax.xlane.f32.xlu0 %v547_v11 }
 0x42d   :  { %578 = vrot.lane.b32.xlu1 %v8992_v50, %s8770_s22 }
 0x431   :  { %574 = vrot.lane.b32.xlu1 %v8982_v48, %s8770_s22 }
 0x435   :  { %682 = vrot.lane.b32.xlu1 %v8992_v50, %s8771_s0 }
 0x439   :  { %680 = vrot.lane.b32.xlu1 %v8978_v47, %s8771_s0 }
 0x4a5   :  { %v543_v12 = vpop.xlane.xlu1 %542 }
 0x4a6   :  { %v550_v13 = vsub.f32 %v537_v63, %v543_v12 }
 0x4a8   :  { %v553_v14 = vmul.f32 1.442695, %v550_v13 }
 0x4a9   :  { %v579_v15 = vpop.permute.xlu1 %578  ;;  %v546_v16 = vpop.xlane.xlu0 %545 }
 0x4aa   :  { %8468 = vpow2.f32 %v553_v14  ;;  %v551_v17 = vsub.f32 %v538_v4, %v546_v16  ;;  %7645 = vmatpush3.msra.mxu0 %v579_v15 }
 0x4ab   :  { %7646 = vmatprep.subr.mxu0 %v8766_v10 }
 0x4ac   :  { %v555_v18 = vmul.f32 1.442695, %v551_v17 }
 0x4ad   :  { %v549_v23 = vpop.xlane.xlu0 %548  ;;  %v575_v28 = vpop.permute.xlu1 %574 }
 0x4ae   :  { %8470 = vpow2.f32 %v555_v18  ;;  %v552_v24 = vsub.f32 %v539_v9, %v549_v23 }
 0x4b0   :  { %v557_v25 = vmul.f32 1.442695, %v552_v24 }
 0x4b1   :  { %v683_v29 = vpop.permute.xlu1 %682 }
 0x4b2   :  { %8472 = vpow2.f32 %v557_v25 }
 0x4b5   :  { %v681_v30 = vpop.permute.xlu1 %680 }
 0x4b7   :  { %v8469_v19 = vpop.eup %8468 }
 0x4b8   :  { %v559_v20 = vsel %vm540_vm7, %v8469_v19, 0.0 }
 0x4b9   :  { %560 = vadd.xlane.f32.xlu0 %v559_v20 }
 0x4bb   :  { %v8471_v21 = vpop.eup %8470 }
 0x4bc   :  { %v562_v22 = vsel %vm540_vm7, %v8471_v21, 0.0 }
 0x4bd   :  { %563 = vadd.xlane.f32.xlu1 %v562_v22 }
 0x4bf   :  { %v8473_v26 = vpop.eup %8472 }
 0x4c0   :  { %v565_v27 = vsel %vm540_vm7, %v8473_v26, 0.0 }
 0x4ce   :  { %672 = vrot.lane.b32.xlu1 %v8982_v48, %s8772_s1 }
 0x4cf   :  { %576 = vrot.lane.b32.xlu0 %v8978_v47, %s8770_s22 }
 0x4d2   :  { %676 = vrot.lane.b32.xlu1 %v8992_v50, %s8772_s1 }
 0x4ee   :  { %566 = vadd.xlane.f32.xlu0 %v565_v27 }
 0x504   :  { %678 = vrot.lane.b32.xlu0 %v8982_v48, %s8771_s0 }
 0x508   :  { %674 = vrot.lane.b32.xlu0 %v8978_v47, %s8772_s1 }
 0x542   :  { %v561_v31 = vpop.xlane.xlu0 %560 }
 0x543   :  { %8474 = vrcp.f32 %v561_v31 }
 0x546   :  { %v564_v32 = vpop.xlane.xlu1 %563  ;;  %v577_v33 = vpop.permute.xlu0 %576 }
 0x547   :  { %8476 = vrcp.f32 %v564_v32  ;;  %7647 = vmatpush3.msra.mxu0 %v577_v33  ;;  %v9116_v33 = vld [vmem:[%s10593_s6 + $0x8] sm:$0xff] }
 0x548   :  { %7648 = vmatprep.subr.mxu0 %v8766_v10 }
 0x549   :  { %7649 = vmatpush3.msra.mxu0 %v575_v28 }
 0x54a   :  { %7659 = vmatprep.subr.mxu0 %v8766_v10  ;;  %v673_v42 = vpop.permute.xlu1 %672 }
 0x54e   :  { %v677_v44 = vpop.permute.xlu1 %676 }
 0x550   :  { %v8475_v34 = vpop.eup %8474 }
 0x551   :  { %v569_v35 = vmul.f32 %v8475_v34, %v8469_v19 }
 0x553   :  { %7651 = vmatmul.mubr.msk.f32.vlgmr.msra.gmra.mxu0 %vm540_vm7, %v569_v35 }
 0x554   :  { %v8477_v36 = vpop.eup %8476  ;;  %7660 = vmatpush3.xpose.msk.msra.mxu0 %vm441_vm5, %v683_v29  ;;  %7653 = vmatprep.mubr.msk.f32.mxu0 %vm8768_vm4, %v8766_v10 }
 0x555   :  { %7661 = vmatprep.subr.mxu0 %v8766_v10  ;;  %v571_v37 = vmul.f32 %v8477_v36, %v8471_v21 }
 0x557   :  { %7654 = vmatmul.mubr.msk.f32.gmra.mxu0 %vm540_vm7, %v571_v37 }
 0x558   :  { %7662 = vmatpush3.xpose.msk.msra.mxu0 %vm441_vm5, %v681_v30  ;;  %7656 = vmatprep.mubr.msk.f32.mxu0 %vm8768_vm4, %v8766_v10 }
 0x559   :  { %7663 = vmatprep.subr.mxu0 %v8766_v10 }
 0x577   :  { %v567_v38 = vpop.xlane.xlu0 %566 }
 0x578   :  { %8478 = vrcp.f32 %v567_v38  ;;  %v9129_v38 = vld [vmem:[%s10593_s6] sm:$0xff] }
 0x57b   :  { %v679_v39 = vpop.permute.xlu0 %678 }
 0x57c   :  { %7664 = vmatpush3.xpose.msk.msra.mxu0 %vm441_vm5, %v679_v39 }
 0x57d   :  { %7674 = vmatprep.subr.mxu0 %v8766_v10 }
 0x57f   :  { %v675_v43 = vpop.permute.xlu0 %674 }
 0x585   :  { %v8479_v40 = vpop.eup %8478 }
 0x586   :  { %v573_v41 = vmul.f32 %v8479_v40, %v8473_v26 }
 0x588   :  { %7657 = vmatmul.mubr.msk.f32.gmra.mxu0 %vm540_vm7, %v573_v41 }
 0x589   :  { %7665 = vmatprep.mubr.msk.f32.mxu0 %vm8768_vm4, %v8766_v10 }
 0x58c   :  { %7666 = vmatmul.mubr.msk.f32.vlgmr.msra.gmra.mxu0 %vm441_vm5, %v673_v42 }
 0x58d   :  { %7668 = vmatprep.mubr.msk.f32.mxu0 %vm8768_vm4, %v8766_v10 }
 0x590   :  { %7669 = vmatmul.mubr.msk.f32.gmra.mxu0 %vm441_vm5, %v675_v43 }
 0x591   :  { %7671 = vmatprep.mubr.msk.f32.mxu0 %vm8768_vm4, %v8766_v10 }
 0x594   :  { %7672 = vmatmul.mubr.msk.f32.gmra.mxu0 %vm441_vm5, %v677_v44 }
 0x595   :  { %7680 = vmatprep.mubr.msk.f32.mxu0 %vm8768_vm4, %v8766_v10 }
 0x613   :  { %v9074_v45 = vpop.f32.mrf.mxu0 }
 0x615   :  { %v7652_v46 = vpop.f32.mrf.mxu0 }
 0x617   :  { %v9076_v51 = vpop.f32.mrf.mxu0 }
 0x619   :  { %v7655_v52 = vpop.f32.mrf.mxu0 }
 0x648   :  { %v9078_v53 = vpop.f32.mrf.mxu0 }
 0x64a   :  { %v7658_v54 = vpop.f32.mrf.mxu0 }
 0x64c   :  { %v762_v55 = vpop.f32.mrf.mxu0 }
 0x64d   :  { %v776_v58 = vmul.f32 0.35355338, %v762_v55 }
 0x64e   :  { %v7667_v59 = vpop.f32.mrf.mxu0 }
 0x64f   :  { %v779_v61 = vadd.f32 %v776_v58, %v9018_v60 }
 0x650   :  { %v767_v62 = vpop.f32.mrf.mxu0 }
 0x651   :  { %v777_v63 = vmul.f32 0.35355338, %v767_v62  ;;  %v782_v0 = vsel %vm540_vm7, %v779_v61, -inf }
 0x652   :  { %783 = vmax.xlane.f32.xlu0 %v782_v0  ;;  %v7670_v1 = vpop.f32.mrf.mxu0 }
 0x653   :  { %v780_v2 = vadd.f32 %v777_v63, %v9018_v60 }
 0x654   :  { %v772_v3 = vpop.f32.mrf.mxu0 }
 0x655   :  { %v778_v4 = vmul.f32 0.35355338, %v772_v3  ;;  %v785_v5 = vsel %vm540_vm7, %v780_v2, -inf }
 0x656   :  { %786 = vmax.xlane.f32.xlu1 %v785_v5  ;;  %v7673_v6 = vpop.f32.mrf.mxu0 }
 0x657   :  { %v781_v7 = vadd.f32 %v778_v4, %v9018_v60 }
 0x659   :  { %v788_v8 = vsel %vm540_vm7, %v781_v7, -inf }
 0x65a   :  { %789 = vmax.xlane.f32.xlu0 %v788_v8 }
 0x667   :  { %817 = vrot.lane.b32.xlu1 %v8978_v47, %s8773_s23 }
 0x6db   :  { %v784_v9 = vpop.xlane.xlu0 %783 }
 0x6dc   :  { %v791_v11 = vsub.f32 %v779_v61, %v784_v9 }
 0x6de   :  { %v794_v12 = vmul.f32 1.442695, %v791_v11 }
 0x6df   :  { %v787_v13 = vpop.xlane.xlu1 %786 }
 0x6e0   :  { %8480 = vpow2.f32 %v794_v12  ;;  %v792_v14 = vsub.f32 %v780_v2, %v787_v13 }
 0x6e2   :  { %v796_v15 = vmul.f32 1.442695, %v792_v14 }
 0x6e3   :  { %v790_v16 = vpop.xlane.xlu0 %789  ;;  %v818_v26 = vpop.permute.xlu1 %817 }
 0x6e4   :  { %8482 = vpow2.f32 %v796_v15  ;;  %v793_v17 = vsub.f32 %v781_v7, %v790_v16 }
 0x6e6   :  { %v798_v18 = vmul.f32 1.442695, %v793_v17 }
 0x6e8   :  { %8484 = vpow2.f32 %v798_v18 }
 0x6ed   :  { %v8481_v19 = vpop.eup %8480 }
 0x6ee   :  { %v800_v20 = vsel %vm540_vm7, %v8481_v19, 0.0 }
 0x6ef   :  { %801 = vadd.xlane.f32.xlu0 %v800_v20 }
 0x6f1   :  { %v8483_v21 = vpop.eup %8482 }
 0x6f2   :  { %v803_v22 = vsel %vm540_vm7, %v8483_v21, 0.0 }
 0x6f3   :  { %804 = vadd.xlane.f32.xlu0 %v803_v22 }
 0x6f5   :  { %v8485_v23 = vpop.eup %8484 }
 0x6f6   :  { %v806_v24 = vsel %vm540_vm7, %v8485_v23, 0.0 }
 0x6f7   :  { %807 = vadd.xlane.f32.xlu1 %v806_v24 }
 0x708   :  { %815 = vrot.lane.b32.xlu1 %v8982_v48, %s8773_s23 }
 0x709   :  { %819 = vrot.lane.b32.xlu0 %v8992_v50, %s8773_s23 }
 0x70c   :  { %1101 = vrot.lane.b32.xlu1 %v8992_v50, %s8774_s24 }
 0x70d   :  { %1099 = vrot.lane.b32.xlu0 %v8978_v47, %s8774_s24 }
 0x710   :  { %1097 = vrot.lane.b32.xlu1 %v8982_v48, %s8774_s24 }
 0x711   :  { %1091 = vrot.lane.b32.xlu0 %v8982_v48, %s8775_s25 }
 0x714   :  { %1093 = vrot.lane.b32.xlu1 %v8978_v47, %s8775_s25 }
 0x715   :  { %1095 = vrot.lane.b32.xlu0 %v8992_v50, %s8775_s25 }
 0x778   :  { %v802_v25 = vpop.xlane.xlu0 %801 }
 0x779   :  { %8486 = vrcp.f32 %v802_v25 }
 0x77c   :  { %v805_v27 = vpop.xlane.xlu0 %804 }
 0x77d   :  { %8488 = vrcp.f32 %v805_v27 }
 0x780   :  { %v808_v28 = vpop.xlane.xlu1 %807  ;;  %v820_v29 = vpop.permute.xlu0 %819 }
 0x781   :  { %8490 = vrcp.f32 %v808_v28  ;;  %7675 = vmatpush3.msra.mxu0 %v820_v29  ;;  %8438 = vmatpush3.msra.mxu1 %v820_v29 }
 0x782   :  { %7676 = vmatprep.subr.mxu0 %v8766_v10  ;;  %8436 = vmatprep.subr.mxu1 %v8766_v10 }
 0x783   :  { %7677 = vmatpush3.msra.mxu0 %v818_v26  ;;  %8439 = vmatpush3.msra.mxu1 %v818_v26 }
 0x784   :  { %v816_v30 = vpop.permute.xlu1 %815  ;;  %7678 = vmatprep.subr.mxu0 %v8766_v10  ;;  %8437 = vmatprep.subr.mxu1 %v8766_v10  ;;  %v1100_v43 = vpop.permute.xlu0 %1099 }
 0x785   :  { %7679 = vmatpush3.msra.mxu0 %v816_v30  ;;  %8440 = vmatpush3.msra.mxu1 %v816_v30 }
 0x786   :  { %v8487_v31 = vpop.eup %8486  ;;  %7700 = vmatprep.subr.mxu1 %v8766_v10  ;;  %7689 = vmatprep.subr.mxu0 %v8766_v10 }
 0x787   :  { %v810_v32 = vmul.f32 %v8487_v31, %v8481_v19 }
 0x788   :  { %v1102_v40 = vpop.permute.xlu1 %1101  ;;  %v1092_v52 = vpop.permute.xlu0 %1091 }
 0x789   :  { %7681 = vmatmul.mubr.msk.f32.vlgmr.msra.gmra.mxu0 %vm540_vm7, %v810_v32 }
 0x78a   :  { %v8489_v34 = vpop.eup %8488  ;;  %7683 = vmatprep.mubr.msk.f32.mxu0 %vm8768_vm4, %v8766_v10  ;;  %7690 = vmatpush3.msra.mxu0 %v9116_v33 }
 0x78b   :  { %v812_v35 = vmul.f32 %v8489_v34, %v8483_v21  ;;  %7711 = vmatprep.subr.mxu0 %v8766_v10 }
 0x78c   :  { %v1098_v46 = vpop.permute.xlu1 %1097  ;;  %v1096_v61 = vpop.permute.xlu0 %1095 }
 0x78d   :  { %7684 = vmatmul.mubr.msk.f32.gmra.mxu0 %vm540_vm7, %v812_v35 }
 0x78e   :  { %v8491_v36 = vpop.eup %8490  ;;  %7691 = vmatprep.mubr.msk.f32.mxu0 %vm8768_vm4, %v8766_v10 }
 0x78f   :  { %v814_v37 = vmul.f32 %v8491_v36, %v8485_v23 }
 0x790   :  { %v1094_v55 = vpop.permute.xlu1 %1093 }
 0x791   :  { %7687 = vmatmul.mubr.msk.f32.vlgmr.msra.gmra.mxu1 %vm540_vm7, %v814_v37 }
 0x792   :  { %7701 = vmatpush3.msra.mxu1 %v9129_v38  ;;  %7702 = vmatprep.mubr.msk.f32.mxu1 %vm8768_vm4, %v8766_v10 }
 0x793   :  { %7726 = vmatprep.subr.mxu1 %v8766_v10 }
 0x795   :  { %7703 = vmatmul.mubr.msk.f32.vlgmr.msra.gmra.mxu1 %vm441_vm5, %v9074_v45 }
 0x796   :  { %7705 = vmatprep.mubr.msk.f32.mxu1 %vm8768_vm4, %v8766_v10 }
 0x799   :  { %7706 = vmatmul.mubr.msk.f32.gmra.mxu1 %vm441_vm5, %v9076_v51 }
 0x79a   :  { %7708 = vmatprep.mubr.msk.f32.mxu1 %vm8768_vm4, %v8766_v10 }
 0x79d   :  { %7709 = vmatmul.mubr.msk.f32.gmra.mxu1 %vm441_vm5, %v9078_v53 }
 0x79e   :  { %7732 = vmatprep.mubr.msk.f32.mxu1 %vm8768_vm4, %v8766_v10 }
 0x849   :  { %v899_v39 = vpop.f32.mrf.mxu0 }
 0x84a   :  { %7692 = vmatmul.mubr.msk.f32.vlgmr.msra.gmra.mxu0 %vm441_vm5, %v899_v39 }
 0x84b   :  { %7712 = vmatpush3.xpose.msk.msra.mxu0 %vm441_vm5, %v1102_v40  ;;  %v7682_v41 = vpop.f32.mrf.mxu0  ;;  %7694 = vmatprep.mubr.msk.f32.mxu0 %vm8768_vm4, %v8766_v10 }
 0x84c   :  { %7713 = vmatprep.subr.mxu0 %v8766_v10 }
 0x84d   :  { %v904_v42 = vpop.f32.mrf.mxu0 }
 0x84e   :  { %7695 = vmatmul.mubr.msk.f32.gmra.mxu0 %vm441_vm5, %v904_v42 }
 0x84f   :  { %7714 = vmatpush3.xpose.msk.msra.mxu0 %vm441_vm5, %v1100_v43  ;;  %v7685_v44 = vpop.f32.mrf.mxu0  ;;  %7697 = vmatprep.mubr.msk.f32.mxu0 %vm8768_vm4, %v8766_v10 }
 0x850   :  { %7715 = vmatprep.subr.mxu0 %v8766_v10 }
 0x851   :  { %v909_v45 = vpop.f32.mrf.mxu1 }
 0x852   :  { %7698 = vmatmul.mubr.msk.f32.gmra.mxu0 %vm441_vm5, %v909_v45 }
 0x853   :  { %7716 = vmatpush3.xpose.msk.msra.mxu0 %vm441_vm5, %v1098_v46  ;;  %v7688_v51 = vpop.f32.mrf.mxu1  ;;  %7717 = vmatprep.mubr.msk.f32.mxu0 %vm8768_vm4, %v8766_v10 }
 0x854   :  { %7741 = vmatprep.subr.mxu0 %v8766_v10 }
 0x855   :  { %v9163_v53 = vpop.f32.mrf.mxu1 }
 0x856   :  { %7718 = vmatmul.mubr.msk.f32.vlgmr.msra.gmra.mxu0 %vm441_vm5, %v1092_v52 }
 0x857   :  { %v7704_v54 = vpop.f32.mrf.mxu1  ;;  %7720 = vmatprep.mubr.msk.f32.mxu0 %vm8768_vm4, %v8766_v10 }
 0x859   :  { %v9168_v58 = vpop.f32.mrf.mxu1 }
 0x85a   :  { %7721 = vmatmul.mubr.msk.f32.gmra.mxu0 %vm441_vm5, %v1094_v55 }
 0x85b   :  { %v7707_v59 = vpop.f32.mrf.mxu1  ;;  %7723 = vmatprep.mubr.msk.f32.mxu0 %vm8768_vm4, %v8766_v10 }
 0x85d   :  { %v9173_v62 = vpop.f32.mrf.mxu1 }
 0x85e   :  { %7724 = vmatmul.mubr.msk.f32.gmra.mxu0 %vm441_vm5, %v1096_v61 }
 0x85f   :  { %v7710_v63 = vpop.f32.mrf.mxu1  ;;  %7743 = vmatprep.mubr.msk.f32.mxu0 %vm8768_vm4, %v8766_v10 }
 0x90a   :  { %v9178_v0 = vpop.f32.mrf.mxu0 }
 0x90c   :  { %v7693_v1 = vpop.f32.mrf.mxu0 }
 0x90e   :  { %v9180_v2 = vpop.f32.mrf.mxu0 }
 0x910   :  { %v7696_v3 = vpop.f32.mrf.mxu0 }
 0x912   :  { %v9182_v4 = vpop.f32.mrf.mxu0 }
 0x914   :  { %v7699_v5 = vpop.f32.mrf.mxu0 }
 0x916   :  { %v1181_v6 = vpop.f32.mrf.mxu0 }
 0x917   :  { %v1195_v7 = vmul.f32 0.35355338, %v1181_v6  ;;  %v9238_v6 = vld [vmem:[%s10593_s6 + $0x10] sm:$0xff] }
 0x918   :  { %v7719_v8 = vpop.f32.mrf.mxu0  ;;  %7742 = vmatpush3.msra.mxu0 %v9238_v6 }
 0x919   :  { %v1198_v9 = vadd.f32 %v1195_v7, %v9018_v60  ;;  %7767 = vmatprep.subr.mxu0 %v8766_v10 }
 0x91a   :  { %v1186_v11 = vpop.f32.mrf.mxu0 }
 0x91b   :  { %v1196_v12 = vmul.f32 0.35355338, %v1186_v11  ;;  %v1201_v13 = vsel %vm540_vm7, %v1198_v9, -inf }
 0x91c   :  { %1202 = vmax.xlane.f32.xlu1 %v1201_v13  ;;  %v7722_v14 = vpop.f32.mrf.mxu0 }
 0x91d   :  { %v1199_v15 = vadd.f32 %v1196_v12, %v9018_v60 }
 0x91e   :  { %v1191_v16 = vpop.f32.mrf.mxu0 }
 0x91f   :  { %v1197_v17 = vmul.f32 0.35355338, %v1191_v16  ;;  %v1204_v18 = vsel %vm540_vm7, %v1199_v15, -inf }
 0x920   :  { %1205 = vmax.xlane.f32.xlu0 %v1204_v18  ;;  %v7725_v19 = vpop.f32.mrf.mxu0 }
 0x921   :  { %v1200_v20 = vadd.f32 %v1197_v17, %v9018_v60 }
 0x923   :  { %v1207_v21 = vsel %vm540_vm7, %v1200_v20, -inf }
 0x924   :  { %1208 = vmax.xlane.f32.xlu0 %v1207_v21 }
 0x92d   :  { %1238 = vrot.lane.b32.xlu1 %v8992_v50, %s8776_s30 }
 0x931   :  { %1234 = vrot.lane.b32.xlu1 %v8982_v48, %s8776_s30 }
 0x935   :  { %1434 = vrot.lane.b32.xlu1 %v8992_v50, %s8777_s2 }
 0x939   :  { %1432 = vrot.lane.b32.xlu1 %v8978_v47, %s8777_s2 }
 0x9a5   :  { %v1203_v22 = vpop.xlane.xlu1 %1202 }
 0x9a6   :  { %v1210_v23 = vsub.f32 %v1198_v9, %v1203_v22 }
 0x9a8   :  { %v1213_v24 = vmul.f32 1.442695, %v1210_v23 }
 0x9a9   :  { %v1239_v25 = vpop.permute.xlu1 %1238  ;;  %v1206_v26 = vpop.xlane.xlu0 %1205 }
 0x9aa   :  { %8492 = vpow2.f32 %v1213_v24  ;;  %v1211_v27 = vsub.f32 %v1199_v15, %v1206_v26  ;;  %7727 = vmatpush3.msra.mxu1 %v1239_v25 }
 0x9ab   :  { %7728 = vmatprep.subr.mxu1 %v8766_v10 }
 0x9ac   :  { %v1215_v28 = vmul.f32 1.442695, %v1211_v27 }
 0x9ad   :  { %v1209_v34 = vpop.xlane.xlu0 %1208  ;;  %v1235_v40 = vpop.permute.xlu1 %1234 }
 0x9ae   :  { %8494 = vpow2.f32 %v1215_v28  ;;  %v1212_v35 = vsub.f32 %v1200_v20, %v1209_v34  ;;  %v1083_v34 = vadd.f32 %v9168_v58, %v9180_v2 }
 0x9b0   :  { %v1217_v36 = vmul.f32 1.442695, %v1212_v35 }
 0x9b1   :  { %v1435_v41 = vpop.permute.xlu1 %1434 }
 0x9b2   :  { %8496 = vpow2.f32 %v1217_v36 }
 0x9b5   :  { %v1433_v42 = vpop.permute.xlu1 %1432 }
 0x9b7   :  { %v8493_v29 = vpop.eup %8492 }
 0x9b8   :  { %v1219_v30 = vsel %vm540_vm7, %v8493_v29, 0.0 }
 0x9b9   :  { %1220 = vadd.xlane.f32.xlu0 %v1219_v30 }
 0x9bb   :  { %v8495_v31 = vpop.eup %8494 }
 0x9bc   :  { %v1222_v32 = vsel %vm540_vm7, %v8495_v31, 0.0 }
 0x9bd   :  { %1223 = vadd.xlane.f32.xlu1 %v1222_v32 }
 0x9bf   :  { %v8497_v37 = vpop.eup %8496 }
 0x9c0   :  { %v1225_v39 = vsel %vm540_vm7, %v8497_v37, 0.0 }
 0x9ce   :  { %1424 = vrot.lane.b32.xlu1 %v8982_v48, %s8778_s3 }
 0x9cf   :  { %1236 = vrot.lane.b32.xlu0 %v8978_v47, %s8776_s30 }
 0x9d2   :  { %1428 = vrot.lane.b32.xlu1 %v8992_v50, %s8778_s3 }
 0x9ee   :  { %1226 = vadd.xlane.f32.xlu0 %v1225_v39 }
 0xa04   :  { %1430 = vrot.lane.b32.xlu0 %v8982_v48, %s8777_s2 }
 0xa08   :  { %1426 = vrot.lane.b32.xlu0 %v8978_v47, %s8778_s3 }
 0xa42   :  { %v1221_v43 = vpop.xlane.xlu0 %1220 }
 0xa43   :  { %8498 = vrcp.f32 %v1221_v43 }
 0xa46   :  { %v1224_v44 = vpop.xlane.xlu1 %1223  ;;  %v1237_v45 = vpop.permute.xlu0 %1236 }
 0xa47   :  { %8500 = vrcp.f32 %v1224_v44  ;;  %7729 = vmatpush3.msra.mxu1 %v1237_v45 }
 0xa48   :  { %7730 = vmatprep.subr.mxu1 %v8766_v10 }
 0xa49   :  { %7731 = vmatpush3.msra.mxu1 %v1235_v40 }
 0xa4a   :  { %7752 = vmatprep.subr.mxu1 %v8766_v10  ;;  %v1425_v1 = vpop.permute.xlu1 %1424 }
 0xa4e   :  { %v1429_v5 = vpop.permute.xlu1 %1428 }
 0xa50   :  { %v8499_v46 = vpop.eup %8498 }
 0xa51   :  { %v1229_v51 = vmul.f32 %v8499_v46, %v8493_v29  ;;  %v1078_v29 = vadd.f32 %v9163_v53, %v9178_v0 }
 0xa53   :  { %7733 = vmatmul.mubr.msk.f32.vlgmr.msra.gmra.mxu1 %vm540_vm7, %v1229_v51 }
 0xa54   :  { %v8501_v52 = vpop.eup %8500  ;;  %7753 = vmatpush3.xpose.msk.msra.mxu1 %vm441_vm5, %v1435_v41  ;;  %7735 = vmatprep.mubr.msk.f32.mxu1 %vm8768_vm4, %v8766_v10 }
 0xa55   :  { %7754 = vmatprep.subr.mxu1 %v8766_v10  ;;  %v1231_v54 = vmul.f32 %v8501_v52, %v8495_v31 }
 0xa57   :  { %7736 = vmatmul.mubr.msk.f32.gmra.mxu1 %vm540_vm7, %v1231_v54 }
 0xa58   :  { %7755 = vmatpush3.xpose.msk.msra.mxu1 %vm441_vm5, %v1433_v42  ;;  %7738 = vmatprep.mubr.msk.f32.mxu1 %vm8768_vm4, %v8766_v10 }
 0xa59   :  { %7756 = vmatprep.subr.mxu1 %v8766_v10 }
 0xa77   :  { %v1227_v55 = vpop.xlane.xlu0 %1226 }
 0xa78   :  { %8502 = vrcp.f32 %v1227_v55  ;;  %v1088_v55 = vadd.f32 %v9173_v62, %v9182_v4 }
 0xa7b   :  { %v1431_v59 = vpop.permute.xlu0 %1430 }
 0xa7c   :  { %7757 = vmatpush3.xpose.msk.msra.mxu1 %vm441_vm5, %v1431_v59 }
 0xa7d   :  { %7782 = vmatprep.subr.mxu1 %v8766_v10 }
 0xa7f   :  { %v1427_v3 = vpop.permute.xlu0 %1426 }
 0xa85   :  { %v8503_v61 = vpop.eup %8502 }
 0xa86   :  { %v1233_v63 = vmul.f32 %v8503_v61, %v8497_v37 }
 0xa88   :  { %7739 = vmatmul.mubr.msk.f32.gmra.mxu1 %vm540_vm7, %v1233_v63 }
 0xa89   :  { %7758 = vmatprep.mubr.msk.f32.mxu1 %vm8768_vm4, %v8766_v10 }
 0xa8c   :  { %7759 = vmatmul.mubr.msk.f32.vlgmr.msra.gmra.mxu1 %vm441_vm5, %v1425_v1 }
 0xa8d   :  { %7761 = vmatprep.mubr.msk.f32.mxu1 %vm8768_vm4, %v8766_v10 }
 0xa90   :  { %7762 = vmatmul.mubr.msk.f32.gmra.mxu1 %vm441_vm5, %v1427_v3 }
 0xa91   :  { %7764 = vmatprep.mubr.msk.f32.mxu1 %vm8768_vm4, %v8766_v10 }
 0xa94   :  { %7765 = vmatmul.mubr.msk.f32.gmra.mxu1 %vm441_vm5, %v1429_v5 }
 0xa95   :  { %7784 = vmatprep.mubr.msk.f32.mxu1 %vm8768_vm4, %v8766_v10 }
 0xb13   :  { %v1318_v7 = vpop.f32.mrf.mxu1 }
 0xb14   :  { %7744 = vmatmul.mubr.msk.f32.vlgmr.msra.gmra.mxu0 %vm441_vm5, %v1318_v7 }
 0xb15   :  { %v7734_v8 = vpop.f32.mrf.mxu1  ;;  %7746 = vmatprep.mubr.msk.f32.mxu0 %vm8768_vm4, %v8766_v10 }
 0xb17   :  { %v1323_v9 = vpop.f32.mrf.mxu1 }
 0xb18   :  { %7747 = vmatmul.mubr.msk.f32.gmra.mxu0 %vm441_vm5, %v1323_v9 }
 0xb19   :  { %v7737_v11 = vpop.f32.mrf.mxu1  ;;  %7749 = vmatprep.mubr.msk.f32.mxu0 %vm8768_vm4, %v8766_v10 }
 0xb48   :  { %v1328_v12 = vpop.f32.mrf.mxu1 }
 0xb49   :  { %7750 = vmatmul.mubr.msk.f32.gmra.mxu0 %vm441_vm5, %v1328_v12 }
 0xb4a   :  { %v7740_v13 = vpop.f32.mrf.mxu1  ;;  %7773 = vmatprep.mubr.msk.f32.mxu0 %vm8768_vm4, %v8766_v10 }
 0xb4c   :  { %v1514_v14 = vpop.f32.mrf.mxu1 }
 0xb4d   :  { %v1528_v15 = vmul.f32 0.35355338, %v1514_v14 }
 0xb4e   :  { %v7760_v16 = vpop.f32.mrf.mxu1 }
 0xb4f   :  { %v1531_v17 = vadd.f32 %v1528_v15, %v9018_v60 }
 0xb50   :  { %v1519_v18 = vpop.f32.mrf.mxu1 }
 0xb51   :  { %v1529_v19 = vmul.f32 0.35355338, %v1519_v18  ;;  %v1534_v20 = vsel %vm540_vm7, %v1531_v17, -inf }
 0xb52   :  { %1535 = vmax.xlane.f32.xlu0 %v1534_v20  ;;  %v7763_v21 = vpop.f32.mrf.mxu1 }
 0xb53   :  { %v1532_v22 = vadd.f32 %v1529_v19, %v9018_v60  ;;  %v9349_v21 = vld [vmem:[%s10593_s6 + $0x18] sm:$0xff] }
 0xb54   :  { %v1524_v23 = vpop.f32.mrf.mxu1  ;;  %7783 = vmatpush3.msra.mxu1 %v9349_v21 }
 0xb55   :  { %v1530_v24 = vmul.f32 0.35355338, %v1524_v23  ;;  %v1537_v25 = vsel %vm540_vm7, %v1532_v22, -inf  ;;  %7808 = vmatprep.subr.mxu1 %v8766_v10 }
 0xb56   :  { %1538 = vmax.xlane.f32.xlu1 %v1537_v25  ;;  %v7766_v26 = vpop.f32.mrf.mxu1 }
 0xb57   :  { %v1533_v27 = vadd.f32 %v1530_v24, %v9018_v60 }
 0xb59   :  { %v1540_v28 = vsel %vm540_vm7, %v1533_v27, -inf }
 0xb5a   :  { %1541 = vmax.xlane.f32.xlu0 %v1540_v28 }
 0xb67   :  { %1569 = vrot.lane.b32.xlu1 %v8978_v47, %s8779_s17 }
 0xb6b   :  { %1567 = vrot.lane.b32.xlu1 %v8982_v48, %s8779_s17 }
 0xb6f   :  { %1770 = vrot.lane.b32.xlu1 %v9014_v56, %s8767_s21 }
 0xb70   :  { %1571 = vrot.lane.b32.xlu0 %v8992_v50, %s8779_s17 }
 0xbd4   :  { %v1407_v30 = vpop.f32.mrf.mxu0 }
 0xbd5   :  { %v9270_v31 = vadd.f32 %v1407_v30, %v1078_v29 }
 0xbd6   :  { %v7745_v32 = vpop.f32.mrf.mxu0 }
 0xbd8   :  { %v1412_v47 = vpop.f32.mrf.mxu0 }
 0xbd9   :  { %v9274_v35 = vadd.f32 %v1412_v47, %v1083_v34 }
 0xbda   :  { %v7748_v48 = vpop.f32.mrf.mxu0 }
 0xbdb   :  { %v1536_v36 = vpop.xlane.xlu0 %1535 }
 0xbdc   :  { %v1543_v37 = vsub.f32 %v1531_v17, %v1536_v36 }
 0xbde   :  { %v1546_v39 = vmul.f32 1.442695, %v1543_v37 }
 0xbdf   :  { %v1539_v40 = vpop.xlane.xlu1 %1538 }
 0xbe0   :  { %8504 = vpow2.f32 %v1546_v39  ;;  %v1544_v50 = vsub.f32 %v1532_v22, %v1539_v40 }
 0xbe2   :  { %v1548_v41 = vmul.f32 1.442695, %v1544_v50 }
 0xbe3   :  { %v1542_v42 = vpop.xlane.xlu0 %1541  ;;  %v1570_v0 = vpop.permute.xlu1 %1569 }
 0xbe4   :  { %8506 = vpow2.f32 %v1548_v41  ;;  %v1545_v53 = vsub.f32 %v1533_v27, %v1542_v42 }
 0xbe6   :  { %v1550_v43 = vmul.f32 1.442695, %v1545_v53 }
 0xbe7   :  { %v1572_v44 = vpop.permute.xlu0 %1571  ;;  %v1568_v58 = vpop.permute.xlu1 %1567 }
 0xbe8   :  { %8508 = vpow2.f32 %v1550_v43  ;;  %7768 = vmatpush3.msra.mxu0 %v1572_v44 }
 0xbe9   :  { %7769 = vmatprep.subr.mxu0 %v8766_v10 }
 0xbea   :  { %7770 = vmatpush3.msra.mxu0 %v1570_v0 }
 0xbeb   :  { %7771 = vmatprep.subr.mxu0 %v8766_v10  ;;  %v1771_v4 = vpop.permute.xlu1 %1770 }
 0xbec   :  { %7772 = vmatpush3.msra.mxu0 %v1568_v58 }
 0xbed   :  { %v8505_v2 = vpop.eup %8504  ;;  %7793 = vmatprep.subr.mxu0 %v8766_v10 }
 0xbee   :  { %v1552_v45 = vsel %vm540_vm7, %v8505_v2, 0.0 }
 0xbef   :  { %1553 = vadd.xlane.f32.xlu0 %v1552_v45 }
 0xbf1   :  { %v8507_v46 = vpop.eup %8506 }
 0xbf2   :  { %v1555_v51 = vsel %vm540_vm7, %v8507_v46, 0.0 }
 0xbf3   :  { %1556 = vadd.xlane.f32.xlu0 %v1555_v51 }
 0xbf5   :  { %v8509_v52 = vpop.eup %8508 }
 0xbf6   :  { %v1558_v54 = vsel %vm540_vm7, %v8509_v52, 0.0 }
 0xbf7   :  { %1559 = vadd.xlane.f32.xlu1 %v1558_v54 }
 0xc08   :  { %1766 = vrot.lane.b32.xlu1 %v8988_v49, %s8767_s21 }
 0xc09   :  { %v1417_v59 = vpop.f32.mrf.mxu0  ;;  %1768 = vrot.lane.b32.xlu0 %v9016_v57, %s8767_s21 }
 0xc0a   :  { %v9288_v61 = vadd.f32 %v1417_v59, %v1088_v55 }
 0xc0b   :  { %v7751_v63 = vpop.f32.mrf.mxu0 }
 0xc0c   :  { %2009 = vrot.lane.b32.xlu1 %v9016_v57, %s8771_s0 }
 0xc0d   :  { %2011 = vrot.lane.b32.xlu0 %v9014_v56, %s8771_s0 }
 0xc10   :  { %2001 = vrot.lane.b32.xlu1 %v8988_v49, %s8772_s1 }
 0xc11   :  { %2007 = vrot.lane.b32.xlu0 %v8988_v49, %s8771_s0 }
 0xc14   :  { %2005 = vrot.lane.b32.xlu1 %v9014_v56, %s8772_s1 }
 0xc15   :  { %2003 = vrot.lane.b32.xlu0 %v9016_v57, %s8772_s1 }
 0xc78   :  { %v1554_v62 = vpop.xlane.xlu0 %1553 }
 0xc79   :  { %8510 = vrcp.f32 %v1554_v62 }
 0xc7c   :  { %v1557_v1 = vpop.xlane.xlu0 %1556 }
 0xc7d   :  { %8512 = vrcp.f32 %v1557_v1 }
 0xc80   :  { %v1560_v3 = vpop.xlane.xlu1 %1559  ;;  %v1769_v11 = vpop.permute.xlu0 %1768 }
 0xc81   :  { %8514 = vrcp.f32 %v1560_v3 }
 0xc84   :  { %v1767_v14 = vpop.permute.xlu1 %1766  ;;  %v2012_v15 = vpop.permute.xlu0 %2011 }
 0xc86   :  { %v8511_v5 = vpop.eup %8510 }
 0xc87   :  { %v1562_v7 = vmul.f32 %v8511_v5, %v8505_v2 }
 0xc88   :  { %v2010_v16 = vpop.permute.xlu1 %2009  ;;  %v2008_v17 = vpop.permute.xlu0 %2007 }
 0xc89   :  { %7774 = vmatmul.mubr.msk.f32.vlgmr.msra.gmra.mxu0 %vm540_vm7, %v1562_v7 }
 0xc8a   :  { %v8513_v8 = vpop.eup %8512  ;;  %7794 = vmatpush3.xpose.msk.msra.mxu0 %vm441_vm5, %v1771_v4  ;;  %7776 = vmatprep.mubr.msk.f32.mxu0 %vm8768_vm4, %v8766_v10 }
 0xc8b   :  { %7795 = vmatprep.subr.mxu0 %v8766_v10  ;;  %v1564_v9 = vmul.f32 %v8513_v8, %v8507_v46 }
 0xc8c   :  { %v2002_v18 = vpop.permute.xlu1 %2001  ;;  %v2004_v19 = vpop.permute.xlu0 %2003 }
 0xc8d   :  { %7777 = vmatmul.mubr.msk.f32.gmra.mxu0 %vm540_vm7, %v1564_v9 }
 0xc8e   :  { %v8515_v12 = vpop.eup %8514  ;;  %7796 = vmatpush3.xpose.msk.msra.mxu0 %vm441_vm5, %v1769_v11  ;;  %7779 = vmatprep.mubr.msk.f32.mxu0 %vm8768_vm4, %v8766_v10 }
 0xc8f   :  { %7797 = vmatprep.subr.mxu0 %v8766_v10  ;;  %v1566_v13 = vmul.f32 %v8515_v12, %v8509_v52 }
 0xc90   :  { %v2006_v20 = vpop.permute.xlu1 %2005 }
 0xc91   :  { %7780 = vmatmul.mubr.msk.f32.gmra.mxu0 %vm540_vm7, %v1566_v13 }
 0xc92   :  { %7798 = vmatpush3.xpose.msk.msra.mxu0 %vm441_vm5, %v1767_v14  ;;  %7799 = vmatprep.mubr.msk.f32.mxu0 %vm8768_vm4, %v8766_v10 }
 0xc93   :  { %7823 = vmatprep.subr.mxu0 %v8766_v10 }
 0xc95   :  { %7800 = vmatmul.mubr.msk.f32.vlgmr.msra.gmra.mxu0 %vm441_vm5, %v8988_v49 }
 0xc96   :  { %7824 = vmatpush3.xpose.msk.msra.mxu0 %vm441_vm5, %v2012_v15  ;;  %7802 = vmatprep.mubr.msk.f32.mxu0 %vm8768_vm4, %v8766_v10 }
 0xc97   :  { %7825 = vmatprep.subr.mxu0 %v8766_v10 }
 0xc99   :  { %7803 = vmatmul.mubr.msk.f32.gmra.mxu0 %vm441_vm5, %v9016_v57 }
 0xc9a   :  { %7826 = vmatpush3.xpose.msk.msra.mxu0 %vm441_vm5, %v2010_v16  ;;  %7805 = vmatprep.mubr.msk.f32.mxu0 %vm8768_vm4, %v8766_v10 }
 0xc9b   :  { %7827 = vmatprep.subr.mxu0 %v8766_v10 }
 0xc9d   :  { %7806 = vmatmul.mubr.msk.f32.gmra.mxu0 %vm441_vm5, %v9014_v56 }
 0xc9e   :  { %7828 = vmatpush3.xpose.msk.msra.mxu0 %vm441_vm5, %v2008_v17  ;;  %7829 = vmatprep.mubr.msk.f32.mxu0 %vm8768_vm4, %v8766_v10 }
 0xc9f   :  { %7853 = vmatprep.subr.mxu0 %v8766_v10 }
 0xca1   :  { %7830 = vmatmul.mubr.msk.f32.vlgmr.msra.gmra.mxu0 %vm441_vm5, %v2002_v18 }
 0xca2   :  { %7832 = vmatprep.mubr.msk.f32.mxu0 %vm8768_vm4, %v8766_v10  ;;  %7854 = vmatpush3.msra.mxu0 %v9116_v33 }
 0xca3   :  { %7875 = vmatprep.subr.mxu0 %v8766_v10 }
 0xca5   :  { %7833 = vmatmul.mubr.msk.f32.gmra.mxu0 %vm441_vm5, %v2004_v19 }
 0xca6   :  { %7835 = vmatprep.mubr.msk.f32.mxu0 %vm8768_vm4, %v8766_v10 }
 0xca9   :  { %7836 = vmatmul.mubr.msk.f32.gmra.mxu0 %vm441_vm5, %v2006_v20 }
 0xcaa   :  { %7855 = vmatprep.mubr.msk.f32.mxu0 %vm8768_vm4, %v8766_v10 }
 0xd49   :  { %v1651_v33 = vpop.f32.mrf.mxu0 }
 0xd4a   :  { %7785 = vmatmul.mubr.msk.f32.vlgmr.msra.gmra.mxu1 %vm441_vm5, %v1651_v33 }
 0xd4b   :  { %v7775_v22 = vpop.f32.mrf.mxu0  ;;  %7787 = vmatprep.mubr.msk.f32.mxu1 %vm8768_vm4, %v8766_v10 }
 0xd4d   :  { %v1656_v23 = vpop.f32.mrf.mxu0 }
 0xd4e   :  { %7788 = vmatmul.mubr.msk.f32.gmra.mxu1 %vm441_vm5, %v1656_v23 }
 0xd4f   :  { %v7778_v24 = vpop.f32.mrf.mxu0  ;;  %7790 = vmatprep.mubr.msk.f32.mxu1 %vm8768_vm4, %v8766_v10 }
 0xd51   :  { %v1661_v25 = vpop.f32.mrf.mxu0 }
 0xd52   :  { %7791 = vmatmul.mubr.msk.f32.gmra.mxu1 %vm441_vm5, %v1661_v25 }
 0xd53   :  { %v7781_v26 = vpop.f32.mrf.mxu0  ;;  %7814 = vmatprep.mubr.msk.f32.mxu1 %vm8768_vm4, %v8766_v10 }
 0xd55   :  { %v1850_v27 = vpop.f32.mrf.mxu0 }
 0xd56   :  { %v1864_v28 = vmul.f32 0.35355338, %v1850_v27 }
 0xd57   :  { %v7801_v29 = vpop.f32.mrf.mxu0 }
 0xd58   :  { %v1867_v30 = vadd.f32 %v1864_v28, %v9018_v60 }
 0xd59   :  { %v1855_v32 = vpop.f32.mrf.mxu0 }
 0xd5a   :  { %v1865_v34 = vmul.f32 0.35355338, %v1855_v32  ;;  %v1870_v47 = vsel %vm540_vm7, %v1867_v30, -inf }
 0xd5b   :  { %1871 = vmax.xlane.f32.xlu0 %v1870_v47  ;;  %v7804_v48 = vpop.f32.mrf.mxu0 }
 0xd5c   :  { %v1868_v36 = vadd.f32 %v1865_v34, %v9018_v60 }
 0xd5d   :  { %v1860_v37 = vpop.f32.mrf.mxu0 }
 0xd5e   :  { %v1866_v39 = vmul.f32 0.35355338, %v1860_v37  ;;  %v1873_v40 = vsel %vm540_vm7, %v1868_v36, -inf }
 0xd5f   :  { %1874 = vmax.xlane.f32.xlu1 %v1873_v40  ;;  %v7807_v50 = vpop.f32.mrf.mxu0 }
 0xd60   :  { %v1869_v41 = vadd.f32 %v1866_v39, %v9018_v60 }
 0xd61   :  { %v2091_v42 = vpop.f32.mrf.mxu0 }
 0xd62   :  { %v2105_v53 = vmul.f32 0.35355338, %v2091_v42  ;;  %v1876_v0 = vsel %vm540_vm7, %v1869_v41, -inf }
 0xd63   :  { %1877 = vmax.xlane.f32.xlu0 %v1876_v0  ;;  %v7831_v43 = vpop.f32.mrf.mxu0 }
 0xd64   :  { %v2108_v44 = vadd.f32 %v2105_v53, %v9018_v60 }
 0xd65   :  { %v2096_v58 = vpop.f32.mrf.mxu0 }
 0xd66   :  { %v2106_v2 = vmul.f32 0.35355338, %v2096_v58  ;;  %v2111_v45 = vsel %vm540_vm7, %v2108_v44, -inf }
 0xd67   :  { %2112 = vmax.xlane.f32.xlu0 %v2111_v45  ;;  %v7834_v46 = vpop.f32.mrf.mxu0 }
 0xd68   :  { %v2109_v51 = vadd.f32 %v2106_v2, %v9018_v60  ;;  %v8734_v46 = vld [vmem:[#allocation2 + $0x10] sm:$0xff] }
 0xd69   :  { %v2101_v52 = vpop.f32.mrf.mxu0 }
 0xd6a   :  { %v2107_v54 = vmul.f32 0.35355338, %v2101_v52  ;;  %v2114_v55 = vsel %vm540_vm7, %v2109_v51, -inf }
 0xd6b   :  { %2115 = vmax.xlane.f32.xlu0 %v2114_v55  ;;  %v7837_v59 = vpop.f32.mrf.mxu0 }
 0xd6c   :  { %v2110_v63 = vadd.f32 %v2107_v54, %v9018_v60 }
 0xd6e   :  { %v2117_v62 = vsel %vm540_vm7, %v2110_v63, -inf }
 0xd6f   :  { %2118 = vmax.xlane.f32.xlu1 %v2117_v62 }
 0xd80   :  { %1905 = vrot.lane.b32.xlu1 %v9016_v57, %s8770_s22 }
 0xd81   :  { %1907 = vrot.lane.b32.xlu0 %v9014_v56, %s8770_s22 }
 0xd84   :  { %1903 = vrot.lane.b32.xlu1 %v8988_v49, %s8770_s22 }
 0xd88   :  { %2148 = vrot.lane.b32.xlu1 %v9014_v56, %s8773_s23 }
 0xde4   :  { %v1872_v4 = vpop.xlane.xlu0 %1871 }
 0xde5   :  { %v1879_v1 = vsub.f32 %v1867_v30, %v1872_v4 }
 0xde7   :  { %v1882_v3 = vmul.f32 1.442695, %v1879_v1 }
 0xde8   :  { %v1875_v5 = vpop.xlane.xlu1 %1874 }
 0xde9   :  { %8516 = vpow2.f32 %v1882_v3  ;;  %v1880_v7 = vsub.f32 %v1868_v36, %v1875_v5 }
 0xdeb   :  { %v1884_v8 = vmul.f32 1.442695, %v1880_v7 }
 0xdec   :  { %v1878_v9 = vpop.xlane.xlu0 %1877 }
 0xded   :  { %8518 = vpow2.f32 %v1884_v8  ;;  %v1881_v11 = vsub.f32 %v1869_v41, %v1878_v9  ;;  %v8732_v41 = vld [vmem:[#allocation2] sm:$0xff] }
 0xdef   :  { %v1886_v12 = vmul.f32 1.442695, %v1881_v11 }
 0xdf0   :  { %v2113_v13 = vpop.xlane.xlu0 %2112 }
 0xdf1   :  { %8520 = vpow2.f32 %v1886_v12  ;;  %v2120_v14 = vsub.f32 %v2108_v44, %v2113_v13  ;;  %v8733_v44 = vld [vmem:[#allocation2 + $0x8] sm:$0xff] }
 0xdf3   :  { %v2123_v15 = vmul.f32 1.442695, %v2120_v14 }
 0xdf4   :  { %v2116_v16 = vpop.xlane.xlu0 %2115 }
 0xdf5   :  { %8522 = vpow2.f32 %v2123_v15  ;;  %v2121_v17 = vsub.f32 %v2109_v51, %v2116_v16 }
 0xdf6   :  { %v9382_v18 = vpop.eup %8516 }
 0xdf7   :  { %v2125_v19 = vmul.f32 1.442695, %v2121_v17  ;;  %v1888_v20 = vsel %vm540_vm7, %v9382_v18, 0.0 }
 0xdf8   :  { %v2119_v33 = vpop.xlane.xlu1 %2118  ;;  %1889 = vadd.xlane.f32.xlu0 %v1888_v20  ;;  %v1908_v22 = vpop.permute.xlu0 %1907 }
 0xdf9   :  { %8524 = vpow2.f32 %v2125_v19  ;;  %v2122_v23 = vsub.f32 %v2110_v63, %v2119_v33  ;;  %7809 = vmatpush3.msra.mxu1 %v1908_v22 }
 0xdfa   :  { %v9386_v24 = vpop.eup %8518  ;;  %7810 = vmatprep.subr.mxu1 %v8766_v10 }
 0xdfb   :  { %v2127_v25 = vmul.f32 1.442695, %v2122_v23  ;;  %v1891_v26 = vsel %vm540_vm7, %v9386_v24, 0.0 }
 0xdfc   :  { %1892 = vadd.xlane.f32.xlu1 %v1891_v26  ;;  %v1906_v27 = vpop.permute.xlu1 %1905 }
 0xdfd   :  { %8526 = vpow2.f32 %v2127_v25  ;;  %7811 = vmatpush3.msra.mxu1 %v1906_v27 }
 0xdfe   :  { %v9391_v28 = vpop.eup %8520  ;;  %7812 = vmatprep.subr.mxu1 %v8766_v10 }
 0xdff   :  { %v1894_v29 = vsel %vm540_vm7, %v9391_v28, 0.0 }
 0xe00   :  { %v1904_v30 = vpop.permute.xlu1 %1903  ;;  %1895 = vadd.xlane.f32.xlu0 %v1894_v29 }
 0xe01   :  { %7813 = vmatpush3.msra.mxu1 %v1904_v30 }
 0xe02   :  { %v9396_v32 = vpop.eup %8522  ;;  %7838 = vmatprep.subr.mxu1 %v8766_v10 }
 0xe03   :  { %v2129_v34 = vsel %vm540_vm7, %v9396_v32, 0.0 }
 0xe04   :  { %2130 = vadd.xlane.f32.xlu1 %v2129_v34 }
 0xe06   :  { %v9401_v47 = vpop.eup %8524 }
 0xe07   :  { %v2132_v48 = vsel %vm540_vm7, %v9401_v47, 0.0 }
 0xe08   :  { %2133 = vadd.xlane.f32.xlu0 %v2132_v48 }
 0xe0a   :  { %v9405_v36 = vpop.eup %8526  ;;  %v1740_v37 = vpop.f32.mrf.mxu1 }
 0xe0b   :  { %v1754_v39 = vadd.f32 %v1740_v37, %v9270_v31  ;;  %v2135_v40 = vsel %vm540_vm7, %v9405_v36, 0.0 }
 0xe0c   :  { %2136 = vadd.xlane.f32.xlu1 %v2135_v40  ;;  %v7786_v50 = vpop.f32.mrf.mxu1 }
 0xe0d   :  { %v1757_v42 = vadd.f32 %v8732_v41, %v1754_v39 }
 0xe0e   :  { %v1745_v53 = vpop.f32.mrf.mxu1 }
 0xe0f   :  { %1760 = vst.msk [vmem:[#allocation2] sm:$0xff] %vm171_vm1, %v1757_v42  ;;  %v1755_v0 = vadd.f32 %v1745_v53, %v9274_v35  ;;  %v2149_v35 = vpop.permute.xlu1 %2148 }
 0xe10   :  { %v7789_v43 = vpop.f32.mrf.mxu1 }
 0xe11   :  { %v1758_v58 = vadd.f32 %v8733_v44, %v1755_v0 }
 0xe12   :  { %v1750_v2 = vpop.f32.mrf.mxu1 }
 0xe13   :  { %1761 = vst.msk [vmem:[#allocation2 + $0x8] sm:$0xff] %vm171_vm1, %v1758_v58  ;;  %v1756_v31 = vadd.f32 %v1750_v2, %v9288_v61 }
 0xe14   :  { %v7792_v45 = vpop.f32.mrf.mxu1 }
 0xe15   :  { %v1759_v51 = vadd.f32 %v8734_v46, %v1756_v31 }
 0xe17   :  { %1762 = vst.msk [vmem:[#allocation2 + $0x10] sm:$0xff] %vm171_vm1, %v1759_v51 }
 0xe1d   :  { %2144 = vrot.lane.b32.xlu1 %v8988_v49, %s8773_s23 }
 0xe1e   :  { %2146 = vrot.lane.b32.xlu0 %v9016_v57, %s8773_s23 }
 0xe21   :  { %2428 = vrot.lane.b32.xlu1 %v9016_v57, %s8774_s24 }
 0xe22   :  { %2430 = vrot.lane.b32.xlu0 %v9014_v56, %s8774_s24 }
 0xe25   :  { %2420 = vrot.lane.b32.xlu1 %v8988_v49, %s8775_s25 }
 0xe26   :  { %2426 = vrot.lane.b32.xlu0 %v8988_v49, %s8774_s24 }
 0xe29   :  { %2424 = vrot.lane.b32.xlu1 %v9014_v56, %s8775_s25 }
 0xe2a   :  { %2422 = vrot.lane.b32.xlu0 %v9016_v57, %s8775_s25 }
 0xe81   :  { %v1890_v61 = vpop.xlane.xlu0 %1889 }
 0xe82   :  { %8528 = vrcp.f32 %v1890_v61 }
 0xe85   :  { %v1893_v52 = vpop.xlane.xlu1 %1892 }
 0xe86   :  { %8530 = vrcp.f32 %v1893_v52 }
 0xe89   :  { %v1896_v54 = vpop.xlane.xlu0 %1895 }
 0xe8a   :  { %8532 = vrcp.f32 %v1896_v54 }
 0xe8d   :  { %v2131_v55 = vpop.xlane.xlu1 %2130 }
 0xe8e   :  { %8534 = vrcp.f32 %v2131_v55 }
 0xe8f   :  { %v8529_v59 = vpop.eup %8528 }
 0xe90   :  { %v1898_v63 = vmul.f32 %v8529_v59, %v9382_v18 }
 0xe91   :  { %v2134_v62 = vpop.xlane.xlu0 %2133 }
 0xe92   :  { %8536 = vrcp.f32 %v2134_v62  ;;  %7815 = vmatmul.mubr.msk.f32.vlgmr.msra.gmra.mxu1 %vm540_vm7, %v1898_v63 }
 0xe93   :  { %v8531_v4 = vpop.eup %8530  ;;  %7839 = vmatpush3.msra.mxu1 %v2149_v35  ;;  %7817 = vmatprep.mubr.msk.f32.mxu1 %vm8768_vm4, %v8766_v10 }
 0xe94   :  { %7840 = vmatprep.subr.mxu1 %v8766_v10  ;;  %v1900_v1 = vmul.f32 %v8531_v4, %v9386_v24 }
 0xe95   :  { %v2137_v3 = vpop.xlane.xlu1 %2136  ;;  %v2147_v5 = vpop.permute.xlu0 %2146 }
 0xe96   :  { %8538 = vrcp.f32 %v2137_v3  ;;  %7818 = vmatmul.mubr.msk.f32.gmra.mxu1 %vm540_vm7, %v1900_v1 }
 0xe97   :  { %v8533_v7 = vpop.eup %8532  ;;  %7841 = vmatpush3.msra.mxu1 %v2147_v5  ;;  %7820 = vmatprep.mubr.msk.f32.mxu1 %vm8768_vm4, %v8766_v10 }
 0xe98   :  { %7842 = vmatprep.subr.mxu1 %v8766_v10  ;;  %v1902_v8 = vmul.f32 %v8533_v7, %v9391_v28 }
 0xe99   :  { %v2145_v9 = vpop.permute.xlu1 %2144  ;;  %v2431_v23 = vpop.permute.xlu0 %2430 }
 0xe9a   :  { %7821 = vmatmul.mubr.msk.f32.gmra.mxu1 %vm540_vm7, %v1902_v8 }
 0xe9b   :  { %v8535_v11 = vpop.eup %8534  ;;  %7843 = vmatpush3.msra.mxu1 %v2145_v9  ;;  %7844 = vmatprep.mubr.msk.f32.mxu1 %vm8768_vm4, %v8766_v10 }
 0xe9c   :  { %v2139_v12 = vmul.f32 %v8535_v11, %v9396_v32  ;;  %7864 = vmatprep.subr.mxu1 %v8766_v10 }
 0xe9d   :  { %v2429_v26 = vpop.permute.xlu1 %2428  ;;  %v2427_v29 = vpop.permute.xlu0 %2426 }
 0xe9e   :  { %7845 = vmatmul.mubr.msk.f32.vlgmr.msra.gmra.mxu1 %vm540_vm7, %v2139_v12 }
 0xe9f   :  { %v8537_v13 = vpop.eup %8536  ;;  %7847 = vmatprep.mubr.msk.f32.mxu1 %vm8768_vm4, %v8766_v10  ;;  %7865 = vmatpush3.msra.mxu1 %v9129_v38 }
 0xea0   :  { %v2141_v14 = vmul.f32 %v8537_v13, %v9401_v47  ;;  %7890 = vmatprep.subr.mxu1 %v8766_v10 }
 0xea1   :  { %v2421_v32 = vpop.permute.xlu1 %2420  ;;  %v2423_v34 = vpop.permute.xlu0 %2422 }
 0xea2   :  { %7848 = vmatmul.mubr.msk.f32.gmra.mxu1 %vm540_vm7, %v2141_v14 }
 0xea3   :  { %v8539_v15 = vpop.eup %8538  ;;  %7850 = vmatprep.mubr.msk.f32.mxu1 %vm8768_vm4, %v8766_v10 }
 0xea4   :  { %v2143_v16 = vmul.f32 %v8539_v15, %v9405_v36 }
 0xea5   :  { %v2425_v47 = vpop.permute.xlu1 %2424 }
 0xea6   :  { %7851 = vmatmul.mubr.msk.f32.gmra.mxu1 %vm540_vm7, %v2143_v16 }
 0xea7   :  { %7866 = vmatprep.mubr.msk.f32.mxu1 %vm8768_vm4, %v8766_v10 }
 0xf52   :  { %v1987_v17 = vpop.f32.mrf.mxu1 }
 0xf53   :  { %7867 = vmatmul.mubr.msk.f32.vlgmr.msra.gmra.mxu1 %vm441_vm5, %v1987_v17 }
 0xf54   :  { %v7816_v38 = vpop.f32.mrf.mxu1  ;;  %7869 = vmatprep.mubr.msk.f32.mxu1 %vm8768_vm4, %v8766_v10 }
 0xf56   :  { %v1992_v18 = vpop.f32.mrf.mxu1 }
 0xf57   :  { %7870 = vmatmul.mubr.msk.f32.gmra.mxu1 %vm441_vm5, %v1992_v18 }
 0xf58   :  { %v7819_v19 = vpop.f32.mrf.mxu1  ;;  %7872 = vmatprep.mubr.msk.f32.mxu1 %vm8768_vm4, %v8766_v10 }
 0xf5a   :  { %v1997_v20 = vpop.f32.mrf.mxu1 }
 0xf5b   :  { %7873 = vmatmul.mubr.msk.f32.gmra.mxu1 %vm441_vm5, %v1997_v20 }
 0xf5c   :  { %v7822_v33 = vpop.f32.mrf.mxu1  ;;  %7896 = vmatprep.mubr.msk.f32.mxu1 %vm8768_vm4, %v8766_v10 }
 0xf5e   :  { %v2228_v22 = vpop.f32.mrf.mxu1 }
 0xf5f   :  { %7856 = vmatmul.mubr.msk.f32.vlgmr.msra.gmra.mxu0 %vm441_vm5, %v2228_v22 }
 0xf60   :  { %7876 = vmatpush3.xpose.msk.msra.mxu0 %vm441_vm5, %v2431_v23  ;;  %v7846_v24 = vpop.f32.mrf.mxu1  ;;  %7858 = vmatprep.mubr.msk.f32.mxu0 %vm8768_vm4, %v8766_v10 }
 0xf61   :  { %7877 = vmatprep.subr.mxu0 %v8766_v10 }
 0xf62   :  { %v2233_v25 = vpop.f32.mrf.mxu1 }
 0xf63   :  { %7859 = vmatmul.mubr.msk.f32.gmra.mxu0 %vm441_vm5, %v2233_v25 }
 0xf64   :  { %7878 = vmatpush3.xpose.msk.msra.mxu0 %vm441_vm5, %v2429_v26  ;;  %v7849_v27 = vpop.f32.mrf.mxu1  ;;  %7861 = vmatprep.mubr.msk.f32.mxu0 %vm8768_vm4, %v8766_v10 }
 0xf65   :  { %7879 = vmatprep.subr.mxu0 %v8766_v10 }
 0xf66   :  { %v2238_v28 = vpop.f32.mrf.mxu1 }
 0xf67   :  { %7862 = vmatmul.mubr.msk.f32.gmra.mxu0 %vm441_vm5, %v2238_v28 }
 0xf68   :  { %7880 = vmatpush3.xpose.msk.msra.mxu0 %vm441_vm5, %v2427_v29  ;;  %v7852_v30 = vpop.f32.mrf.mxu1  ;;  %7881 = vmatprep.mubr.msk.f32.mxu0 %vm8768_vm4, %v8766_v10 }
 0xf69   :  { %7905 = vmatprep.subr.mxu0 %v8766_v10 }
 0xf6b   :  { %7882 = vmatmul.mubr.msk.f32.vlgmr.msra.gmra.mxu0 %vm441_vm5, %v2421_v32 }
 0xf6c   :  { %7884 = vmatprep.mubr.msk.f32.mxu0 %vm8768_vm4, %v8766_v10  ;;  %7906 = vmatpush3.msra.mxu0 %v9238_v6 }
 0xf6d   :  { %7931 = vmatprep.subr.mxu0 %v8766_v10 }
 0xf6f   :  { %7885 = vmatmul.mubr.msk.f32.gmra.mxu0 %vm441_vm5, %v2423_v34 }
 0xf70   :  { %7887 = vmatprep.mubr.msk.f32.mxu0 %vm8768_vm4, %v8766_v10 }
 0xf73   :  { %7888 = vmatmul.mubr.msk.f32.gmra.mxu0 %vm441_vm5, %v2425_v47 }
 0xf74   :  { %7907 = vmatprep.mubr.msk.f32.mxu0 %vm8768_vm4, %v8766_v10 }
0x1013   :  { %v2406_v48 = vpop.f32.mrf.mxu1 }
0x1015   :  { %v7868_v36 = vpop.f32.mrf.mxu1 }
0x1017   :  { %v2411_v37 = vpop.f32.mrf.mxu1 }
0x1019   :  { %v7871_v39 = vpop.f32.mrf.mxu1 }
0x101b   :  { %v2416_v40 = vpop.f32.mrf.mxu1 }
0x101d   :  { %v7874_v6 = vpop.f32.mrf.mxu1 }
0x101f   :  { %v2317_v50 = vpop.f32.mrf.mxu0 }
0x1020   :  { %v9495_v41 = vadd.f32 %v2406_v48, %v2317_v50 }
0x1021   :  { %v7857_v42 = vpop.f32.mrf.mxu0 }
0x1023   :  { %v2322_v53 = vpop.f32.mrf.mxu0 }
0x1024   :  { %v9497_v0 = vadd.f32 %v2411_v37, %v2322_v53 }
0x1025   :  { %v7860_v43 = vpop.f32.mrf.mxu0 }
0x1027   :  { %v2327_v44 = vpop.f32.mrf.mxu0 }
0x1028   :  { %v9499_v58 = vadd.f32 %v2416_v40, %v2327_v44 }
0x1029   :  { %v7863_v2 = vpop.f32.mrf.mxu0 }
0x102b   :  { %v2510_v31 = vpop.f32.mrf.mxu0 }
0x102c   :  { %v2524_v45 = vmul.f32 0.35355338, %v2510_v31 }
0x102d   :  { %v7883_v46 = vpop.f32.mrf.mxu0 }
0x102e   :  { %v2527_v51 = vadd.f32 %v2524_v45, %v9018_v60 }
0x102f   :  { %v2515_v35 = vpop.f32.mrf.mxu0 }
0x1030   :  { %v2525_v61 = vmul.f32 0.35355338, %v2515_v35  ;;  %v2530_v52 = vsel %vm540_vm7, %v2527_v51, -inf }
0x1031   :  { %2531 = vmax.xlane.f32.xlu0 %v2530_v52  ;;  %v7886_v54 = vpop.f32.mrf.mxu0 }
0x1032   :  { %v2528_v55 = vadd.f32 %v2525_v61, %v9018_v60 }
0x1033   :  { %v2520_v59 = vpop.f32.mrf.mxu0 }
0x1034   :  { %v2526_v63 = vmul.f32 0.35355338, %v2520_v59  ;;  %v2533_v62 = vsel %vm540_vm7, %v2528_v55, -inf }
0x1035   :  { %2534 = vmax.xlane.f32.xlu1 %v2533_v62  ;;  %v7889_v4 = vpop.f32.mrf.mxu0 }
0x1036   :  { %v2529_v1 = vadd.f32 %v2526_v63, %v9018_v60 }
0x1038   :  { %v2536_v3 = vsel %vm540_vm7, %v2529_v1, -inf }
0x1039   :  { %2537 = vmax.xlane.f32.xlu0 %v2536_v3 }
0x1046   :  { %2565 = vrot.lane.b32.xlu1 %v9016_v57, %s8776_s30 }
0x104a   :  { %2563 = vrot.lane.b32.xlu1 %v8988_v49, %s8776_s30 }
0x104e   :  { %2763 = vrot.lane.b32.xlu1 %v9014_v56, %s8777_s2 }
0x104f   :  { %2567 = vrot.lane.b32.xlu0 %v9014_v56, %s8776_s30 }
0x10ba   :  { %v2532_v5 = vpop.xlane.xlu0 %2531 }
0x10bb   :  { %v2539_v7 = vsub.f32 %v2527_v51, %v2532_v5 }
0x10bd   :  { %v2542_v8 = vmul.f32 1.442695, %v2539_v7 }
0x10be   :  { %v2535_v9 = vpop.xlane.xlu1 %2534 }
0x10bf   :  { %8540 = vpow2.f32 %v2542_v8  ;;  %v2540_v11 = vsub.f32 %v2528_v55, %v2535_v9 }
0x10c1   :  { %v2544_v12 = vmul.f32 1.442695, %v2540_v11 }
0x10c2   :  { %v2538_v13 = vpop.xlane.xlu0 %2537  ;;  %v2566_v15 = vpop.permute.xlu1 %2565 }
0x10c3   :  { %8542 = vpow2.f32 %v2544_v12  ;;  %v2541_v14 = vsub.f32 %v2529_v1, %v2538_v13 }
0x10c5   :  { %v2546_v16 = vmul.f32 1.442695, %v2541_v14 }
0x10c6   :  { %v2568_v17 = vpop.permute.xlu0 %2567  ;;  %v2564_v38 = vpop.permute.xlu1 %2563 }
0x10c7   :  { %8544 = vpow2.f32 %v2546_v16  ;;  %7891 = vmatpush3.msra.mxu1 %v2568_v17 }
0x10c8   :  { %7892 = vmatprep.subr.mxu1 %v8766_v10 }
0x10c9   :  { %7893 = vmatpush3.msra.mxu1 %v2566_v15 }
0x10ca   :  { %7894 = vmatprep.subr.mxu1 %v8766_v10  ;;  %v2764_v25 = vpop.permute.xlu1 %2763 }
0x10cb   :  { %7895 = vmatpush3.msra.mxu1 %v2564_v38 }
0x10cc   :  { %v8541_v18 = vpop.eup %8540  ;;  %7916 = vmatprep.subr.mxu1 %v8766_v10 }
0x10cd   :  { %v2548_v19 = vsel %vm540_vm7, %v8541_v18, 0.0 }
0x10ce   :  { %2549 = vadd.xlane.f32.xlu0 %v2548_v19  ;;  %v9588_v19 = vld [vmem:[#allocation2 + $0x8] sm:$0xff] }
0x10d0   :  { %v8543_v20 = vpop.eup %8542 }
0x10d1   :  { %v2551_v33 = vsel %vm540_vm7, %v8543_v20, 0.0 }
0x10d2   :  { %2552 = vadd.xlane.f32.xlu0 %v2551_v33 }
0x10d4   :  { %v8545_v22 = vpop.eup %8544 }
0x10d5   :  { %v2554_v23 = vsel %vm540_vm7, %v8545_v22, 0.0 }
0x10d6   :  { %2555 = vadd.xlane.f32.xlu1 %v2554_v23 }
0x10e7   :  { %2759 = vrot.lane.b32.xlu1 %v8988_v49, %s8777_s2 }
0x10e8   :  { %2761 = vrot.lane.b32.xlu0 %v9016_v57, %s8777_s2 }
0x10eb   :  { %2755 = vrot.lane.b32.xlu1 %v9016_v57, %s8778_s3 }
0x10ec   :  { %2753 = vrot.lane.b32.xlu0 %v8988_v49, %s8778_s3 }
0x10ef   :  { %2757 = vrot.lane.b32.xlu1 %v9014_v56, %s8778_s3 }
0x1157   :  { %v2550_v24 = vpop.xlane.xlu0 %2549 }
0x1158   :  { %8546 = vrcp.f32 %v2550_v24 }
0x115b   :  { %v2553_v26 = vpop.xlane.xlu0 %2552 }
0x115c   :  { %8548 = vrcp.f32 %v2553_v26 }
0x115f   :  { %v2556_v27 = vpop.xlane.xlu1 %2555  ;;  %v2762_v34 = vpop.permute.xlu0 %2761 }
0x1160   :  { %8550 = vrcp.f32 %v2556_v27 }
0x1163   :  { %v2760_v36 = vpop.permute.xlu1 %2759  ;;  %v2754_v37 = vpop.permute.xlu0 %2753 }
0x1165   :  { %v8547_v28 = vpop.eup %8546 }
0x1166   :  { %v2558_v29 = vmul.f32 %v8547_v28, %v8541_v18 }
0x1167   :  { %v2756_v39 = vpop.permute.xlu1 %2755 }
0x1168   :  { %7897 = vmatmul.mubr.msk.f32.vlgmr.msra.gmra.mxu1 %vm540_vm7, %v2558_v29 }
0x1169   :  { %v8549_v30 = vpop.eup %8548  ;;  %7917 = vmatpush3.xpose.msk.msra.mxu1 %vm441_vm5, %v2764_v25  ;;  %7899 = vmatprep.mubr.msk.f32.mxu1 %vm8768_vm4, %v8766_v10 }
0x116a   :  { %7918 = vmatprep.subr.mxu1 %v8766_v10  ;;  %v2560_v32 = vmul.f32 %v8549_v30, %v8543_v20 }
0x116b   :  { %v2758_v40 = vpop.permute.xlu1 %2757 }
0x116c   :  { %7900 = vmatmul.mubr.msk.f32.gmra.mxu1 %vm540_vm7, %v2560_v32 }
0x116d   :  { %v8551_v47 = vpop.eup %8550  ;;  %7919 = vmatpush3.xpose.msk.msra.mxu1 %vm441_vm5, %v2762_v34  ;;  %7902 = vmatprep.mubr.msk.f32.mxu1 %vm8768_vm4, %v8766_v10 }
0x116e   :  { %7920 = vmatprep.subr.mxu1 %v8766_v10  ;;  %v2562_v48 = vmul.f32 %v8551_v47, %v8545_v22  ;;  %v9598_v47 = vld [vmem:[#allocation2] sm:$0xff] }
0x1170   :  { %7903 = vmatmul.mubr.msk.f32.gmra.mxu1 %vm540_vm7, %v2562_v48  ;;  %v3098_v48 = vsel %vm171_vm1, %v9598_v47, 0.0 }
0x1171   :  { %7921 = vmatpush3.xpose.msk.msra.mxu1 %vm441_vm5, %v2760_v36  ;;  %7922 = vmatprep.mubr.msk.f32.mxu1 %vm8768_vm4, %v8766_v10  ;;  %v9605_v36 = vld [vmem:[#allocation2 + $0x10] sm:$0xff] }
0x1172   :  { %7946 = vmatprep.subr.mxu1 %v8766_v10 }
0x1174   :  { %7923 = vmatmul.mubr.msk.f32.vlgmr.msra.gmra.mxu1 %vm441_vm5, %v2754_v37  ;;  %v3104_v37 = vsel %vm171_vm1, %v9605_v36, 0.0 }
0x1175   :  { %7925 = vmatprep.mubr.msk.f32.mxu1 %vm8768_vm4, %v8766_v10  ;;  %7947 = vmatpush3.msra.mxu1 %v9349_v21 }
0x1178   :  { %7926 = vmatmul.mubr.msk.f32.gmra.mxu1 %vm441_vm5, %v2756_v39 }
0x1179   :  { %7928 = vmatprep.mubr.msk.f32.mxu1 %vm8768_vm4, %v8766_v10 }
0x117c   :  { %7929 = vmatmul.mubr.msk.f32.gmra.mxu1 %vm441_vm5, %v2758_v40 }
0x117d   :  { %7948 = vmatprep.mubr.msk.f32.mxu1 %vm8768_vm4, %v8766_v10 }
0x1228   :  { %v2647_v6 = vpop.f32.mrf.mxu1 }
0x1229   :  { %7908 = vmatmul.mubr.msk.f32.vlgmr.msra.gmra.mxu0 %vm441_vm5, %v2647_v6 }
0x122a   :  { %v7898_v50 = vpop.f32.mrf.mxu1  ;;  %7910 = vmatprep.mubr.msk.f32.mxu0 %vm8768_vm4, %v8766_v10 }
0x122c   :  { %v2652_v42 = vpop.f32.mrf.mxu1 }
0x122d   :  { %7911 = vmatmul.mubr.msk.f32.gmra.mxu0 %vm441_vm5, %v2652_v42 }
0x122e   :  { %v7901_v21 = vpop.f32.mrf.mxu1  ;;  %7913 = vmatprep.mubr.msk.f32.mxu0 %vm8768_vm4, %v8766_v10 }
0x1230   :  { %v2657_v53 = vpop.f32.mrf.mxu1 }
0x1231   :  { %7914 = vmatmul.mubr.msk.f32.gmra.mxu0 %vm441_vm5, %v2657_v53 }
0x1232   :  { %v7904_v43 = vpop.f32.mrf.mxu1  ;;  %7937 = vmatprep.mubr.msk.f32.mxu0 %vm8768_vm4, %v8766_v10 }
0x1234   :  { %v2843_v44 = vpop.f32.mrf.mxu1 }
0x1235   :  { %v2857_v2 = vmul.f32 0.35355338, %v2843_v44 }
0x1236   :  { %v7924_v31 = vpop.f32.mrf.mxu1 }
0x1237   :  { %v2860_v45 = vadd.f32 %v2857_v2, %v9018_v60 }
0x1238   :  { %v2848_v46 = vpop.f32.mrf.mxu1 }
0x1239   :  { %v2863_v51 = vsel %vm540_vm7, %v2860_v45, -inf  ;;  %v2858_v54 = vmul.f32 0.35355338, %v2848_v46 }
0x123a   :  { %2864 = vmax.xlane.f32.xlu0 %v2863_v51  ;;  %v7927_v35 = vpop.f32.mrf.mxu1 }
0x123b   :  { %v2861_v55 = vadd.f32 %v2858_v54, %v9018_v60 }
0x123c   :  { %v2853_v61 = vpop.f32.mrf.mxu1 }
0x123d   :  { %v2866_v59 = vsel %vm540_vm7, %v2861_v55, -inf }
0x123e   :  { %v7930_v52 = vpop.f32.mrf.mxu1 }
0x1250   :  { %2900 = vrot.lane.b32.xlu0 %v9014_v56, %s8779_s17 }
0x1254   :  { %2896 = vrot.lane.b32.xlu0 %v8988_v49, %s8779_s17 }
0x1273   :  { %2867 = vmax.xlane.f32.xlu0 %v2866_v59 }
0x12c3   :  { %v2865_v63 = vpop.xlane.xlu0 %2864 }
0x12c4   :  { %v2872_v62 = vsub.f32 %v2860_v45, %v2865_v63 }
0x12c6   :  { %v2875_v4 = vmul.f32 1.442695, %v2872_v62 }
0x12c7   :  { %v2901_v1 = vpop.permute.xlu0 %2900 }
0x12c8   :  { %8552 = vpow2.f32 %v2875_v4  ;;  %7932 = vmatpush3.msra.mxu0 %v2901_v1 }
0x12c9   :  { %7933 = vmatprep.subr.mxu0 %v8766_v10 }
0x12cb   :  { %v2897_v15 = vpop.permute.xlu0 %2896 }
0x12d5   :  { %v8553_v3 = vpop.eup %8552 }
0x12d6   :  { %v2881_v56 = vsel %vm540_vm7, %v8553_v3, 0.0 }
0x12d7   :  { %2882 = vadd.xlane.f32.xlu1 %v2881_v56 }
0x12e8   :  { %2898 = vrot.lane.b32.xlu1 %v9016_v57, %s8779_s17  ;;  %v2859_v57 = vmul.f32 0.35355338, %v2853_v61 }
0x12e9   :  { %v2736_v49 = vpop.f32.mrf.mxu0 }
0x12ea   :  { %v9578_v5 = vadd.f32 %v2736_v49, %v9495_v41  ;;  %v2862_v41 = vadd.f32 %v2859_v57, %v9018_v60  ;;  %v8735_v49 = vld [vmem:[#allocation2 + $0x18] sm:$0xff]  ;;  %v214_v57 = vld [vmem:[%s10594_s7 + $0x10] sm:$0xff] }
0x12eb   :  { %v7909_v7 = vpop.f32.mrf.mxu0 }
0x12ec   :  { %v2869_v18 = vsel %vm540_vm7, %v2862_v41, -inf }
0x12ed   :  { %v2741_v8 = vpop.f32.mrf.mxu0 }
0x12ee   :  { %v9581_v9 = vadd.f32 %v2741_v8, %v9497_v0 }
0x12ef   :  { %v7912_v11 = vpop.f32.mrf.mxu0 }
0x12f1   :  { %v2746_v12 = vpop.f32.mrf.mxu0 }
0x12f2   :  { %v9584_v13 = vadd.f32 %v2746_v12, %v9499_v58  ;;  %v3101_v58 = vsel %vm171_vm1, %v9588_v19, 0.0 }
0x12f3   :  { %v7915_v14 = vpop.f32.mrf.mxu0 }
0x12fc   :  { %v2868_v16 = vpop.xlane.xlu0 %2867 }
0x12fd   :  { %v2873_v17 = vsub.f32 %v2861_v55, %v2868_v16 }
0x12ff   :  { %v2877_v38 = vmul.f32 1.442695, %v2873_v17 }
0x1301   :  { %8554 = vpow2.f32 %v2877_v38  ;;  %v215_v38 = vld [vmem:[%s10594_s7 + $0x18] sm:$0xff] }
0x130c   :  { %2870 = vmax.xlane.f32.xlu1 %v2869_v18  ;;  %v212_v18 = vld [vmem:[%s10594_s7] sm:$0xff] }
0x130e   :  { %v8555_v0 = vpop.eup %8554 }
0x130f   :  { %v2884_v20 = vsel %vm540_vm7, %v8555_v0, 0.0 }
0x1310   :  { %2885 = vadd.xlane.f32.xlu0 %v2884_v20  ;;  %3102 = vadd.xlane.f32.xlu1 %v3101_v58 }
0x1360   :  { %v2883_v33 = vpop.xlane.xlu1 %2882 }
0x1361   :  { %8556 = vrcp.f32 %v2883_v33  ;;  %v8736_v33 = vld [vmem:[#allocation2 + $0x20] sm:$0xff] }
0x1364   :  { %v2899_v22 = vpop.permute.xlu1 %2898 }
0x1365   :  { %7934 = vmatpush3.msra.mxu0 %v2899_v22 }
0x1366   :  { %7935 = vmatprep.subr.mxu0 %v8766_v10 }
0x1367   :  { %7936 = vmatpush3.msra.mxu0 %v2897_v15 }
0x1368   :  { %7957 = vmatprep.subr.mxu0 %v215_v38 }
0x136e   :  { %v8557_v23 = vpop.eup %8556 }
0x136f   :  { %v2891_v24 = vmul.f32 %v8557_v23, %v8553_v3 }
0x1371   :  { %7938 = vmatmul.mubr.msk.f32.vlgmr.msra.gmra.mxu0 %vm540_vm7, %v2891_v24 }
0x1372   :  { %7940 = vmatprep.mubr.msk.f32.mxu0 %vm8768_vm4, %v8766_v10  ;;  %7958 = vmatpush3.msra.mxu0 %v215_v38 }
0x1373   :  { %7959 = vmatprep.subr.mxu0 %v214_v57 }
0x1374   :  { %7960 = vmatpush3.msra.mxu0 %v214_v57 }
0x1395   :  { %v2871_v25 = vpop.xlane.xlu1 %2870 }
0x1396   :  { %v2874_v26 = vsub.f32 %v2862_v41, %v2871_v25  ;;  %v213_v41 = vld [vmem:[%s10594_s7 + $0x8] sm:$0xff] }
0x1397   :  { %7961 = vmatprep.subr.mxu0 %v213_v41 }
0x1398   :  { %v2879_v27 = vmul.f32 1.442695, %v2874_v26  ;;  %7962 = vmatpush3.msra.mxu0 %v213_v41 }
0x1399   :  { %v2886_v28 = vpop.xlane.xlu0 %2885  ;;  %v3103_v3 = vpop.xlane.xlu1 %3102  ;;  %7963 = vmatprep.subr.mxu0 %v212_v18 }
0x139a   :  { %8558 = vpow2.f32 %v2879_v27  ;;  %v3117_v8 = vmul.f32 0.03125, %v3103_v3  ;;  %7964 = vmatpush3.msra.mxu0 %v212_v18  ;;  %v223_v3 = vld [vmem:[%s10596_s9 + $0x30] sm:$0xff] }
0x139b   :  { %8560 = vrcp.f32 %v2886_v28 }
0x139c   :  { %v3123_v11 = vsub.f32 %v9588_v19, %v3117_v8  ;;  %v219_v8 = vld [vmem:[%s10596_s9 + $0x10] sm:$0xff] }
0x139e   :  { %v3129_v15 = vmul.f32 %v3123_v11, %v3123_v11 }
0x13a0   :  { %v3137_v17 = vsel %vm171_vm1, %v3129_v15, 0.0 }
0x13a7   :  { %v8559_v29 = vpop.eup %8558 }
0x13a8   :  { %v8561_v30 = vpop.eup %8560  ;;  %v2887_v32 = vsel %vm540_vm7, %v8559_v29, 0.0 }
0x13a9   :  { %2888 = vadd.xlane.f32.xlu0 %v2887_v32  ;;  %v2893_v34 = vmul.f32 %v8561_v30, %v8555_v0 }
0x13ab   :  { %7941 = vmatmul.mubr.msk.f32.gmra.mxu0 %vm540_vm7, %v2893_v34 }
0x13ac   :  { %7943 = vmatprep.mubr.msk.f32.mxu0 %vm8768_vm4, %v8766_v10 }
0x13ad   :  { %3099 = vadd.xlane.f32.xlu0 %v3098_v48 }
0x13b1   :  { %3105 = vadd.xlane.f32.xlu0 %v3104_v37 }
0x1431   :  { %v2980_v39 = vpop.f32.mrf.mxu0 }
0x1432   :  { %7949 = vmatmul.mubr.msk.f32.vlgmr.msra.gmra.mxu1 %vm441_vm5, %v2980_v39  ;;  %v2889_v40 = vpop.xlane.xlu0 %2888 }
0x1433   :  { %8562 = vrcp.f32 %v2889_v40  ;;  %v7939_v6 = vpop.f32.mrf.mxu0  ;;  %7951 = vmatprep.mubr.msk.f32.mxu1 %vm8768_vm4, %v8766_v10 }
0x1436   :  { %v3100_v50 = vpop.xlane.xlu0 %3099 }
0x1437   :  { %v3116_v42 = vmul.f32 0.03125, %v3100_v50 }
0x1439   :  { %v3122_v21 = vsub.f32 %v9598_v47, %v3116_v42 }
0x143a   :  { %v3106_v53 = vpop.xlane.xlu0 %3105 }
0x143b   :  { %v3118_v43 = vmul.f32 0.03125, %v3106_v53  ;;  %v3128_v44 = vmul.f32 %v3122_v21, %v3122_v21 }
0x143d   :  { %v9614_v2 = vsub.f32 %v9605_v36, %v3118_v43  ;;  %v3134_v31 = vsel %vm171_vm1, %v3128_v44, 0.0 }
0x143e   :  { %3135 = vadd.xlane.f32.xlu0 %v3134_v31 }
0x143f   :  { %v3130_v45 = vmul.f32 %v9614_v2, %v9614_v2 }
0x1440   :  { %v8563_v46 = vpop.eup %8562 }
0x1441   :  { %v3140_v51 = vsel %vm171_vm1, %v3130_v45, 0.0  ;;  %v2895_v35 = vmul.f32 %v8563_v46, %v8559_v29  ;;  %v8737_v45 = vld [vmem:[#allocation2 + $0x28] sm:$0xff] }
0x1442   :  { %3141 = vadd.xlane.f32.xlu0 %v3140_v51 }
0x1443   :  { %7944 = vmatmul.mubr.msk.f32.gmra.mxu0 %vm540_vm7, %v2895_v35 }
0x146b   :  { %v2985_v61 = vpop.f32.mrf.mxu0 }
0x146c   :  { %7952 = vmatmul.mubr.msk.f32.gmra.mxu1 %vm441_vm5, %v2985_v61 }
0x146d   :  { %v7942_v52 = vpop.f32.mrf.mxu0  ;;  %7954 = vmatprep.mubr.msk.f32.mxu1 %vm8768_vm4, %v8766_v10 }
0x146e   :  { %v231_v52 = vld [vmem:[%s10596_s9 + $0x70] sm:$0xff] }
0x14c7   :  { %v3136_v54 = vpop.xlane.xlu0 %3135 }
0x14c8   :  { %v3152_v55 = vmul.f32 0.03125, %v3136_v54  ;;  %v230_v54 = vld [vmem:[%s10596_s9 + $0x68] sm:$0xff] }
0x14ca   :  { %v3158_v59 = vadd.f32 1e-05, %v3152_v55  ;;  %v229_v55 = vld [vmem:[%s10596_s9 + $0x60] sm:$0xff] }
0x14cb   :  { %v3142_v25 = vpop.xlane.xlu0 %3141 }
0x14cc   :  { %8564 = vrsqrt.f32 %v3158_v59  ;;  %v3154_v26 = vmul.f32 0.03125, %v3142_v25  ;;  %v228_v59 = vld [vmem:[%s10596_s9 + $0x58] sm:$0xff] }
0x14ce   :  { %v3160_v30 = vadd.f32 1e-05, %v3154_v26 }
0x14d0   :  { %8566 = vrsqrt.f32 %v3160_v30 }
0x14d9   :  { %v8565_v63 = vpop.eup %8564 }
0x14da   :  { %v3170_v62 = vmul.f32 %v8565_v63, %v3122_v21  ;;  %v227_v63 = vld [vmem:[%s10596_s9 + $0x50] sm:$0xff] }
0x14dc   :  { %7965 = vmatprep.mubr.msk.f32.mxu0 %vm171_vm1, %v3170_v62  ;;  %v226_v62 = vld [vmem:[%s10596_s9 + $0x48] sm:$0xff] }
0x14dd   :  { %v8567_v39 = vpop.eup %8566 }
0x14de   :  { %v3172_v50 = vmul.f32 %v8567_v39, %v9614_v2 }
0x14f2   :  { %v3069_v4 = vpop.f32.mrf.mxu1 }
0x14f3   :  { %v3083_v1 = vadd.f32 %v3069_v4, %v9578_v5  ;;  %v225_v4 = vld [vmem:[%s10596_s9 + $0x40] sm:$0xff] }
0x14f4   :  { %v7950_v56 = vpop.f32.mrf.mxu1 }
0x14f5   :  { %v3086_v7 = vadd.f32 %v8735_v49, %v3083_v1  ;;  %v224_v1 = vld [vmem:[%s10596_s9 + $0x38] sm:$0xff]  ;;  %v222_v56 = vld [vmem:[%s10596_s9 + $0x28] sm:$0xff]  ;;  %v221_v49 = vld [vmem:[%s10596_s9 + $0x20] sm:$0xff] }
0x14f7   :  { %3089 = vst.msk [vmem:[#allocation2 + $0x18] sm:$0xff] %vm171_vm1, %v3086_v7  ;;  %v220_v7 = vld [vmem:[%s10596_s9 + $0x18] sm:$0xff] }
0x14fe   :  { %v9628_v12 = vld [vmem:[#allocation2 + $0x18] sm:$0xff] }
0x14ff   :  { %v3107_v14 = vsel %vm171_vm1, %v9628_v12, 0.0 }
0x1500   :  { %3108 = vadd.xlane.f32.xlu1 %v3107_v14  ;;  %v217_v14 = vld [vmem:[%s10596_s9] sm:$0xff] }
0x1503   :  { %v2990_v16 = vpop.f32.mrf.mxu0 }
0x1504   :  { %7955 = vmatmul.mubr.msk.f32.gmra.mxu1 %vm441_vm5, %v2990_v16  ;;  %3138 = vadd.xlane.f32.xlu1 %v3137_v17 }
0x1505   :  { %v7945_v5 = vpop.f32.mrf.mxu0 }
0x152c   :  { %v3074_v0 = vpop.f32.mrf.mxu1 }
0x152d   :  { %v3084_v20 = vadd.f32 %v3074_v0, %v9581_v9 }
0x152e   :  { %v7953_v58 = vpop.f32.mrf.mxu1 }
0x152f   :  { %v3087_v22 = vadd.f32 %v8736_v33, %v3084_v20  ;;  %v9728_v33 = vld [vmem:[%s10595_s8] ss:$0 sm:$0xff] }
0x1531   :  { %3090 = vst.msk [vmem:[#allocation2 + $0x20] sm:$0xff] %vm171_vm1, %v3087_v22 }
0x1538   :  { %v9648_v23 = vld [vmem:[#allocation2 + $0x20] sm:$0xff] }
0x1539   :  { %v3110_v24 = vsel %vm171_vm1, %v9648_v23, 0.0 }
0x153a   :  { %3111 = vadd.xlane.f32.xlu0 %v3110_v24 }
0x1589   :  { %v3109_v27 = vpop.xlane.xlu1 %3108 }
0x158a   :  { %v3119_v28 = vmul.f32 0.03125, %v3109_v27 }
0x158c   :  { %v9653_v29 = vsub.f32 %v9628_v12, %v3119_v28 }
0x158d   :  { %v3139_v9 = vpop.xlane.xlu1 %3138 }
0x158e   :  { %v3153_v32 = vmul.f32 0.03125, %v3139_v9  ;;  %v3131_v34 = vmul.f32 %v9653_v29, %v9653_v29 }
0x1590   :  { %v3159_v48 = vadd.f32 1e-05, %v3153_v32  ;;  %v3143_v37 = vsel %vm171_vm1, %v3131_v34, 0.0 }
0x1591   :  { %3144 = vadd.xlane.f32.xlu1 %v3143_v37 }
0x1592   :  { %8568 = vrsqrt.f32 %v3159_v48 }
0x159f   :  { %v8569_v40 = vpop.eup %8568 }
0x15a0   :  { %v3171_v6 = vmul.f32 %v8569_v40, %v3123_v11  ;;  %v218_v11 = vld [vmem:[%s10596_s9 + $0x8] sm:$0xff] }
0x15a2   :  { %7966 = vmatmul.mubr.msk.f32.vlgmr.msra.gmra.mxu0 %vm171_vm1, %v3171_v6 }
0x15a3   :  { %7968 = vmatprep.mubr.msk.f32.mxu0 %vm171_vm1, %v3172_v50 }
0x15c3   :  { %v3112_v42 = vpop.xlane.xlu0 %3111 }
0x15c4   :  { %v3120_v21 = vmul.f32 0.03125, %v3112_v42  ;;  %v3079_v53 = vpop.f32.mrf.mxu1 }
0x15c5   :  { %v3085_v43 = vadd.f32 %v3079_v53, %v9584_v13  ;;  %v232_v13 = vld [vmem:[%s10596_s9 + $0x78] sm:$0xff] }
0x15c6   :  { %v9663_v44 = vsub.f32 %v9648_v23, %v3120_v21  ;;  %v7956_v31 = vpop.f32.mrf.mxu1  ;;  %7974 = vmatprep.subr.mxu1 %v232_v13 }
0x15c7   :  { %v3088_v46 = vadd.f32 %v8737_v45, %v3085_v43  ;;  %7975 = vmatpush3.msra.mxu1 %v232_v13 }
0x15c8   :  { %v3132_v51 = vmul.f32 %v9663_v44, %v9663_v44  ;;  %7976 = vmatprep.subr.mxu1 %v231_v52 }
0x15c9   :  { %3091 = vst.msk [vmem:[#allocation2 + $0x28] sm:$0xff] %vm171_vm1, %v3088_v46  ;;  %7977 = vmatpush3.msra.mxu1 %v231_v52 }
0x15ca   :  { %v3146_v2 = vsel %vm171_vm1, %v3132_v51, 0.0  ;;  %7978 = vmatprep.subr.mxu1 %v230_v54 }
0x15cb   :  { %3147 = vadd.xlane.f32.xlu0 %v3146_v2  ;;  %7979 = vmatpush3.msra.mxu1 %v230_v54 }
0x15cc   :  { %7980 = vmatprep.subr.mxu1 %v229_v55 }
0x15cd   :  { %7981 = vmatpush3.msra.mxu1 %v229_v55 }
0x15ce   :  { %7982 = vmatprep.subr.mxu1 %v228_v59 }
0x15cf   :  { %7983 = vmatpush3.msra.mxu1 %v228_v59 }
0x15d0   :  { %v9669_v35 = vld [vmem:[#allocation2 + $0x28] sm:$0xff]  ;;  %7984 = vmatprep.subr.mxu1 %v227_v63 }
0x15d1   :  { %v3113_v61 = vsel %vm171_vm1, %v9669_v35, 0.0  ;;  %7985 = vmatpush3.msra.mxu1 %v227_v63 }
0x15d2   :  { %3114 = vadd.xlane.f32.xlu1 %v3113_v61  ;;  %7986 = vmatprep.subr.mxu1 %v226_v62 }
0x15d3   :  { %7987 = vmatpush3.msra.mxu1 %v226_v62 }
0x15d4   :  { %7988 = vmatprep.subr.mxu1 %v225_v4 }
0x15d5   :  { %7989 = vmatpush3.msra.mxu1 %v225_v4 }
0x15d6   :  { %7990 = vmatprep.subr.mxu1 %v224_v1 }
0x15d7   :  { %7991 = vmatpush3.msra.mxu1 %v224_v1 }
0x15d8   :  { %7992 = vmatprep.subr.mxu1 %v223_v3 }
0x15d9   :  { %7993 = vmatpush3.msra.mxu1 %v223_v3 }
0x15da   :  { %7994 = vmatprep.subr.mxu1 %v222_v56 }
0x15db   :  { %7995 = vmatpush3.msra.mxu1 %v222_v56 }
0x15dc   :  { %7996 = vmatprep.subr.mxu1 %v221_v49 }
0x15dd   :  { %7997 = vmatpush3.msra.mxu1 %v221_v49 }
0x15de   :  { %7998 = vmatprep.subr.mxu1 %v220_v7 }
0x15df   :  { %7999 = vmatpush3.msra.mxu1 %v220_v7 }
0x15e0   :  { %8000 = vmatprep.subr.mxu1 %v219_v8 }
0x15e1   :  { %8001 = vmatpush3.msra.mxu1 %v219_v8 }
0x15e2   :  { %8002 = vmatprep.subr.mxu1 %v218_v11 }
0x15e3   :  { %8003 = vmatpush3.msra.mxu1 %v218_v11 }
0x15e4   :  { %8004 = vmatprep.subr.mxu1 %v217_v14 }
0x15e5   :  { %8005 = vmatpush3.msra.mxu1 %v217_v14 }
0x15e6   :  { %8047 = vmatprep.subr.mxu1 %v8766_v10 }
0x161a   :  { %v3145_v15 = vpop.xlane.xlu1 %3144 }
0x161b   :  { %v3155_v16 = vmul.f32 0.03125, %v3145_v15 }
0x161d   :  { %v3161_v17 = vadd.f32 1e-05, %v3155_v16 }
0x161f   :  { %8570 = vrsqrt.f32 %v3161_v17 }
0x162c   :  { %v8571_v5 = vpop.eup %8570 }
0x162d   :  { %v3173_v38 = vmul.f32 %v8571_v5, %v9653_v29 }
0x162f   :  { %7969 = vmatmul.mubr.msk.f32.gmra.mxu0 %vm171_vm1, %v3173_v38 }
0x1654   :  { %v3148_v57 = vpop.xlane.xlu0 %3147 }
0x1655   :  { %v3156_v41 = vmul.f32 0.03125, %v3148_v57 }
0x1657   :  { %v3162_v18 = vadd.f32 1e-05, %v3156_v41 }
0x1659   :  { %8572 = vrsqrt.f32 %v3162_v18 }
0x165b   :  { %v3115_v0 = vpop.xlane.xlu1 %3114 }
0x165c   :  { %v3121_v20 = vmul.f32 0.03125, %v3115_v0 }
0x165e   :  { %v3127_v58 = vsub.f32 %v9669_v35, %v3121_v20  ;;  %v9741_v20 = vld [vmem:[%s10597_s10] ss:$0 sm:$0xff] }
0x1660   :  { %v3133_v22 = vmul.f32 %v3127_v58, %v3127_v58 }
0x1662   :  { %v7967_v24 = vpop.f32.mrf.mxu0  ;;  %v3149_v25 = vsel %vm171_vm1, %v3133_v22, 0.0 }
0x1663   :  { %v3272_v26 = vadd.f32 %v7967_v24, %v9728_v33  ;;  %3150 = vadd.xlane.f32.xlu1 %v3149_v25 }
0x1664   :  { %v3266_v27 = vpop.f32.mrf.mxu0 }
0x1665   :  { %v3302_v28 = vmul.f32 0.044715, %v3272_v26  ;;  %v3267_v29 = vadd.f32 %v9728_v33, %v3266_v27  ;;  %v3296_v46 = vmul.f32 0.5, %v3272_v26 }
0x1666   :  { %v8573_v30 = vpop.eup %8572 }
0x1667   :  { %v3308_v9 = vmul.f32 %v3302_v28, %v3272_v26  ;;  %v3301_v32 = vmul.f32 0.044715, %v3267_v29  ;;  %v3174_v34 = vmul.f32 %v8573_v30, %v9663_v44  ;;  %v3295_v31 = vmul.f32 0.5, %v3267_v29 }
0x1669   :  { %v3314_v48 = vmul.f32 %v3308_v9, %v3272_v26  ;;  %v3307_v37 = vmul.f32 %v3301_v32, %v3267_v29  ;;  %7971 = vmatprep.mubr.msk.f32.mxu0 %vm171_vm1, %v3174_v34 }
0x166b   :  { %v3320_v39 = vadd.f32 %v3314_v48, %v3272_v26  ;;  %v3313_v40 = vmul.f32 %v3307_v37, %v3267_v29 }
0x166d   :  { %v3326_v6 = vmul.f32 0.7978846, %v3320_v39  ;;  %v3319_v50 = vadd.f32 %v3313_v40, %v3267_v29 }
0x166f   :  { %8574 = vtanh.f32 %v3326_v6  ;;  %v3325_v42 = vmul.f32 0.7978846, %v3319_v50 }
0x1671   :  { %8576 = vtanh.f32 %v3325_v42 }
0x167c   :  { %v8575_v21 = vpop.eup %8574 }
0x167d   :  { %v3338_v43 = vadd.f32 1.0, %v8575_v21 }
0x167e   :  { %v8577_v53 = vpop.eup %8576 }
0x167f   :  { %v3337_v45 = vadd.f32 1.0, %v8577_v53  ;;  %v3344_v2 = vmul.f32 %v3338_v43, %v3296_v46 }
0x1681   :  { %v3343_v51 = vmul.f32 %v3337_v45, %v3295_v31 }
0x1683   :  { %8006 = vmatprep.mubr.f32.mxu1 %v3343_v51 }
0x1684   :  { %8007 = vmatmul.mubr.f32.vlgmr.msra.gmra.mxu1 %v3344_v2 }
0x16ec   :  { %v3151_v44 = vpop.xlane.xlu1 %3150 }
0x16ed   :  { %v3157_v61 = vmul.f32 0.03125, %v3151_v44 }
0x16ef   :  { %v3163_v13 = vadd.f32 1e-05, %v3157_v61  ;;  %v7970_v52 = vpop.f32.mrf.mxu0 }
0x16f0   :  { %v3282_v54 = vadd.f32 %v7970_v52, %v9728_v33 }
0x16f1   :  { %8578 = vrsqrt.f32 %v3163_v13  ;;  %v3276_v55 = vpop.f32.mrf.mxu0 }
0x16f2   :  { %v3304_v59 = vmul.f32 0.044715, %v3282_v54  ;;  %v3277_v63 = vadd.f32 %v9728_v33, %v3276_v55  ;;  %v3298_v41 = vmul.f32 0.5, %v3282_v54 }
0x16f4   :  { %v3310_v62 = vmul.f32 %v3304_v59, %v3282_v54  ;;  %v3303_v4 = vmul.f32 0.044715, %v3277_v63  ;;  %v3297_v38 = vmul.f32 0.5, %v3277_v63 }
0x16f6   :  { %v3309_v1 = vmul.f32 %v3303_v4, %v3277_v63  ;;  %v3316_v3 = vmul.f32 %v3310_v62, %v3282_v54 }
0x16f8   :  { %v3315_v56 = vmul.f32 %v3309_v1, %v3277_v63  ;;  %v3322_v49 = vadd.f32 %v3316_v3, %v3282_v54 }
0x16fa   :  { %v3321_v7 = vadd.f32 %v3315_v56, %v3277_v63  ;;  %v3328_v8 = vmul.f32 0.7978846, %v3322_v49 }
0x16fc   :  { %v3327_v11 = vmul.f32 0.7978846, %v3321_v7  ;;  %8580 = vtanh.f32 %v3328_v8 }
0x16fe   :  { %v8579_v14 = vpop.eup %8578  ;;  %8582 = vtanh.f32 %v3327_v11 }
0x16ff   :  { %v3175_v15 = vmul.f32 %v8579_v14, %v3127_v58 }
0x1701   :  { %7972 = vmatmul.mubr.msk.f32.gmra.mxu0 %vm171_vm1, %v3175_v15 }
0x1709   :  { %v8581_v16 = vpop.eup %8580 }
0x170a   :  { %v3340_v5 = vadd.f32 1.0, %v8581_v16 }
0x170b   :  { %v8583_v17 = vpop.eup %8582 }
0x170c   :  { %v3339_v57 = vadd.f32 1.0, %v8583_v17  ;;  %v3346_v0 = vmul.f32 %v3340_v5, %v3298_v41  ;;  %v7088_v17 = vld [vmem:[%s10592_s5 + $0x38] sm:$0xff]  ;;  %v7087_v5 = vld [vmem:[%s10592_s5 + $0x30] sm:$0xff] }
0x170d   :  { %8015 = vmatprep.subr.mxu0 %v7088_v17 }
0x170e   :  { %v3345_v18 = vmul.f32 %v3339_v57, %v3297_v38  ;;  %8016 = vmatpush3.msra.mxu0 %v7088_v17  ;;  %v7086_v38 = vld [vmem:[%s10592_s5 + $0x28] sm:$0xff]  ;;  %v7085_v57 = vld [vmem:[%s10592_s5 + $0x20] sm:$0xff] }
0x170f   :  { %8017 = vmatprep.subr.mxu0 %v7087_v5 }
0x1710   :  { %8009 = vmatprep.mubr.f32.mxu1 %v3345_v18  ;;  %8018 = vmatpush3.msra.mxu0 %v7087_v5 }
0x1711   :  { %8010 = vmatmul.mubr.f32.gmra.mxu1 %v3346_v0  ;;  %8019 = vmatprep.subr.mxu0 %v7086_v38 }
0x1712   :  { %8020 = vmatpush3.msra.mxu0 %v7086_v38 }
0x1713   :  { %8021 = vmatprep.subr.mxu0 %v7085_v57 }
0x1714   :  { %8022 = vmatpush3.msra.mxu0 %v7085_v57 }
0x1715   :  { %8032 = vmatprep.subr.mxu0 %v8766_v10 }
0x1744   :  { %v8008_v22 = vpop.f32.mrf.mxu1 }
0x1745   :  { %v3427_v58 = vadd.f32 %v8008_v22, %v9741_v20 }
0x1746   :  { %v3421_v24 = vpop.f32.mrf.mxu1 }
0x1747   :  { %v3451_v25 = vadd.f32 %v3427_v58, %v9588_v19  ;;  %v3422_v26 = vadd.f32 %v9741_v20, %v3421_v24 }
0x1749   :  { %3457 = vst.msk [vmem:[#allocation2 + $0x8] sm:$0xff] %vm171_vm1, %v3451_v25  ;;  %v3450_v27 = vadd.f32 %v3422_v26, %v9598_v47 }
0x174b   :  { %3456 = vst.msk [vmem:[#allocation2] sm:$0xff] %vm171_vm1, %v3450_v27 }
0x1750   :  { %v3499_v28 = vld [vmem:[#allocation2 + $0x8] sm:$0xff] }
0x1751   :  { %v3507_v29 = vsel %vm171_vm1, %v3499_v28, 0.0 }
0x1752   :  { %3508 = vadd.xlane.f32.xlu1 %v3507_v29  ;;  %v3498_v30 = vld [vmem:[#allocation2] sm:$0xff] }
0x1753   :  { %v3504_v9 = vsel %vm171_vm1, %v3498_v30, 0.0 }
0x1754   :  { %3505 = vadd.xlane.f32.xlu0 %v3504_v9 }
0x17c1   :  { %v7973_v32 = vpop.f32.mrf.mxu0 }
0x17c2   :  { %v3292_v34 = vadd.f32 %v7973_v32, %v9728_v33 }
0x17c3   :  { %v3286_v19 = vpop.f32.mrf.mxu0 }
0x17c4   :  { %v3306_v48 = vmul.f32 0.044715, %v3292_v34  ;;  %v3287_v37 = vadd.f32 %v9728_v33, %v3286_v19  ;;  %v3300_v56 = vmul.f32 0.5, %v3292_v34 }
0x17c6   :  { %v3312_v39 = vmul.f32 %v3306_v48, %v3292_v34  ;;  %v3305_v40 = vmul.f32 0.044715, %v3287_v37  ;;  %v3299_v59 = vmul.f32 0.5, %v3287_v37 }
0x17c8   :  { %v3311_v47 = vmul.f32 %v3305_v40, %v3287_v37  ;;  %v3318_v6 = vmul.f32 %v3312_v39, %v3292_v34 }
0x17ca   :  { %v3317_v50 = vmul.f32 %v3311_v47, %v3287_v37  ;;  %v3324_v42 = vadd.f32 %v3318_v6, %v3292_v34 }
0x17cc   :  { %v3323_v21 = vadd.f32 %v3317_v50, %v3287_v37  ;;  %v3330_v53 = vmul.f32 0.7978846, %v3324_v42 }
0x17ce   :  { %v3329_v43 = vmul.f32 0.7978846, %v3323_v21  ;;  %8584 = vtanh.f32 %v3330_v53 }
0x17d0   :  { %8586 = vtanh.f32 %v3329_v43 }
0x17d1   :  { %v8011_v31 = vpop.f32.mrf.mxu1 }
0x17d2   :  { %v3437_v45 = vadd.f32 %v8011_v31, %v9741_v20 }
0x17d3   :  { %v3431_v46 = vpop.f32.mrf.mxu1 }
0x17d4   :  { %v3453_v51 = vadd.f32 %v3437_v45, %v9628_v12  ;;  %v3432_v2 = vadd.f32 %v9741_v20, %v3431_v46 }
0x17d6   :  { %3459 = vst.msk [vmem:[#allocation2 + $0x18] sm:$0xff] %vm171_vm1, %v3453_v51  ;;  %v3452_v33 = vadd.f32 %v3432_v2, %v9605_v36 }
0x17d8   :  { %3458 = vst.msk [vmem:[#allocation2 + $0x10] sm:$0xff] %vm171_vm1, %v3452_v33 }
0x17db   :  { %v8585_v44 = vpop.eup %8584  ;;  %v3509_v61 = vpop.xlane.xlu1 %3508 }
0x17dc   :  { %v3523_v13 = vmul.f32 0.03125, %v3509_v61  ;;  %v3342_v63 = vadd.f32 1.0, %v8585_v44 }
0x17dd   :  { %v8587_v52 = vpop.eup %8586  ;;  %v3506_v54 = vpop.xlane.xlu0 %3505  ;;  %v3501_v55 = vld [vmem:[#allocation2 + $0x18] sm:$0xff] }
0x17de   :  { %v3529_v62 = vsub.f32 %v3499_v28, %v3523_v13  ;;  %v3522_v4 = vmul.f32 0.03125, %v3506_v54  ;;  %v3513_v12 = vsel %vm171_vm1, %v3501_v55, 0.0  ;;  %v3341_v1 = vadd.f32 1.0, %v8587_v52 }
0x17df   :  { %3514 = vadd.xlane.f32.xlu1 %v3513_v12  ;;  %v3500_v3 = vld [vmem:[#allocation2 + $0x10] sm:$0xff]  ;;  %v3348_v11 = vmul.f32 %v3342_v63, %v3300_v56 }
0x17e0   :  { %v3528_v49 = vsub.f32 %v3498_v30, %v3522_v4  ;;  %v3510_v36 = vsel %vm171_vm1, %v3500_v3, 0.0  ;;  %v3347_v7 = vmul.f32 %v3341_v1, %v3299_v59  ;;  %v3535_v8 = vmul.f32 %v3529_v62, %v3529_v62 }
0x17e1   :  { %3511 = vadd.xlane.f32.xlu0 %v3510_v36 }
0x17e2   :  { %8012 = vmatprep.mubr.f32.mxu1 %v3347_v7  ;;  %v3543_v14 = vsel %vm171_vm1, %v3535_v8, 0.0  ;;  %v3534_v15 = vmul.f32 %v3528_v49, %v3528_v49 }
0x17e3   :  { %8013 = vmatmul.mubr.f32.gmra.mxu1 %v3348_v11  ;;  %3544 = vadd.xlane.f32.xlu1 %v3543_v14 }
0x17e4   :  { %v3540_v16 = vsel %vm171_vm1, %v3534_v15, 0.0  ;;  %8053 = vmatprep.mubr.msk.f32.mxu1 %vm8768_vm4, %v8766_v10 }
0x17e5   :  { %3541 = vadd.xlane.f32.xlu0 %v3540_v16 }
0x1868   :  { %v3515_v41 = vpop.xlane.xlu1 %3514 }
0x1869   :  { %v3525_v18 = vmul.f32 0.03125, %v3515_v41 }
0x186a   :  { %v3512_v0 = vpop.xlane.xlu0 %3511 }
0x186b   :  { %v3531_v22 = vsub.f32 %v3501_v55, %v3525_v18  ;;  %v3524_v58 = vmul.f32 0.03125, %v3512_v0 }
0x186c   :  { %v3545_v24 = vpop.xlane.xlu1 %3544 }
0x186d   :  { %v3530_v25 = vsub.f32 %v3500_v3, %v3524_v58  ;;  %v3559_v26 = vmul.f32 0.03125, %v3545_v24  ;;  %v3537_v27 = vmul.f32 %v3531_v22, %v3531_v22 }
0x186e   :  { %v3542_v28 = vpop.xlane.xlu0 %3541 }
0x186f   :  { %v3565_v29 = vadd.f32 1e-05, %v3559_v26  ;;  %v3558_v30 = vmul.f32 0.03125, %v3542_v28  ;;  %v3549_v9 = vsel %vm171_vm1, %v3537_v27, 0.0  ;;  %v3536_v32 = vmul.f32 %v3530_v25, %v3530_v25 }
0x1870   :  { %3550 = vadd.xlane.f32.xlu1 %v3549_v9 }
0x1871   :  { %v3564_v34 = vadd.f32 1e-05, %v3558_v30  ;;  %v3546_v19 = vsel %vm171_vm1, %v3536_v32, 0.0  ;;  %8588 = vrsqrt.f32 %v3565_v29 }
0x1872   :  { %3547 = vadd.xlane.f32.xlu0 %v3546_v19 }
0x1873   :  { %8590 = vrsqrt.f32 %v3564_v34 }
0x187e   :  { %v8589_v48 = vpop.eup %8588 }
0x187f   :  { %v3577_v40 = vmul.f32 %v8589_v48, %v3529_v62 }
0x1880   :  { %v8591_v37 = vpop.eup %8590 }
0x1881   :  { %v3576_v39 = vmul.f32 %v8591_v37, %v3528_v49 }
0x1883   :  { %8023 = vmatprep.mubr.msk.f32.mxu0 %vm171_vm1, %v3576_v39 }
0x1884   :  { %8024 = vmatmul.mubr.msk.f32.vlgmr.msra.gmra.mxu0 %vm171_vm1, %v3577_v40 }
0x18a3   :  { %v8014_v47 = vpop.f32.mrf.mxu1 }
0x18a4   :  { %v3447_v6 = vadd.f32 %v8014_v47, %v9741_v20 }
0x18a5   :  { %v3441_v50 = vpop.f32.mrf.mxu1 }
0x18a6   :  { %v3455_v42 = vadd.f32 %v3447_v6, %v9669_v35  ;;  %v3442_v21 = vadd.f32 %v9741_v20, %v3441_v50 }
0x18a8   :  { %3461 = vst.msk [vmem:[#allocation2 + $0x28] sm:$0xff] %vm171_vm1, %v3455_v42  ;;  %v3454_v53 = vadd.f32 %v3442_v21, %v9648_v23 }
0x18aa   :  { %3460 = vst.msk [vmem:[#allocation2 + $0x20] sm:$0xff] %vm171_vm1, %v3454_v53 }
0x18af   :  { %v3503_v43 = vld [vmem:[#allocation2 + $0x28] sm:$0xff] }
0x18b0   :  { %v3519_v31 = vsel %vm171_vm1, %v3503_v43, 0.0 }
0x18b1   :  { %3520 = vadd.xlane.f32.xlu1 %v3519_v31  ;;  %v3502_v45 = vld [vmem:[#allocation2 + $0x20] sm:$0xff] }
0x18b2   :  { %v3516_v46 = vsel %vm171_vm1, %v3502_v45, 0.0 }
0x18b3   :  { %3517 = vadd.xlane.f32.xlu0 %v3516_v46 }
0x18f9   :  { %v3551_v51 = vpop.xlane.xlu1 %3550 }
0x18fa   :  { %v3561_v2 = vmul.f32 0.03125, %v3551_v51 }
0x18fb   :  { %v3548_v33 = vpop.xlane.xlu0 %3547 }
0x18fc   :  { %v3567_v35 = vadd.f32 1e-05, %v3561_v2  ;;  %v3560_v44 = vmul.f32 0.03125, %v3548_v33 }
0x18fe   :  { %v3566_v20 = vadd.f32 1e-05, %v3560_v44  ;;  %8592 = vrsqrt.f32 %v3567_v35 }
0x1900   :  { %8594 = vrsqrt.f32 %v3566_v20 }
0x190b   :  { %v8593_v61 = vpop.eup %8592 }
0x190c   :  { %v3579_v52 = vmul.f32 %v8593_v61, %v3531_v22 }
0x190d   :  { %v8595_v23 = vpop.eup %8594 }
0x190e   :  { %v3578_v13 = vmul.f32 %v8595_v23, %v3530_v25 }
0x1910   :  { %8026 = vmatprep.mubr.msk.f32.mxu0 %vm171_vm1, %v3578_v13 }
0x1911   :  { %8027 = vmatmul.mubr.msk.f32.gmra.mxu0 %vm171_vm1, %v3579_v52 }
0x193a   :  { %v3521_v54 = vpop.xlane.xlu1 %3520 }
0x193b   :  { %v3527_v55 = vmul.f32 0.03125, %v3521_v54 }
0x193c   :  { %v3518_v59 = vpop.xlane.xlu0 %3517 }
0x193d   :  { %v3533_v63 = vsub.f32 %v3503_v43, %v3527_v55  ;;  %v3526_v62 = vmul.f32 0.03125, %v3518_v59 }
0x193f   :  { %v3532_v4 = vsub.f32 %v3502_v45, %v3526_v62  ;;  %v3539_v12 = vmul.f32 %v3533_v63, %v3533_v63 }
0x1941   :  { %v3555_v1 = vsel %vm171_vm1, %v3539_v12, 0.0  ;;  %v3538_v3 = vmul.f32 %v3532_v4, %v3532_v4 }
0x1942   :  { %3556 = vadd.xlane.f32.xlu1 %v3555_v1 }
0x1943   :  { %v3552_v56 = vsel %vm171_vm1, %v3538_v3, 0.0 }
0x1944   :  { %3553 = vadd.xlane.f32.xlu0 %v3552_v56  ;;  %v9794_v49 = vpop.f32.mrf.mxu0 }
0x1946   :  { %v9798_v36 = vpop.f32.mrf.mxu0 }
0x1953   :  { %3700 = vrot.lane.b32.xlu1 %v9794_v49, %s8767_s21 }
0x1957   :  { %3698 = vrot.lane.b32.xlu1 %v9798_v36, %s8767_s21 }
0x19cb   :  { %v3557_v7 = vpop.xlane.xlu1 %3556 }
0x19cc   :  { %v3563_v8 = vmul.f32 0.03125, %v3557_v7 }
0x19cd   :  { %v3554_v11 = vpop.xlane.xlu0 %3553 }
0x19ce   :  { %v3569_v14 = vadd.f32 1e-05, %v3563_v8  ;;  %v3562_v15 = vmul.f32 0.03125, %v3554_v11 }
0x19cf   :  { %v3701_v22 = vpop.permute.xlu1 %3700 }
0x19d0   :  { %v3568_v16 = vadd.f32 1e-05, %v3562_v15  ;;  %8596 = vrsqrt.f32 %v3569_v14 }
0x19d1   :  { %v9802_v17 = vpop.f32.mrf.mxu0 }
0x19d2   :  { %8598 = vrsqrt.f32 %v3568_v16 }
0x19d3   :  { %v9804_v5 = vpop.f32.mrf.mxu0  ;;  %v3699_v58 = vpop.permute.xlu1 %3698 }
0x19d4   :  { %3943 = vrot.lane.b32.xlu1 %v9804_v5, %s8771_s0  ;;  %3702 = vrot.lane.b32.xlu0 %v9804_v5, %s8767_s21 }
0x19d8   :  { %3939 = vrot.lane.b32.xlu1 %v9798_v36, %s8771_s0  ;;  %3941 = vrot.lane.b32.xlu0 %v9794_v49, %s8771_s0 }
0x19dc   :  { %3935 = vrot.lane.b32.xlu1 %v9794_v49, %s8772_s1  ;;  %3933 = vrot.lane.b32.xlu0 %v9798_v36, %s8772_s1 }
0x19dd   :  { %v8597_v38 = vpop.eup %8596 }
0x19de   :  { %v3581_v18 = vmul.f32 %v8597_v38, %v3533_v63 }
0x19df   :  { %v8599_v57 = vpop.eup %8598 }
0x19e0   :  { %3937 = vrot.lane.b32.xlu0 %v9804_v5, %s8772_s1  ;;  %v3580_v41 = vmul.f32 %v8599_v57, %v3532_v4 }
0x19e2   :  { %8029 = vmatprep.mubr.msk.f32.mxu0 %vm171_vm1, %v3580_v41 }
0x19e3   :  { %8030 = vmatmul.mubr.msk.f32.gmra.mxu0 %vm171_vm1, %v3581_v18 }
0x19e4   :  { %8038 = vmatprep.mubr.msk.f32.mxu0 %vm8768_vm4, %v8766_v10 }
0x1a46   :  { %v3703_v0 = vpop.permute.xlu0 %3702  ;;  %v3944_v24 = vpop.permute.xlu1 %3943 }
0x1a47   :  { %8033 = vmatpush3.xpose.msk.msra.mxu0 %vm441_vm5, %v3703_v0 }
0x1a48   :  { %8034 = vmatprep.subr.mxu0 %v8766_v10 }
0x1a4a   :  { %v3942_v25 = vpop.permute.xlu0 %3941  ;;  %v3940_v26 = vpop.permute.xlu1 %3939 }
0x1a4b   :  { %8035 = vmatpush3.xpose.msk.msra.mxu0 %vm441_vm5, %v3701_v22 }
0x1a4c   :  { %8036 = vmatprep.subr.mxu0 %v8766_v10 }
0x1a4e   :  { %v3934_v27 = vpop.permute.xlu0 %3933  ;;  %v3936_v28 = vpop.permute.xlu1 %3935 }
0x1a4f   :  { %8037 = vmatpush3.xpose.msk.msra.mxu0 %vm441_vm5, %v3699_v58 }
0x1a50   :  { %8062 = vmatprep.subr.mxu0 %v8766_v10 }
0x1a52   :  { %8039 = vmatmul.mubr.msk.f32.vlgmr.msra.gmra.mxu0 %vm441_vm5, %v9798_v36  ;;  %v3938_v29 = vpop.permute.xlu0 %3937 }
0x1a53   :  { %8063 = vmatpush3.xpose.msk.msra.mxu0 %vm441_vm5, %v3944_v24  ;;  %8041 = vmatprep.mubr.msk.f32.mxu0 %vm8768_vm4, %v8766_v10 }
0x1a54   :  { %8064 = vmatprep.subr.mxu0 %v8766_v10 }
0x1a56   :  { %8042 = vmatmul.mubr.msk.f32.gmra.mxu0 %vm441_vm5, %v9794_v49 }
0x1a57   :  { %8065 = vmatpush3.xpose.msk.msra.mxu0 %vm441_vm5, %v3942_v25  ;;  %8044 = vmatprep.mubr.msk.f32.mxu0 %vm8768_vm4, %v8766_v10 }
0x1a58   :  { %8066 = vmatprep.subr.mxu0 %v8766_v10 }
0x1a5a   :  { %8045 = vmatmul.mubr.msk.f32.gmra.mxu0 %vm441_vm5, %v9804_v5 }
0x1a5b   :  { %8067 = vmatpush3.xpose.msk.msra.mxu0 %vm441_vm5, %v3940_v26  ;;  %8068 = vmatprep.mubr.msk.f32.mxu0 %vm8768_vm4, %v8766_v10 }
0x1a5c   :  { %8092 = vmatprep.subr.mxu0 %v8766_v10 }
0x1a5e   :  { %8069 = vmatmul.mubr.msk.f32.vlgmr.msra.gmra.mxu0 %vm441_vm5, %v3934_v27 }
0x1a5f   :  { %8071 = vmatprep.mubr.msk.f32.mxu0 %vm8768_vm4, %v8766_v10 }
0x1a62   :  { %8072 = vmatmul.mubr.msk.f32.gmra.mxu0 %vm441_vm5, %v3936_v28 }
0x1a63   :  { %8074 = vmatprep.mubr.msk.f32.mxu0 %vm8768_vm4, %v8766_v10 }
0x1a66   :  { %8075 = vmatmul.mubr.msk.f32.gmra.mxu0 %vm441_vm5, %v3938_v29 }
0x1a67   :  { %8094 = vmatprep.mubr.msk.f32.mxu0 %vm8768_vm4, %v8766_v10 }
0x1aa3   :  { %v9857_v30 = vpop.f32.mrf.mxu0 }
0x1aa5   :  { %v9859_v9 = vpop.f32.mrf.mxu0 }
0x1b12   :  { %v3782_v32 = vpop.f32.mrf.mxu0 }
0x1b13   :  { %v3796_v34 = vmul.f32 0.35355338, %v3782_v32 }
0x1b14   :  { %v8040_v19 = vpop.f32.mrf.mxu0 }
0x1b15   :  { %v3799_v48 = vadd.f32 %v3796_v34, %v9018_v60 }
0x1b16   :  { %v3787_v37 = vpop.f32.mrf.mxu0 }
0x1b17   :  { %v3797_v39 = vmul.f32 0.35355338, %v3787_v37  ;;  %v3802_v40 = vsel %vm540_vm7, %v3799_v48, -inf }
0x1b18   :  { %3803 = vmax.xlane.f32.xlu1 %v3802_v40  ;;  %v8043_v47 = vpop.f32.mrf.mxu0 }
0x1b19   :  { %v3800_v6 = vadd.f32 %v3797_v39, %v9018_v60 }
0x1b1a   :  { %v3792_v50 = vpop.f32.mrf.mxu0 }
0x1b1b   :  { %v3798_v42 = vmul.f32 0.35355338, %v3792_v50  ;;  %v3805_v21 = vsel %vm540_vm7, %v3800_v6, -inf }
0x1b1c   :  { %3806 = vmax.xlane.f32.xlu0 %v3805_v21  ;;  %v8046_v53 = vpop.f32.mrf.mxu0 }
0x1b1d   :  { %v3801_v43 = vadd.f32 %v3798_v42, %v9018_v60 }
0x1b1e   :  { %v4023_v31 = vpop.f32.mrf.mxu0 }
0x1b1f   :  { %v4037_v45 = vmul.f32 0.35355338, %v4023_v31  ;;  %v3808_v46 = vsel %vm540_vm7, %v3801_v43, -inf }
0x1b20   :  { %3809 = vmax.xlane.f32.xlu0 %v3808_v46  ;;  %v8070_v51 = vpop.f32.mrf.mxu0 }
0x1b21   :  { %v4040_v2 = vadd.f32 %v4037_v45, %v9018_v60 }
0x1b22   :  { %v4028_v33 = vpop.f32.mrf.mxu0 }
0x1b23   :  { %v4038_v35 = vmul.f32 0.35355338, %v4028_v33  ;;  %v4043_v44 = vsel %vm540_vm7, %v4040_v2, -inf }
0x1b24   :  { %4044 = vmax.xlane.f32.xlu0 %v4043_v44  ;;  %v8073_v20 = vpop.f32.mrf.mxu0 }
0x1b25   :  { %v4041_v61 = vadd.f32 %v4038_v35, %v9018_v60 }
0x1b26   :  { %v4033_v23 = vpop.f32.mrf.mxu0 }
0x1b27   :  { %v4039_v13 = vmul.f32 0.35355338, %v4033_v23  ;;  %v4046_v52 = vsel %vm540_vm7, %v4041_v61, -inf }
0x1b28   :  { %4047 = vmax.xlane.f32.xlu1 %v4046_v52  ;;  %v8076_v54 = vpop.f32.mrf.mxu0 }
0x1b29   :  { %v4042_v55 = vadd.f32 %v4039_v13, %v9018_v60 }
0x1b2b   :  { %v4049_v59 = vsel %vm540_vm7, %v4042_v55, -inf }
0x1b2c   :  { %4050 = vmax.xlane.f32.xlu0 %v4049_v59  ;;  %v9937_v59 = vld [vmem:[%s10593_s6 + $0x28] sm:$0xff] }
0x1b2d   :  { %8093 = vmatpush3.msra.mxu0 %v9937_v59 }
0x1b2e   :  { %8114 = vmatprep.subr.mxu0 %v8766_v10 }
0x1b39   :  { %3839 = vrot.lane.b32.xlu1 %v9804_v5, %s8770_s22 }
0x1b3d   :  { %3835 = vrot.lane.b32.xlu1 %v9798_v36, %s8770_s22 }
0x1b41   :  { %4080 = vrot.lane.b32.xlu1 %v9804_v5, %s8773_s23 }
0x1b42   :  { %3837 = vrot.lane.b32.xlu0 %v9794_v49, %s8770_s22 }
0x1ba1   :  { %v3804_v63 = vpop.xlane.xlu1 %3803 }
0x1ba2   :  { %v3811_v62 = vsub.f32 %v3799_v48, %v3804_v63 }
0x1ba4   :  { %v3814_v4 = vmul.f32 1.442695, %v3811_v62 }
0x1ba5   :  { %v3807_v12 = vpop.xlane.xlu0 %3806 }
0x1ba6   :  { %8600 = vpow2.f32 %v3814_v4  ;;  %v3812_v1 = vsub.f32 %v3800_v6, %v3807_v12 }
0x1ba8   :  { %v3816_v3 = vmul.f32 1.442695, %v3812_v1 }
0x1ba9   :  { %v3810_v56 = vpop.xlane.xlu0 %3809 }
0x1baa   :  { %8602 = vpow2.f32 %v3816_v3  ;;  %v3813_v7 = vsub.f32 %v3801_v43, %v3810_v56 }
0x1bac   :  { %v3818_v8 = vmul.f32 1.442695, %v3813_v7 }
0x1bad   :  { %v4045_v11 = vpop.xlane.xlu0 %4044 }
0x1bae   :  { %8604 = vpow2.f32 %v3818_v8  ;;  %v4052_v14 = vsub.f32 %v4040_v2, %v4045_v11 }
0x1bb0   :  { %v4055_v15 = vmul.f32 1.442695, %v4052_v14 }
0x1bb1   :  { %v4048_v16 = vpop.xlane.xlu1 %4047 }
0x1bb2   :  { %8606 = vpow2.f32 %v4055_v15  ;;  %v4053_v38 = vsub.f32 %v4041_v61, %v4048_v16 }
0x1bb3   :  { %v8601_v57 = vpop.eup %8600 }
0x1bb4   :  { %v4057_v41 = vmul.f32 1.442695, %v4053_v38  ;;  %v3820_v18 = vsel %vm540_vm7, %v8601_v57, 0.0 }
0x1bb5   :  { %3821 = vadd.xlane.f32.xlu1 %v3820_v18  ;;  %v3840_v0 = vpop.permute.xlu1 %3839  ;;  %v4051_v22 = vpop.xlane.xlu0 %4050 }
0x1bb6   :  { %8608 = vpow2.f32 %v4057_v41  ;;  %v4054_v58 = vsub.f32 %v4042_v55, %v4051_v22  ;;  %8048 = vmatpush3.msra.mxu1 %v3840_v0  ;;  %v9930_v55 = vld [vmem:[%s10593_s6 + $0x20] sm:$0xff] }
0x1bb7   :  { %v8603_v24 = vpop.eup %8602  ;;  %8049 = vmatprep.subr.mxu1 %v8766_v10 }
0x1bb8   :  { %v4059_v25 = vmul.f32 1.442695, %v4054_v58  ;;  %v3823_v26 = vsel %vm540_vm7, %v8603_v24, 0.0 }
0x1bb9   :  { %3824 = vadd.xlane.f32.xlu0 %v3823_v26  ;;  %v3838_v27 = vpop.permute.xlu0 %3837  ;;  %v3836_v29 = vpop.permute.xlu1 %3835 }
0x1bba   :  { %8610 = vpow2.f32 %v4059_v25  ;;  %8050 = vmatpush3.msra.mxu1 %v3838_v27 }
0x1bbb   :  { %v8605_v28 = vpop.eup %8604  ;;  %8051 = vmatprep.subr.mxu1 %v8766_v10 }
0x1bbc   :  { %8052 = vmatpush3.msra.mxu1 %v3836_v29  ;;  %v3826_v32 = vsel %vm540_vm7, %v8605_v28, 0.0 }
0x1bbd   :  { %3827 = vadd.xlane.f32.xlu1 %v3826_v32  ;;  %8077 = vmatprep.subr.mxu1 %v8766_v10  ;;  %v4081_v47 = vpop.permute.xlu1 %4080 }
0x1bbf   :  { %v8607_v34 = vpop.eup %8606 }
0x1bc0   :  { %v4061_v19 = vsel %vm540_vm7, %v8607_v34, 0.0 }
0x1bc1   :  { %4062 = vadd.xlane.f32.xlu0 %v4061_v19 }
0x1bc3   :  { %v8609_v48 = vpop.eup %8608 }
0x1bc4   :  { %v4064_v37 = vsel %vm540_vm7, %v8609_v48, 0.0 }
0x1bc5   :  { %4065 = vadd.xlane.f32.xlu1 %v4064_v37 }
0x1bc7   :  { %v8611_v39 = vpop.eup %8610 }
0x1bc8   :  { %v4067_v40 = vsel %vm540_vm7, %v8611_v39, 0.0 }
0x1bc9   :  { %4068 = vadd.xlane.f32.xlu0 %v4067_v40 }
0x1bd6   :  { %4078 = vrot.lane.b32.xlu1 %v9794_v49, %s8773_s23 }
0x1bda   :  { %4362 = vrot.lane.b32.xlu1 %v9804_v5, %s8774_s24 }
0x1bde   :  { %4358 = vrot.lane.b32.xlu1 %v9798_v36, %s8774_s24 }
0x1bdf   :  { %4076 = vrot.lane.b32.xlu0 %v9798_v36, %s8773_s23 }
0x1be2   :  { %4354 = vrot.lane.b32.xlu1 %v9794_v49, %s8775_s25 }
0x1be3   :  { %4360 = vrot.lane.b32.xlu0 %v9794_v49, %s8774_s24 }
0x1be7   :  { %4352 = vrot.lane.b32.xlu0 %v9798_v36, %s8775_s25 }
0x1beb   :  { %4356 = vrot.lane.b32.xlu0 %v9804_v5, %s8775_s25 }
0x1c3e   :  { %v3822_v6 = vpop.xlane.xlu1 %3821 }
0x1c3f   :  { %8612 = vrcp.f32 %v3822_v6 }
0x1c42   :  { %v3825_v50 = vpop.xlane.xlu0 %3824 }
0x1c43   :  { %8614 = vrcp.f32 %v3825_v50 }
0x1c46   :  { %v3828_v42 = vpop.xlane.xlu1 %3827 }
0x1c47   :  { %8616 = vrcp.f32 %v3828_v42 }
0x1c4a   :  { %v4063_v21 = vpop.xlane.xlu0 %4062 }
0x1c4b   :  { %8618 = vrcp.f32 %v4063_v21 }
0x1c4c   :  { %v8613_v53 = vpop.eup %8612 }
0x1c4d   :  { %v3830_v43 = vmul.f32 %v8613_v53, %v8601_v57 }
0x1c4e   :  { %v4066_v31 = vpop.xlane.xlu1 %4065 }
0x1c4f   :  { %8620 = vrcp.f32 %v4066_v31  ;;  %8054 = vmatmul.mubr.msk.f32.vlgmr.msra.gmra.mxu1 %vm540_vm7, %v3830_v43 }
0x1c50   :  { %v8615_v45 = vpop.eup %8614  ;;  %8078 = vmatpush3.msra.mxu1 %v4081_v47  ;;  %8056 = vmatprep.mubr.msk.f32.mxu1 %vm8768_vm4, %v8766_v10 }
0x1c51   :  { %8079 = vmatprep.subr.mxu1 %v8766_v10  ;;  %v3832_v46 = vmul.f32 %v8615_v45, %v8603_v24 }
0x1c52   :  { %v4079_v51 = vpop.permute.xlu1 %4078  ;;  %v4069_v2 = vpop.xlane.xlu0 %4068 }
0x1c53   :  { %8622 = vrcp.f32 %v4069_v2  ;;  %8057 = vmatmul.mubr.msk.f32.gmra.mxu1 %vm540_vm7, %v3832_v46 }
0x1c54   :  { %v8617_v33 = vpop.eup %8616  ;;  %8080 = vmatpush3.msra.mxu1 %v4079_v51  ;;  %8059 = vmatprep.mubr.msk.f32.mxu1 %vm8768_vm4, %v8766_v10 }
0x1c55   :  { %8081 = vmatprep.subr.mxu1 %v8766_v10  ;;  %v3834_v35 = vmul.f32 %v8617_v33, %v8605_v28 }
0x1c56   :  { %v4077_v44 = vpop.permute.xlu0 %4076  ;;  %v4363_v7 = vpop.permute.xlu1 %4362 }
0x1c57   :  { %8060 = vmatmul.mubr.msk.f32.gmra.mxu1 %vm540_vm7, %v3834_v35 }
0x1c58   :  { %v8619_v20 = vpop.eup %8618  ;;  %8082 = vmatpush3.msra.mxu1 %v4077_v44  ;;  %8083 = vmatprep.mubr.msk.f32.mxu1 %vm8768_vm4, %v8766_v10 }
0x1c59   :  { %v4071_v61 = vmul.f32 %v8619_v20, %v8607_v34  ;;  %8103 = vmatprep.subr.mxu1 %v8766_v10 }
0x1c5a   :  { %v4361_v14 = vpop.permute.xlu0 %4360  ;;  %v4359_v38 = vpop.permute.xlu1 %4358 }
0x1c5b   :  { %8084 = vmatmul.mubr.msk.f32.vlgmr.msra.gmra.mxu1 %vm540_vm7, %v4071_v61 }
0x1c5c   :  { %v8621_v23 = vpop.eup %8620  ;;  %8086 = vmatprep.mubr.msk.f32.mxu1 %vm8768_vm4, %v8766_v10  ;;  %8104 = vmatpush3.msra.mxu1 %v9930_v55 }
0x1c5d   :  { %v4073_v13 = vmul.f32 %v8621_v23, %v8609_v48  ;;  %8129 = vmatprep.subr.mxu1 %v8766_v10 }
0x1c5e   :  { %v4353_v41 = vpop.permute.xlu0 %4352  ;;  %v4355_v18 = vpop.permute.xlu1 %4354 }
0x1c5f   :  { %8087 = vmatmul.mubr.msk.f32.gmra.mxu1 %vm540_vm7, %v4073_v13 }
0x1c60   :  { %v8623_v52 = vpop.eup %8622  ;;  %8089 = vmatprep.mubr.msk.f32.mxu1 %vm8768_vm4, %v8766_v10 }
0x1c61   :  { %v4075_v54 = vmul.f32 %v8623_v52, %v8611_v39 }
0x1c62   :  { %v4357_v0 = vpop.permute.xlu0 %4356 }
0x1c63   :  { %8090 = vmatmul.mubr.msk.f32.gmra.mxu1 %vm540_vm7, %v4075_v54 }
0x1c64   :  { %8105 = vmatprep.mubr.msk.f32.mxu1 %vm8768_vm4, %v8766_v10 }
0x1d0f   :  { %v3919_v63 = vpop.f32.mrf.mxu1 }
0x1d10   :  { %8106 = vmatmul.mubr.msk.f32.vlgmr.msra.gmra.mxu1 %vm441_vm5, %v3919_v63 }
0x1d11   :  { %v8055_v62 = vpop.f32.mrf.mxu1  ;;  %8108 = vmatprep.mubr.msk.f32.mxu1 %vm8768_vm4, %v8766_v10 }
0x1d13   :  { %v3924_v4 = vpop.f32.mrf.mxu1 }
0x1d14   :  { %8109 = vmatmul.mubr.msk.f32.gmra.mxu1 %vm441_vm5, %v3924_v4 }
0x1d15   :  { %v8058_v12 = vpop.f32.mrf.mxu1  ;;  %8111 = vmatprep.mubr.msk.f32.mxu1 %vm8768_vm4, %v8766_v10 }
0x1d17   :  { %v3929_v1 = vpop.f32.mrf.mxu1 }
0x1d18   :  { %8112 = vmatmul.mubr.msk.f32.gmra.mxu1 %vm441_vm5, %v3929_v1 }
0x1d19   :  { %v8061_v3 = vpop.f32.mrf.mxu1  ;;  %8135 = vmatprep.mubr.msk.f32.mxu1 %vm8768_vm4, %v8766_v10 }
0x1d1b   :  { %v4160_v56 = vpop.f32.mrf.mxu1 }
0x1d1c   :  { %8095 = vmatmul.mubr.msk.f32.vlgmr.msra.gmra.mxu0 %vm441_vm5, %v4160_v56 }
0x1d1d   :  { %8115 = vmatpush3.xpose.msk.msra.mxu0 %vm441_vm5, %v4363_v7  ;;  %v8085_v8 = vpop.f32.mrf.mxu1  ;;  %8097 = vmatprep.mubr.msk.f32.mxu0 %vm8768_vm4, %v8766_v10 }
0x1d1e   :  { %8116 = vmatprep.subr.mxu0 %v8766_v10 }
0x1d1f   :  { %v4165_v11 = vpop.f32.mrf.mxu1 }
0x1d20   :  { %8098 = vmatmul.mubr.msk.f32.gmra.mxu0 %vm441_vm5, %v4165_v11 }
0x1d21   :  { %8117 = vmatpush3.xpose.msk.msra.mxu0 %vm441_vm5, %v4361_v14  ;;  %v8088_v15 = vpop.f32.mrf.mxu1  ;;  %8100 = vmatprep.mubr.msk.f32.mxu0 %vm8768_vm4, %v8766_v10 }
0x1d22   :  { %8118 = vmatprep.subr.mxu0 %v8766_v10 }
0x1d23   :  { %v4170_v16 = vpop.f32.mrf.mxu1 }
0x1d24   :  { %8101 = vmatmul.mubr.msk.f32.gmra.mxu0 %vm441_vm5, %v4170_v16 }
0x1d25   :  { %8119 = vmatpush3.xpose.msk.msra.mxu0 %vm441_vm5, %v4359_v38  ;;  %v8091_v57 = vpop.f32.mrf.mxu1  ;;  %8120 = vmatprep.mubr.msk.f32.mxu0 %vm8768_vm4, %v8766_v10 }
0x1d26   :  { %8144 = vmatprep.subr.mxu0 %v8766_v10 }
0x1d28   :  { %8121 = vmatmul.mubr.msk.f32.vlgmr.msra.gmra.mxu0 %vm441_vm5, %v4353_v41 }
0x1d29   :  { %8123 = vmatprep.mubr.msk.f32.mxu0 %vm8768_vm4, %v8766_v10 }
0x1d2c   :  { %8124 = vmatmul.mubr.msk.f32.gmra.mxu0 %vm441_vm5, %v4355_v18 }
0x1d2d   :  { %8126 = vmatprep.mubr.msk.f32.mxu0 %vm8768_vm4, %v8766_v10 }
0x1d30   :  { %8127 = vmatmul.mubr.msk.f32.gmra.mxu0 %vm441_vm5, %v4357_v0 }
0x1d31   :  { %8146 = vmatprep.mubr.msk.f32.mxu0 %vm8768_vm4, %v8766_v10 }
0x1dd0   :  { %v4338_v22 = vpop.f32.mrf.mxu1 }
0x1dd2   :  { %v8107_v58 = vpop.f32.mrf.mxu1 }
0x1dd4   :  { %v4343_v24 = vpop.f32.mrf.mxu1 }
0x1dd6   :  { %v8110_v25 = vpop.f32.mrf.mxu1 }
0x1dd8   :  { %v4348_v26 = vpop.f32.mrf.mxu1 }
0x1dda   :  { %v8113_v27 = vpop.f32.mrf.mxu1 }
0x1ddc   :  { %v4249_v28 = vpop.f32.mrf.mxu0 }
0x1ddd   :  { %v9974_v29 = vadd.f32 %v4338_v22, %v4249_v28 }
0x1dde   :  { %v8096_v32 = vpop.f32.mrf.mxu0 }
0x1de0   :  { %v4254_v34 = vpop.f32.mrf.mxu0 }
0x1de1   :  { %v9976_v19 = vadd.f32 %v4343_v24, %v4254_v34 }
0x1de2   :  { %v8099_v48 = vpop.f32.mrf.mxu0 }
0x1de3   :  { %v10034_v48 = vld [vmem:[%s10593_s6 + $0x30] sm:$0xff] }
0x1de4   :  { %v4259_v37 = vpop.f32.mrf.mxu0  ;;  %8145 = vmatpush3.msra.mxu0 %v10034_v48 }
0x1de5   :  { %v9978_v39 = vadd.f32 %v4348_v26, %v4259_v37  ;;  %8170 = vmatprep.subr.mxu0 %v8766_v10 }
0x1de6   :  { %v8102_v40 = vpop.f32.mrf.mxu0 }
0x1de8   :  { %v4442_v47 = vpop.f32.mrf.mxu0 }
0x1de9   :  { %v4456_v6 = vmul.f32 0.35355338, %v4442_v47 }
0x1dea   :  { %v8122_v50 = vpop.f32.mrf.mxu0 }
0x1deb   :  { %v4459_v42 = vadd.f32 %v4456_v6, %v9018_v60 }
0x1dec   :  { %v4447_v21 = vpop.f32.mrf.mxu0 }
0x1ded   :  { %v4457_v53 = vmul.f32 0.35355338, %v4447_v21  ;;  %v4462_v43 = vsel %vm540_vm7, %v4459_v42, -inf }
0x1dee   :  { %4463 = vmax.xlane.f32.xlu1 %v4462_v43  ;;  %v8125_v31 = vpop.f32.mrf.mxu0 }
0x1def   :  { %v4460_v45 = vadd.f32 %v4457_v53, %v9018_v60 }
0x1df0   :  { %v4452_v46 = vpop.f32.mrf.mxu0 }
0x1df1   :  { %v4458_v51 = vmul.f32 0.35355338, %v4452_v46  ;;  %v4465_v2 = vsel %vm540_vm7, %v4460_v45, -inf }
0x1df2   :  { %4466 = vmax.xlane.f32.xlu0 %v4465_v2  ;;  %v8128_v33 = vpop.f32.mrf.mxu0 }
0x1df3   :  { %v4461_v35 = vadd.f32 %v4458_v51, %v9018_v60 }
0x1df5   :  { %v4468_v44 = vsel %vm540_vm7, %v4461_v35, -inf }
0x1df6   :  { %4469 = vmax.xlane.f32.xlu0 %v4468_v44 }
0x1dff   :  { %4499 = vrot.lane.b32.xlu1 %v9804_v5, %s8776_s30 }
0x1e03   :  { %4495 = vrot.lane.b32.xlu1 %v9798_v36, %s8776_s30 }
0x1e07   :  { %4695 = vrot.lane.b32.xlu1 %v9804_v5, %s8777_s2 }
0x1e0b   :  { %4693 = vrot.lane.b32.xlu1 %v9794_v49, %s8777_s2 }
0x1e77   :  { %v4464_v20 = vpop.xlane.xlu1 %4463 }
0x1e78   :  { %v4471_v61 = vsub.f32 %v4459_v42, %v4464_v20 }
0x1e7a   :  { %v4474_v23 = vmul.f32 1.442695, %v4471_v61 }
0x1e7b   :  { %v4500_v13 = vpop.permute.xlu1 %4499  ;;  %v4467_v52 = vpop.xlane.xlu0 %4466 }
0x1e7c   :  { %8624 = vpow2.f32 %v4474_v23  ;;  %v4472_v54 = vsub.f32 %v4460_v45, %v4467_v52  ;;  %8130 = vmatpush3.msra.mxu1 %v4500_v13 }
0x1e7d   :  { %8131 = vmatprep.subr.mxu1 %v8766_v10 }
0x1e7e   :  { %v4476_v63 = vmul.f32 1.442695, %v4472_v54 }
0x1e7f   :  { %v4470_v3 = vpop.xlane.xlu0 %4469  ;;  %v4496_v14 = vpop.permute.xlu1 %4495 }
0x1e80   :  { %8626 = vpow2.f32 %v4476_v63  ;;  %v4473_v56 = vsub.f32 %v4461_v35, %v4470_v3 }
0x1e82   :  { %v4478_v7 = vmul.f32 1.442695, %v4473_v56 }
0x1e83   :  { %v4696_v15 = vpop.permute.xlu1 %4695 }
0x1e84   :  { %8628 = vpow2.f32 %v4478_v7 }
0x1e87   :  { %v4694_v16 = vpop.permute.xlu1 %4693 }
0x1e89   :  { %v8625_v62 = vpop.eup %8624 }
0x1e8a   :  { %v4480_v4 = vsel %vm540_vm7, %v8625_v62, 0.0 }
0x1e8b   :  { %4481 = vadd.xlane.f32.xlu0 %v4480_v4 }
0x1e8d   :  { %v8627_v12 = vpop.eup %8626 }
0x1e8e   :  { %v4483_v1 = vsel %vm540_vm7, %v8627_v12, 0.0 }
0x1e8f   :  { %4484 = vadd.xlane.f32.xlu1 %v4483_v1 }
0x1e91   :  { %v8629_v8 = vpop.eup %8628 }
0x1e92   :  { %v4486_v11 = vsel %vm540_vm7, %v8629_v8, 0.0 }
0x1ea0   :  { %4685 = vrot.lane.b32.xlu1 %v9798_v36, %s8778_s3 }
0x1ea1   :  { %4497 = vrot.lane.b32.xlu0 %v9794_v49, %s8776_s30 }
0x1ea4   :  { %4689 = vrot.lane.b32.xlu1 %v9804_v5, %s8778_s3 }
0x1ec0   :  { %4487 = vadd.xlane.f32.xlu0 %v4486_v11 }
0x1ed6   :  { %4691 = vrot.lane.b32.xlu0 %v9798_v36, %s8777_s2 }
0x1eda   :  { %4687 = vrot.lane.b32.xlu0 %v9794_v49, %s8778_s3 }
0x1f14   :  { %v4482_v38 = vpop.xlane.xlu0 %4481 }
0x1f15   :  { %8630 = vrcp.f32 %v4482_v38 }
0x1f18   :  { %v4485_v57 = vpop.xlane.xlu1 %4484  ;;  %v4498_v41 = vpop.permute.xlu0 %4497 }
0x1f19   :  { %8632 = vrcp.f32 %v4485_v57  ;;  %8132 = vmatpush3.msra.mxu1 %v4498_v41 }
0x1f1a   :  { %8133 = vmatprep.subr.mxu1 %v8766_v10 }
0x1f1b   :  { %8134 = vmatpush3.msra.mxu1 %v4496_v14 }
0x1f1c   :  { %8155 = vmatprep.subr.mxu1 %v8766_v10  ;;  %v4686_v28 = vpop.permute.xlu1 %4685 }
0x1f20   :  { %v4690_v34 = vpop.permute.xlu1 %4689 }
0x1f22   :  { %v8631_v18 = vpop.eup %8630 }
0x1f23   :  { %v4490_v0 = vmul.f32 %v8631_v18, %v8625_v62 }
0x1f25   :  { %8136 = vmatmul.mubr.msk.f32.vlgmr.msra.gmra.mxu1 %vm540_vm7, %v4490_v0 }
0x1f26   :  { %v8633_v22 = vpop.eup %8632  ;;  %8156 = vmatpush3.xpose.msk.msra.mxu1 %vm441_vm5, %v4696_v15  ;;  %8138 = vmatprep.mubr.msk.f32.mxu1 %vm8768_vm4, %v8766_v10 }
0x1f27   :  { %8157 = vmatprep.subr.mxu1 %v8766_v10  ;;  %v4492_v58 = vmul.f32 %v8633_v22, %v8627_v12 }
0x1f29   :  { %8139 = vmatmul.mubr.msk.f32.gmra.mxu1 %vm540_vm7, %v4492_v58 }
0x1f2a   :  { %8158 = vmatpush3.xpose.msk.msra.mxu1 %vm441_vm5, %v4694_v16  ;;  %8141 = vmatprep.mubr.msk.f32.mxu1 %vm8768_vm4, %v8766_v10 }
0x1f2b   :  { %8159 = vmatprep.subr.mxu1 %v8766_v10 }
0x1f49   :  { %v4488_v24 = vpop.xlane.xlu0 %4487 }
0x1f4a   :  { %8634 = vrcp.f32 %v4488_v24 }
0x1f4d   :  { %v4692_v25 = vpop.permute.xlu0 %4691 }
0x1f4e   :  { %8160 = vmatpush3.xpose.msk.msra.mxu1 %vm441_vm5, %v4692_v25 }
0x1f4f   :  { %8185 = vmatprep.subr.mxu1 %v8766_v10 }
0x1f51   :  { %v4688_v32 = vpop.permute.xlu0 %4687 }
0x1f57   :  { %v8635_v26 = vpop.eup %8634 }
0x1f58   :  { %v4494_v27 = vmul.f32 %v8635_v26, %v8629_v8 }
0x1f5a   :  { %8142 = vmatmul.mubr.msk.f32.gmra.mxu1 %vm540_vm7, %v4494_v27 }
0x1f5b   :  { %8161 = vmatprep.mubr.msk.f32.mxu1 %vm8768_vm4, %v8766_v10 }
0x1f5e   :  { %8162 = vmatmul.mubr.msk.f32.vlgmr.msra.gmra.mxu1 %vm441_vm5, %v4686_v28 }
0x1f5f   :  { %8164 = vmatprep.mubr.msk.f32.mxu1 %vm8768_vm4, %v8766_v10 }
0x1f62   :  { %8165 = vmatmul.mubr.msk.f32.gmra.mxu1 %vm441_vm5, %v4688_v32 }
0x1f63   :  { %8167 = vmatprep.mubr.msk.f32.mxu1 %vm8768_vm4, %v8766_v10 }
0x1f66   :  { %8168 = vmatmul.mubr.msk.f32.gmra.mxu1 %vm441_vm5, %v4690_v34 }
0x1f67   :  { %8187 = vmatprep.mubr.msk.f32.mxu1 %vm8768_vm4, %v8766_v10 }
0x1fe5   :  { %v4579_v37 = vpop.f32.mrf.mxu1 }
0x1fe6   :  { %8147 = vmatmul.mubr.msk.f32.vlgmr.msra.gmra.mxu0 %vm441_vm5, %v4579_v37 }
0x1fe7   :  { %v8137_v40 = vpop.f32.mrf.mxu1  ;;  %8149 = vmatprep.mubr.msk.f32.mxu0 %vm8768_vm4, %v8766_v10 }
0x1fe9   :  { %v4584_v47 = vpop.f32.mrf.mxu1 }
0x1fea   :  { %8150 = vmatmul.mubr.msk.f32.gmra.mxu0 %vm441_vm5, %v4584_v47 }
0x1feb   :  { %v8140_v6 = vpop.f32.mrf.mxu1  ;;  %8152 = vmatprep.mubr.msk.f32.mxu0 %vm8768_vm4, %v8766_v10 }
0x201a   :  { %v4589_v50 = vpop.f32.mrf.mxu1 }
0x201b   :  { %8153 = vmatmul.mubr.msk.f32.gmra.mxu0 %vm441_vm5, %v4589_v50 }
0x201c   :  { %v8143_v42 = vpop.f32.mrf.mxu1  ;;  %8176 = vmatprep.mubr.msk.f32.mxu0 %vm8768_vm4, %v8766_v10 }
0x201e   :  { %v4775_v21 = vpop.f32.mrf.mxu1 }
0x201f   :  { %v4789_v53 = vmul.f32 0.35355338, %v4775_v21 }
0x2020   :  { %v8163_v43 = vpop.f32.mrf.mxu1 }
0x2021   :  { %v4792_v31 = vadd.f32 %v4789_v53, %v9018_v60 }
0x2022   :  { %v4780_v45 = vpop.f32.mrf.mxu1 }
0x2023   :  { %v4790_v46 = vmul.f32 0.35355338, %v4780_v45  ;;  %v4795_v51 = vsel %vm540_vm7, %v4792_v31, -inf  ;;  %v10142_v45 = vld [vmem:[%s10593_s6 + $0x38] sm:$0xff] }
0x2024   :  { %4796 = vmax.xlane.f32.xlu0 %v4795_v51  ;;  %v8166_v2 = vpop.f32.mrf.mxu1  ;;  %8186 = vmatpush3.msra.mxu1 %v10142_v45 }
0x2025   :  { %v4793_v33 = vadd.f32 %v4790_v46, %v9018_v60  ;;  %8211 = vmatprep.subr.mxu1 %v8766_v10 }
0x2026   :  { %v4785_v35 = vpop.f32.mrf.mxu1 }
0x2027   :  { %v4791_v44 = vmul.f32 0.35355338, %v4785_v35  ;;  %v4798_v20 = vsel %vm540_vm7, %v4793_v33, -inf }
0x2028   :  { %4799 = vmax.xlane.f32.xlu1 %v4798_v20  ;;  %v8169_v61 = vpop.f32.mrf.mxu1 }
0x2029   :  { %v4794_v23 = vadd.f32 %v4791_v44, %v9018_v60 }
0x202b   :  { %v4801_v13 = vsel %vm540_vm7, %v4794_v23, -inf }
0x202c   :  { %4802 = vmax.xlane.f32.xlu0 %v4801_v13 }
0x2039   :  { %4830 = vrot.lane.b32.xlu1 %v9794_v49, %s8779_s17 }
0x203d   :  { %4828 = vrot.lane.b32.xlu1 %v9798_v36, %s8779_s17 }
0x2041   :  { %5031 = vrot.lane.b32.xlu1 %v9857_v30, %s8767_s21 }
0x2042   :  { %4832 = vrot.lane.b32.xlu0 %v9804_v5, %s8779_s17 }
0x20a6   :  { %v4668_v52 = vpop.f32.mrf.mxu0 }
0x20a7   :  { %v10065_v54 = vadd.f32 %v4668_v52, %v9974_v29 }
0x20a8   :  { %v8148_v63 = vpop.f32.mrf.mxu0 }
0x20aa   :  { %v4673_v62 = vpop.f32.mrf.mxu0 }
0x20ab   :  { %v10068_v4 = vadd.f32 %v4673_v62, %v9976_v19 }
0x20ac   :  { %v8151_v12 = vpop.f32.mrf.mxu0 }
0x20ad   :  { %v4797_v49 = vpop.xlane.xlu0 %4796 }
0x20ae   :  { %v4804_v1 = vsub.f32 %v4792_v31, %v4797_v49 }
0x20b0   :  { %v4807_v3 = vmul.f32 1.442695, %v4804_v1 }
0x20b1   :  { %v4800_v36 = vpop.xlane.xlu1 %4799 }
0x20b2   :  { %8636 = vpow2.f32 %v4807_v3  ;;  %v4805_v56 = vsub.f32 %v4793_v33, %v4800_v36 }
0x20b4   :  { %v4809_v7 = vmul.f32 1.442695, %v4805_v56 }
0x20b5   :  { %v4803_v8 = vpop.xlane.xlu0 %4802  ;;  %v4831_v11 = vpop.permute.xlu1 %4830 }
0x20b6   :  { %8638 = vpow2.f32 %v4809_v7  ;;  %v4806_v5 = vsub.f32 %v4794_v23, %v4803_v8 }
0x20b8   :  { %v4811_v14 = vmul.f32 1.442695, %v4806_v5 }
0x20b9   :  { %v4833_v29 = vpop.permute.xlu0 %4832  ;;  %v4829_v19 = vpop.permute.xlu1 %4828 }
0x20ba   :  { %8640 = vpow2.f32 %v4811_v14  ;;  %8171 = vmatpush3.msra.mxu0 %v4833_v29 }
0x20bb   :  { %8172 = vmatprep.subr.mxu0 %v8766_v10 }
0x20bc   :  { %8173 = vmatpush3.msra.mxu0 %v4831_v11 }
0x20bd   :  { %8174 = vmatprep.subr.mxu0 %v8766_v10  ;;  %v5032_v24 = vpop.permute.xlu1 %5031 }
0x20be   :  { %8175 = vmatpush3.msra.mxu0 %v4829_v19 }
0x20bf   :  { %v8637_v15 = vpop.eup %8636  ;;  %8196 = vmatprep.subr.mxu0 %v8766_v10 }
0x20c0   :  { %v4813_v16 = vsel %vm540_vm7, %v8637_v15, 0.0 }
0x20c1   :  { %4814 = vadd.xlane.f32.xlu0 %v4813_v16 }
0x20c3   :  { %v8639_v38 = vpop.eup %8638 }
0x20c4   :  { %v4816_v57 = vsel %vm540_vm7, %v8639_v38, 0.0 }
0x20c5   :  { %4817 = vadd.xlane.f32.xlu0 %v4816_v57 }
0x20c7   :  { %v8641_v41 = vpop.eup %8640 }
0x20c8   :  { %v4819_v18 = vsel %vm540_vm7, %v8641_v41, 0.0 }
0x20c9   :  { %4820 = vadd.xlane.f32.xlu1 %v4819_v18 }
0x20da   :  { %5027 = vrot.lane.b32.xlu1 %v9802_v17, %s8767_s21 }
0x20db   :  { %v4678_v0 = vpop.f32.mrf.mxu0  ;;  %5029 = vrot.lane.b32.xlu0 %v9859_v9, %s8767_s21 }
0x20dc   :  { %v10081_v22 = vadd.f32 %v4678_v0, %v9978_v39 }
0x20dd   :  { %v8154_v58 = vpop.f32.mrf.mxu0 }
0x20de   :  { %5270 = vrot.lane.b32.xlu1 %v9859_v9, %s8771_s0 }
0x20df   :  { %5272 = vrot.lane.b32.xlu0 %v9857_v30, %s8771_s0 }
0x20e2   :  { %5262 = vrot.lane.b32.xlu1 %v9802_v17, %s8772_s1 }
0x20e3   :  { %5268 = vrot.lane.b32.xlu0 %v9802_v17, %s8771_s0 }
0x20e6   :  { %5266 = vrot.lane.b32.xlu1 %v9857_v30, %s8772_s1 }
0x20e7   :  { %5264 = vrot.lane.b32.xlu0 %v9859_v9, %s8772_s1 }
0x214a   :  { %v4815_v39 = vpop.xlane.xlu0 %4814 }
0x214b   :  { %8642 = vrcp.f32 %v4815_v39 }
0x214e   :  { %v4818_v25 = vpop.xlane.xlu0 %4817 }
0x214f   :  { %8644 = vrcp.f32 %v4818_v25 }
0x2152   :  { %v4821_v26 = vpop.xlane.xlu1 %4820  ;;  %v5030_v37 = vpop.permute.xlu0 %5029 }
0x2153   :  { %8646 = vrcp.f32 %v4821_v26 }
0x2156   :  { %v5028_v6 = vpop.permute.xlu1 %5027  ;;  %v5273_v50 = vpop.permute.xlu0 %5272 }
0x2158   :  { %v8643_v27 = vpop.eup %8642 }
0x2159   :  { %v4823_v28 = vmul.f32 %v8643_v27, %v8637_v15 }
0x215a   :  { %v5271_v42 = vpop.permute.xlu1 %5270  ;;  %v5269_v21 = vpop.permute.xlu0 %5268 }
0x215b   :  { %8177 = vmatmul.mubr.msk.f32.vlgmr.msra.gmra.mxu0 %vm540_vm7, %v4823_v28 }
0x215c   :  { %v8645_v32 = vpop.eup %8644  ;;  %8197 = vmatpush3.xpose.msk.msra.mxu0 %vm441_vm5, %v5032_v24  ;;  %8179 = vmatprep.mubr.msk.f32.mxu0 %vm8768_vm4, %v8766_v10 }
0x215d   :  { %8198 = vmatprep.subr.mxu0 %v8766_v10  ;;  %v4825_v34 = vmul.f32 %v8645_v32, %v8639_v38 }
0x215e   :  { %v5263_v53 = vpop.permute.xlu1 %5262  ;;  %v5265_v43 = vpop.permute.xlu0 %5264 }
0x215f   :  { %8180 = vmatmul.mubr.msk.f32.gmra.mxu0 %vm540_vm7, %v4825_v34 }
0x2160   :  { %v8647_v40 = vpop.eup %8646  ;;  %8199 = vmatpush3.xpose.msk.msra.mxu0 %vm441_vm5, %v5030_v37  ;;  %8182 = vmatprep.mubr.msk.f32.mxu0 %vm8768_vm4, %v8766_v10 }
0x2161   :  { %8200 = vmatprep.subr.mxu0 %v8766_v10  ;;  %v4827_v47 = vmul.f32 %v8647_v40, %v8641_v41 }
0x2162   :  { %v5267_v31 = vpop.permute.xlu1 %5266 }
0x2163   :  { %8183 = vmatmul.mubr.msk.f32.gmra.mxu0 %vm540_vm7, %v4827_v47 }
0x2164   :  { %8201 = vmatpush3.xpose.msk.msra.mxu0 %vm441_vm5, %v5028_v6  ;;  %8202 = vmatprep.mubr.msk.f32.mxu0 %vm8768_vm4, %v8766_v10 }
0x2165   :  { %8226 = vmatprep.subr.mxu0 %v8766_v10 }
0x2167   :  { %8203 = vmatmul.mubr.msk.f32.vlgmr.msra.gmra.mxu0 %vm441_vm5, %v9802_v17 }
0x2168   :  { %8227 = vmatpush3.xpose.msk.msra.mxu0 %vm441_vm5, %v5273_v50  ;;  %8205 = vmatprep.mubr.msk.f32.mxu0 %vm8768_vm4, %v8766_v10 }
0x2169   :  { %8228 = vmatprep.subr.mxu0 %v8766_v10 }
0x216b   :  { %8206 = vmatmul.mubr.msk.f32.gmra.mxu0 %vm441_vm5, %v9859_v9 }
0x216c   :  { %8229 = vmatpush3.xpose.msk.msra.mxu0 %vm441_vm5, %v5271_v42  ;;  %8208 = vmatprep.mubr.msk.f32.mxu0 %vm8768_vm4, %v8766_v10 }
0x216d   :  { %8230 = vmatprep.subr.mxu0 %v8766_v10 }
0x216f   :  { %8209 = vmatmul.mubr.msk.f32.gmra.mxu0 %vm441_vm5, %v9857_v30 }
0x2170   :  { %8231 = vmatpush3.xpose.msk.msra.mxu0 %vm441_vm5, %v5269_v21  ;;  %8232 = vmatprep.mubr.msk.f32.mxu0 %vm8768_vm4, %v8766_v10 }
0x2171   :  { %8256 = vmatprep.subr.mxu0 %v8766_v10 }
0x2173   :  { %8233 = vmatmul.mubr.msk.f32.vlgmr.msra.gmra.mxu0 %vm441_vm5, %v5263_v53 }
0x2174   :  { %8235 = vmatprep.mubr.msk.f32.mxu0 %vm8768_vm4, %v8766_v10  ;;  %8257 = vmatpush3.msra.mxu0 %v9937_v59 }
0x2175   :  { %8278 = vmatprep.subr.mxu0 %v8766_v10 }
0x2177   :  { %8236 = vmatmul.mubr.msk.f32.gmra.mxu0 %vm441_vm5, %v5265_v43 }
0x2178   :  { %8238 = vmatprep.mubr.msk.f32.mxu0 %vm8768_vm4, %v8766_v10 }
0x217b   :  { %8239 = vmatmul.mubr.msk.f32.gmra.mxu0 %vm441_vm5, %v5267_v31 }
0x217c   :  { %8258 = vmatprep.mubr.msk.f32.mxu0 %vm8768_vm4, %v8766_v10 }
0x221b   :  { %v4912_v59 = vpop.f32.mrf.mxu0 }
0x221c   :  { %8188 = vmatmul.mubr.msk.f32.vlgmr.msra.gmra.mxu1 %vm441_vm5, %v4912_v59 }
0x221d   :  { %v8178_v46 = vpop.f32.mrf.mxu0  ;;  %8190 = vmatprep.mubr.msk.f32.mxu1 %vm8768_vm4, %v8766_v10 }
0x221f   :  { %v4917_v51 = vpop.f32.mrf.mxu0 }
0x2220   :  { %8191 = vmatmul.mubr.msk.f32.gmra.mxu1 %vm441_vm5, %v4917_v51 }
0x2221   :  { %v8181_v2 = vpop.f32.mrf.mxu0  ;;  %8193 = vmatprep.mubr.msk.f32.mxu1 %vm8768_vm4, %v8766_v10 }
0x2223   :  { %v4922_v33 = vpop.f32.mrf.mxu0 }
0x2224   :  { %8194 = vmatmul.mubr.msk.f32.gmra.mxu1 %vm441_vm5, %v4922_v33 }
0x2225   :  { %v8184_v35 = vpop.f32.mrf.mxu0  ;;  %8217 = vmatprep.mubr.msk.f32.mxu1 %vm8768_vm4, %v8766_v10 }
0x2227   :  { %v5111_v44 = vpop.f32.mrf.mxu0 }
0x2228   :  { %v5125_v20 = vmul.f32 0.35355338, %v5111_v44 }
0x2229   :  { %v8204_v61 = vpop.f32.mrf.mxu0 }
0x222a   :  { %v5128_v23 = vadd.f32 %v5125_v20, %v9018_v60 }
0x222b   :  { %v5116_v13 = vpop.f32.mrf.mxu0 }
0x222c   :  { %v5126_v52 = vmul.f32 0.35355338, %v5116_v13  ;;  %v5131_v63 = vsel %vm540_vm7, %v5128_v23, -inf }
0x222d   :  { %5132 = vmax.xlane.f32.xlu0 %v5131_v63  ;;  %v8207_v62 = vpop.f32.mrf.mxu0 }
0x222e   :  { %v5129_v12 = vadd.f32 %v5126_v52, %v9018_v60 }
0x222f   :  { %v5121_v49 = vpop.f32.mrf.mxu0 }
0x2230   :  { %v5127_v1 = vmul.f32 0.35355338, %v5121_v49  ;;  %v5134_v3 = vsel %vm540_vm7, %v5129_v12, -inf }
0x2231   :  { %5135 = vmax.xlane.f32.xlu1 %v5134_v3  ;;  %v8210_v36 = vpop.f32.mrf.mxu0 }
0x2232   :  { %v5130_v56 = vadd.f32 %v5127_v1, %v9018_v60 }
0x2233   :  { %v5352_v7 = vpop.f32.mrf.mxu0 }
0x2234   :  { %v5366_v8 = vmul.f32 0.35355338, %v5352_v7  ;;  %v5137_v5 = vsel %vm540_vm7, %v5130_v56, -inf }
0x2235   :  { %5138 = vmax.xlane.f32.xlu0 %v5137_v5  ;;  %v8234_v11 = vpop.f32.mrf.mxu0 }
0x2236   :  { %v5369_v14 = vadd.f32 %v5366_v8, %v9018_v60 }
0x2237   :  { %v5357_v29 = vpop.f32.mrf.mxu0 }
0x2238   :  { %v5367_v19 = vmul.f32 0.35355338, %v5357_v29  ;;  %v5372_v15 = vsel %vm540_vm7, %v5369_v14, -inf }
0x2239   :  { %5373 = vmax.xlane.f32.xlu0 %v5372_v15  ;;  %v8237_v16 = vpop.f32.mrf.mxu0 }
0x223a   :  { %v5370_v38 = vadd.f32 %v5367_v19, %v9018_v60  ;;  %v8740_v16 = vld [vmem:[#allocation2 + $0x10] sm:$0xff] }
0x223b   :  { %v5362_v57 = vpop.f32.mrf.mxu0 }
0x223c   :  { %v5368_v41 = vmul.f32 0.35355338, %v5362_v57  ;;  %v5375_v18 = vsel %vm540_vm7, %v5370_v38, -inf }
0x223d   :  { %5376 = vmax.xlane.f32.xlu0 %v5375_v18  ;;  %v8240_v0 = vpop.f32.mrf.mxu0 }
0x223e   :  { %v5371_v58 = vadd.f32 %v5368_v41, %v9018_v60 }
0x2240   :  { %v5378_v39 = vsel %vm540_vm7, %v5371_v58, -inf }
0x2241   :  { %5379 = vmax.xlane.f32.xlu1 %v5378_v39 }
0x2252   :  { %5166 = vrot.lane.b32.xlu1 %v9859_v9, %s8770_s22 }
0x2253   :  { %5168 = vrot.lane.b32.xlu0 %v9857_v30, %s8770_s22 }
0x2256   :  { %5164 = vrot.lane.b32.xlu1 %v9802_v17, %s8770_s22 }
0x225a   :  { %5409 = vrot.lane.b32.xlu1 %v9857_v30, %s8773_s23 }
0x22b6   :  { %v5133_v24 = vpop.xlane.xlu0 %5132 }
0x22b7   :  { %v5140_v25 = vsub.f32 %v5128_v23, %v5133_v24 }
0x22b9   :  { %v5143_v26 = vmul.f32 1.442695, %v5140_v25 }
0x22ba   :  { %v5136_v27 = vpop.xlane.xlu1 %5135 }
0x22bb   :  { %8648 = vpow2.f32 %v5143_v26  ;;  %v5141_v28 = vsub.f32 %v5129_v12, %v5136_v27 }
0x22bd   :  { %v5145_v32 = vmul.f32 1.442695, %v5141_v28 }
0x22be   :  { %v5139_v34 = vpop.xlane.xlu0 %5138 }
0x22bf   :  { %8650 = vpow2.f32 %v5145_v32  ;;  %v5142_v37 = vsub.f32 %v5130_v56, %v5139_v34  ;;  %v8738_v56 = vld [vmem:[#allocation2] sm:$0xff] }
0x22c1   :  { %v5147_v40 = vmul.f32 1.442695, %v5142_v37 }
0x22c2   :  { %v5374_v47 = vpop.xlane.xlu0 %5373 }
0x22c3   :  { %8652 = vpow2.f32 %v5147_v40  ;;  %v5381_v6 = vsub.f32 %v5369_v14, %v5374_v47  ;;  %v8739_v14 = vld [vmem:[#allocation2 + $0x8] sm:$0xff] }
0x22c5   :  { %v5384_v50 = vmul.f32 1.442695, %v5381_v6 }
0x22c6   :  { %v5377_v42 = vpop.xlane.xlu0 %5376 }
0x22c7   :  { %8654 = vpow2.f32 %v5384_v50  ;;  %v5382_v21 = vsub.f32 %v5370_v38, %v5377_v42 }
0x22c8   :  { %v10175_v53 = vpop.eup %8648 }
0x22c9   :  { %v5386_v43 = vmul.f32 1.442695, %v5382_v21  ;;  %v5149_v31 = vsel %vm540_vm7, %v10175_v53, 0.0 }
0x22ca   :  { %v5380_v59 = vpop.xlane.xlu1 %5379  ;;  %5150 = vadd.xlane.f32.xlu0 %v5149_v31  ;;  %v5169_v46 = vpop.permute.xlu0 %5168 }
0x22cb   :  { %8656 = vpow2.f32 %v5386_v43  ;;  %v5383_v51 = vsub.f32 %v5371_v58, %v5380_v59  ;;  %8212 = vmatpush3.msra.mxu1 %v5169_v46 }
0x22cc   :  { %v10179_v2 = vpop.eup %8650  ;;  %8213 = vmatprep.subr.mxu1 %v8766_v10 }
0x22cd   :  { %v5388_v33 = vmul.f32 1.442695, %v5383_v51  ;;  %v5152_v35 = vsel %vm540_vm7, %v10179_v2, 0.0 }
0x22ce   :  { %5153 = vadd.xlane.f32.xlu1 %v5152_v35  ;;  %v5167_v44 = vpop.permute.xlu1 %5166 }
0x22cf   :  { %8658 = vpow2.f32 %v5388_v33  ;;  %8214 = vmatpush3.msra.mxu1 %v5167_v44 }
0x22d0   :  { %v10184_v20 = vpop.eup %8652  ;;  %8215 = vmatprep.subr.mxu1 %v8766_v10 }
0x22d1   :  { %v5155_v61 = vsel %vm540_vm7, %v10184_v20, 0.0 }
0x22d2   :  { %v5165_v23 = vpop.permute.xlu1 %5164  ;;  %5156 = vadd.xlane.f32.xlu0 %v5155_v61 }
0x22d3   :  { %8216 = vmatpush3.msra.mxu1 %v5165_v23 }
0x22d4   :  { %v10189_v13 = vpop.eup %8654  ;;  %8241 = vmatprep.subr.mxu1 %v8766_v10 }
0x22d5   :  { %v5390_v52 = vsel %vm540_vm7, %v10189_v13, 0.0 }
0x22d6   :  { %5391 = vadd.xlane.f32.xlu1 %v5390_v52 }
0x22d8   :  { %v10194_v63 = vpop.eup %8656 }
0x22d9   :  { %v5393_v62 = vsel %vm540_vm7, %v10194_v63, 0.0 }
0x22da   :  { %5394 = vadd.xlane.f32.xlu0 %v5393_v62 }
0x22dc   :  { %v10198_v12 = vpop.eup %8658  ;;  %v5001_v49 = vpop.f32.mrf.mxu1 }
0x22dd   :  { %v5015_v1 = vadd.f32 %v5001_v49, %v10065_v54  ;;  %v5396_v3 = vsel %vm540_vm7, %v10198_v12, 0.0 }
0x22de   :  { %v8189_v36 = vpop.f32.mrf.mxu1  ;;  %5397 = vadd.xlane.f32.xlu1 %v5396_v3 }
0x22df   :  { %v5018_v7 = vadd.f32 %v8738_v56, %v5015_v1 }
0x22e0   :  { %v5006_v8 = vpop.f32.mrf.mxu1 }
0x22e1   :  { %5021 = vst.msk [vmem:[#allocation2] sm:$0xff] %vm171_vm1, %v5018_v7  ;;  %v5016_v5 = vadd.f32 %v5006_v8, %v10068_v4  ;;  %v5410_v4 = vpop.permute.xlu1 %5409 }
0x22e2   :  { %v8192_v11 = vpop.f32.mrf.mxu1 }
0x22e3   :  { %v5019_v29 = vadd.f32 %v8739_v14, %v5016_v5 }
0x22e4   :  { %v5011_v19 = vpop.f32.mrf.mxu1 }
0x22e5   :  { %5022 = vst.msk [vmem:[#allocation2 + $0x8] sm:$0xff] %vm171_vm1, %v5019_v29  ;;  %v5017_v54 = vadd.f32 %v5011_v19, %v10081_v22 }
0x22e6   :  { %v8195_v15 = vpop.f32.mrf.mxu1 }
0x22e7   :  { %v5020_v38 = vadd.f32 %v8740_v16, %v5017_v54 }
0x22e9   :  { %5023 = vst.msk [vmem:[#allocation2 + $0x10] sm:$0xff] %vm171_vm1, %v5020_v38 }
0x22ef   :  { %5405 = vrot.lane.b32.xlu1 %v9802_v17, %s8773_s23 }
0x22f0   :  { %5407 = vrot.lane.b32.xlu0 %v9859_v9, %s8773_s23 }
0x22f3   :  { %5689 = vrot.lane.b32.xlu1 %v9859_v9, %s8774_s24 }
0x22f4   :  { %5691 = vrot.lane.b32.xlu0 %v9857_v30, %s8774_s24 }
0x22f7   :  { %5681 = vrot.lane.b32.xlu1 %v9802_v17, %s8775_s25 }
0x22f8   :  { %5687 = vrot.lane.b32.xlu0 %v9802_v17, %s8774_s24 }
0x22fb   :  { %5685 = vrot.lane.b32.xlu1 %v9857_v30, %s8775_s25 }
0x22fc   :  { %5683 = vrot.lane.b32.xlu0 %v9859_v9, %s8775_s25 }
0x2353   :  { %v5151_v22 = vpop.xlane.xlu0 %5150 }
0x2354   :  { %8660 = vrcp.f32 %v5151_v22 }
0x2357   :  { %v5154_v57 = vpop.xlane.xlu1 %5153 }
0x2358   :  { %8662 = vrcp.f32 %v5154_v57 }
0x235b   :  { %v5157_v41 = vpop.xlane.xlu0 %5156 }
0x235c   :  { %8664 = vrcp.f32 %v5157_v41 }
0x235f   :  { %v5392_v18 = vpop.xlane.xlu1 %5391 }
0x2360   :  { %8666 = vrcp.f32 %v5392_v18 }
0x2361   :  { %v8661_v0 = vpop.eup %8660 }
0x2362   :  { %v5159_v58 = vmul.f32 %v8661_v0, %v10175_v53 }
0x2363   :  { %v5395_v39 = vpop.xlane.xlu0 %5394 }
0x2364   :  { %8668 = vrcp.f32 %v5395_v39  ;;  %8218 = vmatmul.mubr.msk.f32.vlgmr.msra.gmra.mxu1 %vm540_vm7, %v5159_v58 }
0x2365   :  { %v8663_v24 = vpop.eup %8662  ;;  %8242 = vmatpush3.msra.mxu1 %v5410_v4  ;;  %8220 = vmatprep.mubr.msk.f32.mxu1 %vm8768_vm4, %v8766_v10 }
0x2366   :  { %8243 = vmatprep.subr.mxu1 %v8766_v10  ;;  %v5161_v25 = vmul.f32 %v8663_v24, %v10179_v2 }
0x2367   :  { %v5398_v26 = vpop.xlane.xlu1 %5397  ;;  %v5408_v27 = vpop.permute.xlu0 %5407 }
0x2368   :  { %8670 = vrcp.f32 %v5398_v26  ;;  %8221 = vmatmul.mubr.msk.f32.gmra.mxu1 %vm540_vm7, %v5161_v25 }
0x2369   :  { %v8665_v28 = vpop.eup %8664  ;;  %8244 = vmatpush3.msra.mxu1 %v5408_v27  ;;  %8223 = vmatprep.mubr.msk.f32.mxu1 %vm8768_vm4, %v8766_v10 }
0x236a   :  { %8245 = vmatprep.subr.mxu1 %v8766_v10  ;;  %v5163_v32 = vmul.f32 %v8665_v28, %v10184_v20 }
0x236b   :  { %v5406_v34 = vpop.permute.xlu1 %5405  ;;  %v5692_v51 = vpop.permute.xlu0 %5691 }
0x236c   :  { %8224 = vmatmul.mubr.msk.f32.gmra.mxu1 %vm540_vm7, %v5163_v32 }
0x236d   :  { %v8667_v37 = vpop.eup %8666  ;;  %8246 = vmatpush3.msra.mxu1 %v5406_v34  ;;  %8247 = vmatprep.mubr.msk.f32.mxu1 %vm8768_vm4, %v8766_v10 }
0x236e   :  { %v5400_v40 = vmul.f32 %v8667_v37, %v10189_v13  ;;  %8267 = vmatprep.subr.mxu1 %v8766_v10 }
0x236f   :  { %v5690_v35 = vpop.permute.xlu1 %5689  ;;  %v5688_v61 = vpop.permute.xlu0 %5687 }
0x2370   :  { %8248 = vmatmul.mubr.msk.f32.vlgmr.msra.gmra.mxu1 %vm540_vm7, %v5400_v40 }
0x2371   :  { %v8669_v47 = vpop.eup %8668  ;;  %8250 = vmatprep.mubr.msk.f32.mxu1 %vm8768_vm4, %v8766_v10  ;;  %8268 = vmatpush3.msra.mxu1 %v9930_v55 }
0x2372   :  { %v5402_v6 = vmul.f32 %v8669_v47, %v10194_v63  ;;  %8293 = vmatprep.subr.mxu1 %v8766_v10 }
0x2373   :  { %v5682_v13 = vpop.permute.xlu1 %5681  ;;  %v5684_v52 = vpop.permute.xlu0 %5683 }
0x2374   :  { %8251 = vmatmul.mubr.msk.f32.gmra.mxu1 %vm540_vm7, %v5402_v6 }
0x2375   :  { %v8671_v50 = vpop.eup %8670  ;;  %8253 = vmatprep.mubr.msk.f32.mxu1 %vm8768_vm4, %v8766_v10 }
0x2376   :  { %v5404_v42 = vmul.f32 %v8671_v50, %v10198_v12 }
0x2377   :  { %v5686_v63 = vpop.permute.xlu1 %5685 }
0x2378   :  { %8254 = vmatmul.mubr.msk.f32.gmra.mxu1 %vm540_vm7, %v5404_v42 }
0x2379   :  { %8269 = vmatprep.mubr.msk.f32.mxu1 %vm8768_vm4, %v8766_v10 }
0x2424   :  { %v5248_v21 = vpop.f32.mrf.mxu1 }
0x2425   :  { %8270 = vmatmul.mubr.msk.f32.vlgmr.msra.gmra.mxu1 %vm441_vm5, %v5248_v21 }
0x2426   :  { %v8219_v55 = vpop.f32.mrf.mxu1  ;;  %8272 = vmatprep.mubr.msk.f32.mxu1 %vm8768_vm4, %v8766_v10 }
0x2428   :  { %v5253_v53 = vpop.f32.mrf.mxu1 }
0x2429   :  { %8273 = vmatmul.mubr.msk.f32.gmra.mxu1 %vm441_vm5, %v5253_v53 }
0x242a   :  { %v8222_v43 = vpop.f32.mrf.mxu1  ;;  %8275 = vmatprep.mubr.msk.f32.mxu1 %vm8768_vm4, %v8766_v10 }
0x242c   :  { %v5258_v31 = vpop.f32.mrf.mxu1 }
0x242d   :  { %8276 = vmatmul.mubr.msk.f32.gmra.mxu1 %vm441_vm5, %v5258_v31 }
0x242e   :  { %v8225_v59 = vpop.f32.mrf.mxu1  ;;  %8299 = vmatprep.mubr.msk.f32.mxu1 %vm8768_vm4, %v8766_v10 }
0x2430   :  { %v5489_v46 = vpop.f32.mrf.mxu1 }
0x2431   :  { %8259 = vmatmul.mubr.msk.f32.vlgmr.msra.gmra.mxu0 %vm441_vm5, %v5489_v46 }
0x2432   :  { %8279 = vmatpush3.xpose.msk.msra.mxu0 %vm441_vm5, %v5692_v51  ;;  %v8249_v2 = vpop.f32.mrf.mxu1  ;;  %8261 = vmatprep.mubr.msk.f32.mxu0 %vm8768_vm4, %v8766_v10 }
0x2433   :  { %8280 = vmatprep.subr.mxu0 %v8766_v10 }
0x2434   :  { %v5494_v33 = vpop.f32.mrf.mxu1 }
0x2435   :  { %8262 = vmatmul.mubr.msk.f32.gmra.mxu0 %vm441_vm5, %v5494_v33 }
0x2436   :  { %8281 = vmatpush3.xpose.msk.msra.mxu0 %vm441_vm5, %v5690_v35  ;;  %v8252_v44 = vpop.f32.mrf.mxu1  ;;  %8264 = vmatprep.mubr.msk.f32.mxu0 %vm8768_vm4, %v8766_v10 }
0x2437   :  { %8282 = vmatprep.subr.mxu0 %v8766_v10 }
0x2438   :  { %v5499_v20 = vpop.f32.mrf.mxu1 }
0x2439   :  { %8265 = vmatmul.mubr.msk.f32.gmra.mxu0 %vm441_vm5, %v5499_v20 }
0x243a   :  { %8283 = vmatpush3.xpose.msk.msra.mxu0 %vm441_vm5, %v5688_v61  ;;  %v8255_v23 = vpop.f32.mrf.mxu1  ;;  %8284 = vmatprep.mubr.msk.f32.mxu0 %vm8768_vm4, %v8766_v10 }
0x243b   :  { %8308 = vmatprep.subr.mxu0 %v8766_v10 }
0x243d   :  { %8285 = vmatmul.mubr.msk.f32.vlgmr.msra.gmra.mxu0 %vm441_vm5, %v5682_v13 }
0x243e   :  { %8287 = vmatprep.mubr.msk.f32.mxu0 %vm8768_vm4, %v8766_v10  ;;  %8309 = vmatpush3.msra.mxu0 %v10034_v48 }
0x243f   :  { %8334 = vmatprep.subr.mxu0 %v8766_v10 }
0x2441   :  { %8288 = vmatmul.mubr.msk.f32.gmra.mxu0 %vm441_vm5, %v5684_v52 }
0x2442   :  { %8290 = vmatprep.mubr.msk.f32.mxu0 %vm8768_vm4, %v8766_v10 }
0x2445   :  { %8291 = vmatmul.mubr.msk.f32.gmra.mxu0 %vm441_vm5, %v5686_v63 }
0x2446   :  { %8310 = vmatprep.mubr.msk.f32.mxu0 %vm8768_vm4, %v8766_v10 }
0x24e5   :  { %v5667_v62 = vpop.f32.mrf.mxu1 }
0x24e7   :  { %v8271_v12 = vpop.f32.mrf.mxu1 }
0x24e9   :  { %v5672_v49 = vpop.f32.mrf.mxu1 }
0x24eb   :  { %v8274_v1 = vpop.f32.mrf.mxu1 }
0x24ed   :  { %v5677_v3 = vpop.f32.mrf.mxu1 }
0x24ef   :  { %v8277_v48 = vpop.f32.mrf.mxu1 }
0x24f1   :  { %v5578_v36 = vpop.f32.mrf.mxu0 }
0x24f2   :  { %v10288_v56 = vadd.f32 %v5667_v62, %v5578_v36 }
0x24f3   :  { %v8260_v7 = vpop.f32.mrf.mxu0 }
0x24f5   :  { %v5583_v8 = vpop.f32.mrf.mxu0 }
0x24f6   :  { %v10290_v5 = vadd.f32 %v5672_v49, %v5583_v8 }
0x24f7   :  { %v8263_v11 = vpop.f32.mrf.mxu0 }
0x24f9   :  { %v5588_v14 = vpop.f32.mrf.mxu0 }
0x24fa   :  { %v10292_v29 = vadd.f32 %v5677_v3, %v5588_v14 }
0x24fb   :  { %v8266_v19 = vpop.f32.mrf.mxu0 }
0x24fd   :  { %v5771_v54 = vpop.f32.mrf.mxu0 }
0x24fe   :  { %v5785_v15 = vmul.f32 0.35355338, %v5771_v54 }
0x24ff   :  { %v8286_v16 = vpop.f32.mrf.mxu0 }
0x2500   :  { %v5788_v38 = vadd.f32 %v5785_v15, %v9018_v60 }
0x2501   :  { %v5776_v4 = vpop.f32.mrf.mxu0 }
0x2502   :  { %v5786_v22 = vmul.f32 0.35355338, %v5776_v4  ;;  %v5791_v57 = vsel %vm540_vm7, %v5788_v38, -inf }
0x2503   :  { %5792 = vmax.xlane.f32.xlu0 %v5791_v57  ;;  %v8289_v41 = vpop.f32.mrf.mxu0 }
0x2504   :  { %v5789_v18 = vadd.f32 %v5786_v22, %v9018_v60 }
0x2505   :  { %v5781_v0 = vpop.f32.mrf.mxu0 }
0x2506   :  { %v5787_v58 = vmul.f32 0.35355338, %v5781_v0  ;;  %v5794_v39 = vsel %vm540_vm7, %v5789_v18, -inf }
0x2507   :  { %5795 = vmax.xlane.f32.xlu1 %v5794_v39  ;;  %v8292_v24 = vpop.f32.mrf.mxu0 }
0x2508   :  { %v5790_v25 = vadd.f32 %v5787_v58, %v9018_v60 }
0x250a   :  { %v5797_v26 = vsel %vm540_vm7, %v5790_v25, -inf }
0x250b   :  { %5798 = vmax.xlane.f32.xlu0 %v5797_v26 }
0x2518   :  { %5826 = vrot.lane.b32.xlu1 %v9859_v9, %s8776_s30 }
0x251c   :  { %5824 = vrot.lane.b32.xlu1 %v9802_v17, %s8776_s30 }
0x2520   :  { %6024 = vrot.lane.b32.xlu1 %v9857_v30, %s8777_s2 }
0x2521   :  { %5828 = vrot.lane.b32.xlu0 %v9857_v30, %s8776_s30  ;;  %s8780_s30 = smov [#allocation3]  }
0x2524   :  { %6020 = vrot.lane.b32.xlu1 %v9802_v17, %s8777_s2 }
0x258c   :  { %v5793_v27 = vpop.xlane.xlu0 %5792 }
0x258d   :  { %v5800_v28 = vsub.f32 %v5788_v38, %v5793_v27 }
0x258f   :  { %v5803_v32 = vmul.f32 1.442695, %v5800_v28 }
0x2590   :  { %v5796_v34 = vpop.xlane.xlu1 %5795 }
0x2591   :  { %8672 = vpow2.f32 %v5803_v32  ;;  %v5801_v37 = vsub.f32 %v5789_v18, %v5796_v34 }
0x2593   :  { %v5805_v40 = vmul.f32 1.442695, %v5801_v37 }
0x2594   :  { %v5799_v47 = vpop.xlane.xlu0 %5798  ;;  %v5827_v50 = vpop.permute.xlu1 %5826 }
0x2595   :  { %8674 = vpow2.f32 %v5805_v40  ;;  %v5802_v6 = vsub.f32 %v5790_v25, %v5799_v47 }
0x2597   :  { %v5807_v42 = vmul.f32 1.442695, %v5802_v6 }
0x2598   :  { %v5829_v21 = vpop.permute.xlu0 %5828  ;;  %v5825_v55 = vpop.permute.xlu1 %5824 }
0x2599   :  { %8676 = vpow2.f32 %v5807_v42  ;;  %8294 = vmatpush3.msra.mxu1 %v5829_v21 }
0x259a   :  { %8295 = vmatprep.subr.mxu1 %v8766_v10 }
0x259b   :  { %8296 = vmatpush3.msra.mxu1 %v5827_v50 }
0x259c   :  { %8297 = vmatprep.subr.mxu1 %v8766_v10  ;;  %v6025_v2 = vpop.permute.xlu1 %6024 }
0x259d   :  { %8298 = vmatpush3.msra.mxu1 %v5825_v55 }
0x259e   :  { %v8673_v53 = vpop.eup %8672  ;;  %8319 = vmatprep.subr.mxu1 %v8766_v10 }
0x259f   :  { %v5809_v43 = vsel %vm540_vm7, %v8673_v53, 0.0 }
0x25a0   :  { %5810 = vadd.xlane.f32.xlu0 %v5809_v43  ;;  %v6021_v35 = vpop.permute.xlu1 %6020 }
0x25a2   :  { %v8675_v31 = vpop.eup %8674 }
0x25a3   :  { %v5812_v59 = vsel %vm540_vm7, %v8675_v31, 0.0 }
0x25a4   :  { %5813 = vadd.xlane.f32.xlu0 %v5812_v59 }
0x25a6   :  { %v8677_v46 = vpop.eup %8676 }
0x25a7   :  { %v5815_v51 = vsel %vm540_vm7, %v8677_v46, 0.0 }
0x25a8   :  { %5816 = vadd.xlane.f32.xlu1 %v5815_v51 }
0x25b9   :  { %6016 = vrot.lane.b32.xlu1 %v9859_v9, %s8778_s3 }
0x25ba   :  { %6022 = vrot.lane.b32.xlu0 %v9859_v9, %s8777_s2  ;;  %s6962_s2 = sshll.u32 %s8780_s30, 4  ;;  %s6963_s2 = int_to_ptr.vmem [resolvable:$true] %s6962_s2 }
0x25bb   :  { %p8749_p1 = scmp.lt.s32.totalorder %s6963_s2, %s6963_s2 }
0x25be   :  { %6014 = vrot.lane.b32.xlu0 %v9802_v17, %s8778_s3 }
0x25c2   :  { %6018 = vrot.lane.b32.xlu0 %v9857_v30, %s8778_s3 }
0x2629   :  { %v5811_v33 = vpop.xlane.xlu0 %5810 }
0x262a   :  { %8678 = vrcp.f32 %v5811_v33 }
0x262d   :  { %v5814_v44 = vpop.xlane.xlu0 %5813 }
0x262e   :  { %8680 = vrcp.f32 %v5814_v44  ;;  %v10377_v44 = vld [vmem:[#allocation2] sm:$0xff] }
0x2631   :  { %v5817_v20 = vpop.xlane.xlu1 %5816  ;;  %v6023_v63 = vpop.permute.xlu0 %6022 }
0x2632   :  { %8682 = vrcp.f32 %v5817_v20  ;;  %v10381_v20 = vld [vmem:[#allocation2 + $0x8] sm:$0xff] }
0x2635   :  { %v6015_v49 = vpop.permute.xlu0 %6014  ;;  %v6017_v1 = vpop.permute.xlu1 %6016 }
0x2637   :  { %v8679_v61 = vpop.eup %8678 }
0x2638   :  { %v5819_v23 = vmul.f32 %v8679_v61, %v8673_v53 }
0x2639   :  { %v6019_v3 = vpop.permute.xlu0 %6018 }
0x263a   :  { %8300 = vmatmul.mubr.msk.f32.vlgmr.msra.gmra.mxu1 %vm540_vm7, %v5819_v23 }
0x263b   :  { %v8681_v13 = vpop.eup %8680  ;;  %8320 = vmatpush3.xpose.msk.msra.mxu1 %vm441_vm5, %v6025_v2  ;;  %8302 = vmatprep.mubr.msk.f32.mxu1 %vm8768_vm4, %v8766_v10 }
0x263c   :  { %8321 = vmatprep.subr.mxu1 %v8766_v10  ;;  %v5821_v52 = vmul.f32 %v8681_v13, %v8675_v31 }
0x263e   :  { %8303 = vmatmul.mubr.msk.f32.gmra.mxu1 %vm540_vm7, %v5821_v52 }
0x263f   :  { %v8683_v62 = vpop.eup %8682  ;;  %8322 = vmatpush3.xpose.msk.msra.mxu1 %vm441_vm5, %v6023_v63  ;;  %8305 = vmatprep.mubr.msk.f32.mxu1 %vm8768_vm4, %v8766_v10 }
0x2640   :  { %8323 = vmatprep.subr.mxu1 %v8766_v10  ;;  %v5823_v12 = vmul.f32 %v8683_v62, %v8677_v46 }
0x2642   :  { %8306 = vmatmul.mubr.msk.f32.gmra.mxu1 %vm540_vm7, %v5823_v12 }
0x2643   :  { %8324 = vmatpush3.xpose.msk.msra.mxu1 %vm441_vm5, %v6021_v35  ;;  %8325 = vmatprep.mubr.msk.f32.mxu1 %vm8768_vm4, %v8766_v10 }
0x2644   :  { %8349 = vmatprep.subr.mxu1 %v8766_v10 }
0x2646   :  { %8326 = vmatmul.mubr.msk.f32.vlgmr.msra.gmra.mxu1 %vm441_vm5, %v6015_v49 }
0x2647   :  { %8328 = vmatprep.mubr.msk.f32.mxu1 %vm8768_vm4, %v8766_v10  ;;  %8350 = vmatpush3.msra.mxu1 %v10142_v45 }
0x264a   :  { %8329 = vmatmul.mubr.msk.f32.gmra.mxu1 %vm441_vm5, %v6017_v1 }
0x264b   :  { %8331 = vmatprep.mubr.msk.f32.mxu1 %vm8768_vm4, %v8766_v10 }
0x264e   :  { %8332 = vmatmul.mubr.msk.f32.gmra.mxu1 %vm441_vm5, %v6019_v3 }
0x264f   :  { %8351 = vmatprep.mubr.msk.f32.mxu1 %vm8768_vm4, %v8766_v10 }
0x26fa   :  { %v5908_v48 = vpop.f32.mrf.mxu1 }
0x26fb   :  { %8311 = vmatmul.mubr.msk.f32.vlgmr.msra.gmra.mxu0 %vm441_vm5, %v5908_v48 }
0x26fc   :  { %v8301_v36 = vpop.f32.mrf.mxu1  ;;  %8313 = vmatprep.mubr.msk.f32.mxu0 %vm8768_vm4, %v8766_v10 }
0x26fe   :  { %v5913_v45 = vpop.f32.mrf.mxu1 }
0x26ff   :  { %8314 = vmatmul.mubr.msk.f32.gmra.mxu0 %vm441_vm5, %v5913_v45 }
0x2700   :  { %v8304_v7 = vpop.f32.mrf.mxu1  ;;  %8316 = vmatprep.mubr.msk.f32.mxu0 %vm8768_vm4, %v8766_v10 }
0x2702   :  { %v5918_v8 = vpop.f32.mrf.mxu1 }
0x2703   :  { %8317 = vmatmul.mubr.msk.f32.gmra.mxu0 %vm441_vm5, %v5918_v8 }
0x2704   :  { %v8307_v11 = vpop.f32.mrf.mxu1  ;;  %8340 = vmatprep.mubr.msk.f32.mxu0 %vm8768_vm4, %v8766_v10 }
0x2706   :  { %v6104_v14 = vpop.f32.mrf.mxu1 }
0x2707   :  { %v6118_v19 = vmul.f32 0.35355338, %v6104_v14 }
0x2708   :  { %v8327_v54 = vpop.f32.mrf.mxu1 }
0x2709   :  { %v6121_v15 = vadd.f32 %v6118_v19, %v9018_v60 }
0x270a   :  { %v6109_v16 = vpop.f32.mrf.mxu1 }
0x270b   :  { %v6119_v38 = vmul.f32 0.35355338, %v6109_v16  ;;  %v6124_v4 = vsel %vm540_vm7, %v6121_v15, -inf }
0x270c   :  { %6125 = vmax.xlane.f32.xlu1 %v6124_v4  ;;  %v8330_v22 = vpop.f32.mrf.mxu1 }
0x270d   :  { %v6122_v57 = vadd.f32 %v6119_v38, %v9018_v60 }
0x270e   :  { %v6114_v41 = vpop.f32.mrf.mxu1 }
0x270f   :  { %v6120_v18 = vmul.f32 0.35355338, %v6114_v41  ;;  %v6127_v0 = vsel %vm540_vm7, %v6122_v57, -inf }
0x2710   :  { %6128 = vmax.xlane.f32.xlu0 %v6127_v0  ;;  %v8333_v58 = vpop.f32.mrf.mxu1 }
0x2711   :  { %v6123_v39 = vadd.f32 %v6120_v18, %v9018_v60  ;;  %v8742_v18 = vld [vmem:[#allocation2 + $0x20] sm:$0xff] }
0x2713   :  { %v6130_v24 = vsel %vm540_vm7, %v6123_v39, -inf }
0x2714   :  { %6131 = vmax.xlane.f32.xlu0 %v6130_v24 }
0x271d   :  { %6161 = vrot.lane.b32.xlu1 %v9857_v30, %s8779_s17 }
0x2795   :  { %v6126_v25 = vpop.xlane.xlu1 %6125 }
0x2796   :  { %v6133_v26 = vsub.f32 %v6121_v15, %v6126_v25  ;;  %v8741_v15 = vld [vmem:[#allocation2 + $0x18] sm:$0xff] }
0x2798   :  { %v6136_v27 = vmul.f32 1.442695, %v6133_v26  ;;  %v8743_v26 = vld [vmem:[#allocation2 + $0x28] sm:$0xff] }
0x2799   :  { %v6162_v28 = vpop.permute.xlu1 %6161  ;;  %v6129_v32 = vpop.xlane.xlu0 %6128 }
0x279a   :  { %8684 = vpow2.f32 %v6136_v27  ;;  %v6134_v34 = vsub.f32 %v6122_v57, %v6129_v32  ;;  %8335 = vmatpush3.msra.mxu0 %v6162_v28 }
0x279b   :  { %8336 = vmatprep.subr.mxu0 %v8766_v10 }
0x279c   :  { %v6138_v37 = vmul.f32 1.442695, %v6134_v34 }
0x279d   :  { %v6132_v40 = vpop.xlane.xlu0 %6131 }
0x279e   :  { %8686 = vpow2.f32 %v6138_v37  ;;  %v6135_v60 = vsub.f32 %v6123_v39, %v6132_v40 }
0x27a0   :  { %v6140_v47 = vmul.f32 1.442695, %v6135_v60 }
0x27a2   :  { %8688 = vpow2.f32 %v6140_v47 }
0x27a7   :  { %v8685_v6 = vpop.eup %8684 }
0x27a8   :  { %v6142_v50 = vsel %vm540_vm7, %v8685_v6, 0.0 }
0x27a9   :  { %6143 = vadd.xlane.f32.xlu0 %v6142_v50 }
0x27ab   :  { %v8687_v30 = vpop.eup %8686 }
0x27ac   :  { %v6145_v42 = vsel %vm540_vm7, %v8687_v30, 0.0 }
0x27ad   :  { %6146 = vadd.xlane.f32.xlu1 %v6145_v42 }
0x27af   :  { %v8689_v21 = vpop.eup %8688 }
0x27b0   :  { %v6148_v55 = vsel %vm540_vm7, %v8689_v21, 0.0 }
0x27b1   :  { %6149 = vadd.xlane.f32.xlu0 %v6148_v55 }
0x27bb   :  { %v5997_v53 = vpop.f32.mrf.mxu0 }
0x27bc   :  { %v6011_v43 = vadd.f32 %v5997_v53, %v10288_v56  ;;  %v6359_v56 = vsel %vm171_vm1, %v10377_v44, 0.0 }
0x27bd   :  { %v8312_v31 = vpop.f32.mrf.mxu0 }
0x27be   :  { %6157 = vrot.lane.b32.xlu1 %v9802_v17, %s8779_s17  ;;  %v6362_v17 = vsel %vm171_vm1, %v10381_v20, 0.0 }
0x27bf   :  { %v6002_v59 = vpop.f32.mrf.mxu0 }
0x27c0   :  { %v6012_v46 = vadd.f32 %v6002_v59, %v10290_v5  ;;  %v10385_v5 = vld [vmem:[#allocation2 + $0x10] sm:$0xff] }
0x27c1   :  { %v8315_v51 = vpop.f32.mrf.mxu0 }
0x27c2   :  { %v7095_v51 = vld [vmem:[%s10594_s7 + $0x30] sm:$0xff] }
0x27c3   :  { %v6007_v2 = vpop.f32.mrf.mxu0 }
0x27c4   :  { %v6013_v33 = vadd.f32 %v6007_v2, %v10292_v29  ;;  %v6365_v29 = vsel %vm171_vm1, %v10385_v5, 0.0  ;;  %v7094_v2 = vld [vmem:[%s10594_s7 + $0x28] sm:$0xff] }
0x27c5   :  { %v8318_v35 = vpop.f32.mrf.mxu0 }
0x27c7   :  { %6159 = vrot.lane.b32.xlu0 %v9859_v9, %s8779_s17 }
0x27e2   :  { %6360 = vadd.xlane.f32.xlu1 %v6359_v56 }
0x27e6   :  { %6363 = vadd.xlane.f32.xlu0 %v6362_v17 }
0x27ea   :  { %6366 = vadd.xlane.f32.xlu0 %v6365_v29 }
0x2832   :  { %v6144_v61 = vpop.xlane.xlu0 %6143 }
0x2833   :  { %8690 = vrcp.f32 %v6144_v61 }
0x2836   :  { %v6147_v9 = vpop.xlane.xlu1 %6146 }
0x2837   :  { %8692 = vrcp.f32 %v6147_v9 }
0x283a   :  { %v6150_v23 = vpop.xlane.xlu0 %6149  ;;  %v6158_v63 = vpop.permute.xlu1 %6157 }
0x283b   :  { %8694 = vrcp.f32 %v6150_v23 }
0x283e   :  { %v6160_v13 = vpop.permute.xlu0 %6159 }
0x283f   :  { %8337 = vmatpush3.msra.mxu0 %v6160_v13 }
0x2840   :  { %v8691_v52 = vpop.eup %8690  ;;  %8338 = vmatprep.subr.mxu0 %v8766_v10 }
0x2841   :  { %v6152_v62 = vmul.f32 %v8691_v52, %v8685_v6  ;;  %8339 = vmatpush3.msra.mxu0 %v6158_v63 }
0x2843   :  { %8341 = vmatmul.mubr.msk.f32.vlgmr.msra.gmra.mxu0 %vm540_vm7, %v6152_v62 }
0x2844   :  { %v8693_v12 = vpop.eup %8692  ;;  %8343 = vmatprep.mubr.msk.f32.mxu0 %vm8768_vm4, %v8766_v10 }
0x2845   :  { %v6154_v49 = vmul.f32 %v8693_v12, %v8687_v30 }
0x2847   :  { %8344 = vmatmul.mubr.msk.f32.gmra.mxu0 %vm540_vm7, %v6154_v49 }
0x2848   :  { %v8695_v1 = vpop.eup %8694  ;;  %8346 = vmatprep.mubr.msk.f32.mxu0 %vm8768_vm4, %v8766_v10 }
0x2849   :  { %v6156_v3 = vmul.f32 %v8695_v1, %v8689_v21 }
0x284b   :  { %8347 = vmatmul.mubr.msk.f32.gmra.mxu0 %vm540_vm7, %v6156_v3 }
0x286b   :  { %v6361_v57 = vpop.xlane.xlu1 %6360 }
0x286f   :  { %v6364_v38 = vpop.xlane.xlu0 %6363 }
0x2870   :  { %v6378_v34 = vmul.f32 0.03125, %v6364_v38 }
0x2872   :  { %v10417_v47 = vsub.f32 %v10381_v20, %v6378_v34  ;;  %v7102_v34 = vld [vmem:[%s10596_s9 + $0xa0] sm:$0xff] }
0x2873   :  { %v6367_v24 = vpop.xlane.xlu0 %6366 }
0x2874   :  { %v6379_v37 = vmul.f32 0.03125, %v6367_v24  ;;  %v6390_v53 = vmul.f32 %v10417_v47, %v10417_v47  ;;  %v7107_v24 = vld [vmem:[%s10596_s9 + $0xc8] sm:$0xff] }
0x2876   :  { %v10420_v6 = vsub.f32 %v10385_v5, %v6379_v37  ;;  %v6398_v31 = vsel %vm171_vm1, %v6390_v53, 0.0  ;;  %v7101_v37 = vld [vmem:[%s10596_s9 + $0x98] sm:$0xff] }
0x2903   :  { %v6241_v48 = vpop.f32.mrf.mxu0 }
0x2904   :  { %8352 = vmatmul.mubr.msk.f32.vlgmr.msra.gmra.mxu1 %vm441_vm5, %v6241_v48 }
0x2905   :  { %v8342_v36 = vpop.f32.mrf.mxu0  ;;  %8354 = vmatprep.mubr.msk.f32.mxu1 %vm8768_vm4, %v8766_v10 }
0x2907   :  { %v6246_v45 = vpop.f32.mrf.mxu0 }
0x2908   :  { %8355 = vmatmul.mubr.msk.f32.gmra.mxu1 %vm441_vm5, %v6246_v45 }
0x2909   :  { %v8345_v7 = vpop.f32.mrf.mxu0  ;;  %8357 = vmatprep.mubr.msk.f32.mxu1 %vm8768_vm4, %v8766_v10  ;;  %v6377_v10 = vmul.f32 0.03125, %v6361_v57 }
0x290b   :  { %v6251_v8 = vpop.f32.mrf.mxu0  ;;  %v10409_v32 = vsub.f32 %v10377_v44, %v6377_v10  ;;  %v7109_v10 = vld [vmem:[%s10596_s9 + $0xd8] sm:$0xff] }
0x290c   :  { %8358 = vmatmul.mubr.msk.f32.gmra.mxu1 %vm441_vm5, %v6251_v8 }
0x290d   :  { %v8348_v11 = vpop.f32.mrf.mxu0  ;;  %v6389_v30 = vmul.f32 %v10409_v32, %v10409_v32 }
0x290f   :  { %v6395_v21 = vsel %vm171_vm1, %v6389_v30, 0.0 }
0x29c4   :  { %v6330_v14 = vpop.f32.mrf.mxu1 }
0x29c5   :  { %v6344_v19 = vadd.f32 %v6330_v14, %v6011_v43  ;;  %v6391_v43 = vmul.f32 %v10420_v6, %v10420_v6 }
0x29c6   :  { %v8353_v54 = vpop.f32.mrf.mxu1 }
0x29c7   :  { %v6347_v16 = vadd.f32 %v8741_v15, %v6344_v19  ;;  %v6401_v59 = vsel %vm171_vm1, %v6391_v43, 0.0 }
0x29c8   :  { %v6335_v4 = vpop.f32.mrf.mxu1 }
0x29c9   :  { %6350 = vst.msk [vmem:[#allocation2 + $0x18] sm:$0xff] %vm171_vm1, %v6347_v16  ;;  %v6345_v22 = vadd.f32 %v6335_v4, %v6012_v46  ;;  %v7096_v46 = vld [vmem:[%s10594_s7 + $0x38] sm:$0xff] }
0x29ca   :  { %v8356_v41 = vpop.f32.mrf.mxu1  ;;  %8360 = vmatprep.subr.mxu0 %v7096_v46 }
0x29cb   :  { %v6348_v0 = vadd.f32 %v8742_v18, %v6345_v22  ;;  %8361 = vmatpush3.msra.mxu0 %v7096_v46  ;;  %v7113_v41 = vld [vmem:[%s10596_s9 + $0xf8] sm:$0xff]  ;;  %v7112_v18 = vld [vmem:[%s10596_s9 + $0xf0] sm:$0xff] }
0x29cc   :  { %v6340_v58 = vpop.f32.mrf.mxu1  ;;  %8362 = vmatprep.subr.mxu0 %v7095_v51  ;;  %8377 = vmatprep.subr.mxu1 %v7113_v41 }
0x29cd   :  { %6351 = vst.msk [vmem:[#allocation2 + $0x20] sm:$0xff] %vm171_vm1, %v6348_v0  ;;  %v6346_v39 = vadd.f32 %v6340_v58, %v6013_v33  ;;  %8363 = vmatpush3.msra.mxu0 %v7095_v51  ;;  %v7093_v33 = vld [vmem:[%s10594_s7 + $0x20] sm:$0xff]  ;;  %8378 = vmatpush3.msra.mxu1 %v7113_v41  ;;  %v7111_v0 = vld [vmem:[%s10596_s9 + $0xe8] sm:$0xff]  ;;  %s8744_s7 = scalar_lea.vmem %s6963_s2, 32 }
0x29ce   :  { %v8359_v25 = vpop.f32.mrf.mxu1  ;;  %8364 = vmatprep.subr.mxu0 %v7094_v2  ;;  %8379 = vmatprep.subr.mxu1 %v7112_v18  ;;  %v7110_v58 = vld [vmem:[%s10596_s9 + $0xe0] sm:$0xff]  ;;  %p8745_p0 = scmp.ne.s32.totalorder %s6963_s2, %s8744_s7  ;;  %p8750_p2 = scmp.lt.s32.totalorder %s8744_s7, %s8744_s7 }
0x29cf   :  { %v6349_v27 = vadd.f32 %v8743_v26, %v6346_v39  ;;  %8365 = vmatpush3.msra.mxu0 %v7094_v2  ;;  %8380 = vmatpush3.msra.mxu1 %v7112_v18  ;;  %v7108_v39 = vld [vmem:[%s10596_s9 + $0xd0] sm:$0xff]  ;;  %v7106_v25 = vld [vmem:[%s10596_s9 + $0xc0] sm:$0xff]  ;;  %v7105_v26 = vld [vmem:[%s10596_s9 + $0xb8] sm:$0xff] }
0x29d0   :  { %v10406_v28 = vld [vmem:[#allocation2 + $0x18] sm:$0xff]  ;;  %8366 = vmatprep.subr.mxu0 %v7093_v33  ;;  %8381 = vmatprep.subr.mxu1 %v7111_v0  ;;  %p8751_p3 = por %p8750_p2, %p8749_p1 }
0x29d1   :  { %6352 = vst.msk [vmem:[#allocation2 + $0x28] sm:$0xff] %vm171_vm1, %v6349_v27  ;;  %v6368_v40 = vsel %vm171_vm1, %v10406_v28, 0.0  ;;  %8367 = vmatpush3.msra.mxu0 %v7093_v33  ;;  %8382 = vmatpush3.msra.mxu1 %v7111_v0  ;;  %v7104_v27 = vld [vmem:[%s10596_s9 + $0xb0] sm:$0xff] }
0x29d2   :  { %6369 = vadd.xlane.f32.xlu1 %v6368_v40  ;;  %8383 = vmatprep.subr.mxu1 %v7110_v58  ;;  %v7100_v40 = vld [vmem:[%s10596_s9 + $0x90] sm:$0xff]  ;;  %p8752_p4 = pnand %p8751_p3, %p8745_p0 }
0x29d3   :  { %8384 = vmatpush3.msra.mxu1 %v7110_v58 }
0x29d4   :  { %v10414_v60 = vld [vmem:[#allocation2 + $0x20] sm:$0xff]  ;;  %8385 = vmatprep.subr.mxu1 %v7109_v10 }
0x29d5   :  { %v6371_v50 = vsel %vm171_vm1, %v10414_v60, 0.0  ;;  %8386 = vmatpush3.msra.mxu1 %v7109_v10 }
0x29d6   :  { %6372 = vadd.xlane.f32.xlu0 %v6371_v50  ;;  %8387 = vmatprep.subr.mxu1 %v7108_v39 }
0x29d7   :  { %8388 = vmatpush3.msra.mxu1 %v7108_v39 }
0x29d8   :  { %v10426_v42 = vld [vmem:[#allocation2 + $0x28] sm:$0xff]  ;;  %8389 = vmatprep.subr.mxu1 %v7107_v24 }
0x29d9   :  { %v6374_v55 = vsel %vm171_vm1, %v10426_v42, 0.0  ;;  %8390 = vmatpush3.msra.mxu1 %v7107_v24 }
0x29da   :  { %6396 = vadd.xlane.f32.xlu0 %v6395_v21  ;;  %6375 = vadd.xlane.f32.xlu1 %v6374_v55 }
0x29db   :  { %8391 = vmatprep.subr.mxu1 %v7106_v25 }
0x29dc   :  { %8392 = vmatpush3.msra.mxu1 %v7106_v25 }
0x29dd   :  { %8393 = vmatprep.subr.mxu1 %v7105_v26 }
0x29de   :  { %6399 = vadd.xlane.f32.xlu1 %v6398_v31  ;;  %6402 = vadd.xlane.f32.xlu0 %v6401_v59 }
0x29df   :  { %8394 = vmatpush3.msra.mxu1 %v7105_v26 }
0x29e0   :  { %8395 = vmatprep.subr.mxu1 %v7104_v27 }
0x29e1   :  { %8396 = vmatpush3.msra.mxu1 %v7104_v27 }
0x2a5b   :  { %v6370_v35 = vpop.xlane.xlu1 %6369 }
0x2a5c   :  { %v6380_v56 = vmul.f32 0.03125, %v6370_v35 }
0x2a5e   :  { %v10450_v17 = vsub.f32 %v10406_v28, %v6380_v56 }
0x2a5f   :  { %v6373_v29 = vpop.xlane.xlu0 %6372 }
0x2a60   :  { %v6381_v61 = vmul.f32 0.03125, %v6373_v29  ;;  %v6392_v9 = vmul.f32 %v10450_v17, %v10450_v17 }
0x2a62   :  { %v10455_v23 = vsub.f32 %v10414_v60, %v6381_v61  ;;  %v6404_v13 = vsel %vm171_vm1, %v6392_v9, 0.0  ;;  %v7217_v61 = vld [vmem:[%s10595_s8 + $0x1] ss:$0 sm:$0xff] }
0x2a63   :  { %v6376_v52 = vpop.xlane.xlu1 %6375  ;;  %6405 = vadd.xlane.f32.xlu1 %v6404_v13  ;;  %v6397_v63 = vpop.xlane.xlu0 %6396 }
0x2a64   :  { %v6382_v62 = vmul.f32 0.03125, %v6376_v52  ;;  %v6413_v12 = vmul.f32 0.03125, %v6397_v63  ;;  %v6393_v49 = vmul.f32 %v10455_v23, %v10455_v23 }
0x2a66   :  { %v10461_v1 = vsub.f32 %v10426_v42, %v6382_v62  ;;  %v6419_v3 = vadd.f32 1e-05, %v6413_v12  ;;  %v6407_v48 = vsel %vm171_vm1, %v6393_v49, 0.0 }
0x2a67   :  { %v6400_v36 = vpop.xlane.xlu1 %6399  ;;  %6408 = vadd.xlane.f32.xlu0 %v6407_v48  ;;  %v6403_v45 = vpop.xlane.xlu0 %6402 }
0x2a68   :  { %8696 = vrsqrt.f32 %v6419_v3  ;;  %v6414_v7 = vmul.f32 0.03125, %v6400_v36  ;;  %v6415_v8 = vmul.f32 0.03125, %v6403_v45  ;;  %v6394_v11 = vmul.f32 %v10461_v1, %v10461_v1 }
0x2a6a   :  { %v6420_v14 = vadd.f32 1e-05, %v6414_v7  ;;  %v6421_v19 = vadd.f32 1e-05, %v6415_v8  ;;  %v6410_v54 = vsel %vm171_vm1, %v6394_v11, 0.0 }
0x2a6b   :  { %6411 = vadd.xlane.f32.xlu1 %v6410_v54 }
0x2a6c   :  { %8698 = vrsqrt.f32 %v6420_v14 }
0x2a6d   :  { %8700 = vrsqrt.f32 %v6421_v19 }
0x2a75   :  { %v8697_v15 = vpop.eup %8696 }
0x2a76   :  { %v6431_v16 = vmul.f32 %v8697_v15, %v10409_v32  ;;  %v7103_v32 = vld [vmem:[%s10596_s9 + $0xa8] sm:$0xff] }
0x2a77   :  { %8397 = vmatprep.subr.mxu1 %v7103_v32 }
0x2a78   :  { %8368 = vmatprep.mubr.msk.f32.mxu0 %vm171_vm1, %v6431_v16  ;;  %8398 = vmatpush3.msra.mxu1 %v7103_v32 }
0x2a79   :  { %v8699_v38 = vpop.eup %8698  ;;  %8399 = vmatprep.subr.mxu1 %v7102_v34 }
0x2a7a   :  { %v8701_v4 = vpop.eup %8700  ;;  %v6432_v22 = vmul.f32 %v8699_v38, %v10417_v47  ;;  %8400 = vmatpush3.msra.mxu1 %v7102_v34  ;;  %v7099_v47 = vld [vmem:[%s10596_s9 + $0x88] sm:$0xff] }
0x2a7b   :  { %v6433_v57 = vmul.f32 %v8701_v4, %v10420_v6  ;;  %8401 = vmatprep.subr.mxu1 %v7101_v37  ;;  %v7098_v6 = vld [vmem:[%s10596_s9 + $0x80] sm:$0xff] }
0x2a7c   :  { %8369 = vmatmul.mubr.msk.f32.vlgmr.msra.gmra.mxu0 %vm171_vm1, %v6432_v22  ;;  %8402 = vmatpush3.msra.mxu1 %v7101_v37 }
0x2a7d   :  { %8371 = vmatprep.mubr.msk.f32.mxu0 %vm171_vm1, %v6433_v57  ;;  %8403 = vmatprep.subr.mxu1 %v7100_v40 }
0x2a7e   :  { %8404 = vmatpush3.msra.mxu1 %v7100_v40 }
0x2a7f   :  { %8405 = vmatprep.subr.mxu1 %v7099_v47 }
0x2a80   :  { %8406 = vmatpush3.msra.mxu1 %v7099_v47 }
0x2a81   :  { %8407 = vmatprep.subr.mxu1 %v7098_v6 }
0x2a82   :  { %8408 = vmatpush3.msra.mxu1 %v7098_v6 }
0x2aec   :  { %v6406_v50 = vpop.xlane.xlu1 %6405 }
0x2aed   :  { %v6416_v30 = vmul.f32 0.03125, %v6406_v50 }
0x2aef   :  { %v6422_v21 = vadd.f32 1e-05, %v6416_v30 }
0x2af0   :  { %v6409_v55 = vpop.xlane.xlu0 %6408 }
0x2af1   :  { %8702 = vrsqrt.f32 %v6422_v21  ;;  %v6417_v53 = vmul.f32 0.03125, %v6409_v55 }
0x2af3   :  { %v6423_v43 = vadd.f32 1e-05, %v6417_v53 }
0x2af4   :  { %v6412_v31 = vpop.xlane.xlu1 %6411 }
0x2af5   :  { %8704 = vrsqrt.f32 %v6423_v43  ;;  %v6418_v59 = vmul.f32 0.03125, %v6412_v31 }
0x2af7   :  { %v6424_v46 = vadd.f32 1e-05, %v6418_v59 }
0x2af9   :  { %8706 = vrsqrt.f32 %v6424_v46 }
0x2afe   :  { %v8703_v51 = vpop.eup %8702 }
0x2aff   :  { %v6434_v2 = vmul.f32 %v8703_v51, %v10450_v17 }
0x2b01   :  { %8372 = vmatmul.mubr.msk.f32.gmra.mxu0 %vm171_vm1, %v6434_v2 }
0x2b02   :  { %v8705_v33 = vpop.eup %8704 }
0x2b03   :  { %v6435_v35 = vmul.f32 %v8705_v33, %v10455_v23 }
0x2b05   :  { %8374 = vmatprep.mubr.msk.f32.mxu0 %vm171_vm1, %v6435_v35 }
0x2b06   :  { %v8707_v56 = vpop.eup %8706 }
0x2b07   :  { %v6436_v29 = vmul.f32 %v8707_v56, %v10461_v1 }
0x2b09   :  { %8375 = vmatmul.mubr.msk.f32.gmra.mxu0 %vm171_vm1, %v6436_v29 }
0x2b3c   :  { %v8370_v9 = vpop.f32.mrf.mxu0 }
0x2b3d   :  { %v6533_v13 = vadd.f32 %v8370_v9, %v7217_v61 }
0x2b3e   :  { %v6527_v52 = vpop.f32.mrf.mxu0 }
0x2b3f   :  { %v6563_v17 = vmul.f32 0.044715, %v6533_v13  ;;  %v6528_v63 = vadd.f32 %v7217_v61, %v6527_v52  ;;  %v6557_v54 = vmul.f32 0.5, %v6533_v13 }
0x2b41   :  { %v6569_v62 = vmul.f32 %v6563_v17, %v6533_v13  ;;  %v6562_v12 = vmul.f32 0.044715, %v6528_v63  ;;  %v6556_v14 = vmul.f32 0.5, %v6528_v63 }
0x2b43   :  { %v6575_v49 = vmul.f32 %v6569_v62, %v6533_v13  ;;  %v6568_v23 = vmul.f32 %v6562_v12, %v6528_v63 }
0x2b45   :  { %v6581_v3 = vadd.f32 %v6575_v49, %v6533_v13  ;;  %v6574_v48 = vmul.f32 %v6568_v23, %v6528_v63  ;;  %v7224_v23 = vld [vmem:[%s10597_s10 + $0x1] ss:$0 sm:$0xff] }
0x2b47   :  { %v6587_v36 = vmul.f32 0.7978846, %v6581_v3  ;;  %v6580_v45 = vadd.f32 %v6574_v48, %v6528_v63 }
0x2b49   :  { %8708 = vtanh.f32 %v6587_v36  ;;  %v6586_v1 = vmul.f32 0.7978846, %v6580_v45 }
0x2b4b   :  { %8710 = vtanh.f32 %v6586_v1 }
0x2b56   :  { %v8709_v7 = vpop.eup %8708 }
0x2b57   :  { %v6599_v11 = vadd.f32 1.0, %v8709_v7 }
0x2b58   :  { %v8711_v8 = vpop.eup %8710 }
0x2b59   :  { %v6598_v19 = vadd.f32 1.0, %v8711_v8  ;;  %v6605_v16 = vmul.f32 %v6599_v11, %v6557_v54 }
0x2b5b   :  { %v6604_v15 = vmul.f32 %v6598_v19, %v6556_v14 }
0x2b5d   :  { %8409 = vmatprep.mubr.f32.mxu1 %v6604_v15 }
0x2b5e   :  { %8410 = vmatmul.mubr.f32.vlgmr.msra.gmra.mxu1 %v6605_v16 }
0x2bc1   :  { %v8373_v38 = vpop.f32.mrf.mxu0 }
0x2bc2   :  { %v6543_v4 = vadd.f32 %v8373_v38, %v7217_v61 }
0x2bc3   :  { %v6537_v22 = vpop.f32.mrf.mxu0 }
0x2bc4   :  { %v6565_v57 = vmul.f32 0.044715, %v6543_v4  ;;  %v6538_v41 = vadd.f32 %v7217_v61, %v6537_v22  ;;  %v6559_v56 = vmul.f32 0.5, %v6543_v4 }
0x2bc6   :  { %v6571_v18 = vmul.f32 %v6565_v57, %v6543_v4  ;;  %v6564_v0 = vmul.f32 0.044715, %v6538_v41  ;;  %v6558_v33 = vmul.f32 0.5, %v6538_v41 }
0x2bc8   :  { %v6577_v58 = vmul.f32 %v6571_v18, %v6543_v4  ;;  %v6570_v10 = vmul.f32 %v6564_v0, %v6538_v41 }
0x2bc9   :  { %v8376_v39 = vpop.f32.mrf.mxu0 }
0x2bca   :  { %v6583_v24 = vadd.f32 %v6577_v58, %v6543_v4  ;;  %v6553_v25 = vadd.f32 %v8376_v39, %v7217_v61  ;;  %v6576_v26 = vmul.f32 %v6570_v10, %v6538_v41 }
0x2bcb   :  { %v6547_v27 = vpop.f32.mrf.mxu0 }
0x2bcc   :  { %v6567_v32 = vmul.f32 0.044715, %v6553_v25  ;;  %v6548_v34 = vadd.f32 %v7217_v61, %v6547_v27  ;;  %v6582_v37 = vadd.f32 %v6576_v26, %v6538_v41  ;;  %v6589_v40 = vmul.f32 0.7978846, %v6583_v24 }
0x2bcd   :  { %v6561_v62 = vmul.f32 0.5, %v6553_v25 }
0x2bce   :  { %v6573_v47 = vmul.f32 %v6567_v32, %v6553_v25  ;;  %v6566_v6 = vmul.f32 0.044715, %v6548_v34  ;;  %v6588_v50 = vmul.f32 0.7978846, %v6582_v37  ;;  %8712 = vtanh.f32 %v6589_v40 }
0x2bcf   :  { %v6560_v17 = vmul.f32 0.5, %v6548_v34 }
0x2bd0   :  { %v6579_v30 = vmul.f32 %v6573_v47, %v6553_v25  ;;  %v6572_v21 = vmul.f32 %v6566_v6, %v6548_v34  ;;  %8714 = vtanh.f32 %v6588_v50 }
0x2bd2   :  { %v6585_v55 = vadd.f32 %v6579_v30, %v6553_v25  ;;  %v6578_v53 = vmul.f32 %v6572_v21, %v6548_v34  ;;  %v6836_v30 = vld [vmem:[%s10600_s13 + $0x18] sm:$0xff]  ;;  %v6835_v21 = vld [vmem:[%s10600_s13 + $0x10] sm:$0xff] }
0x2bd3   :  { %8418 = vmatprep.subr.mxu0 %v6836_v30 }
0x2bd4   :  { %v6584_v43 = vadd.f32 %v6578_v53, %v6548_v34  ;;  %v6591_v31 = vmul.f32 0.7978846, %v6585_v55  ;;  %8419 = vmatpush3.msra.mxu0 %v6836_v30  ;;  %v6834_v55 = vld [vmem:[%s10600_s13 + $0x8] sm:$0xff]  ;;  %v6833_v53 = vld [vmem:[%s10600_s13] sm:$0xff] }
0x2bd5   :  { %8420 = vmatprep.subr.mxu0 %v6835_v21 }
0x2bd6   :  { %v6590_v59 = vmul.f32 0.7978846, %v6584_v43  ;;  %8716 = vtanh.f32 %v6591_v31  ;;  %8421 = vmatpush3.msra.mxu0 %v6835_v21 }
0x2bd7   :  { %8422 = vmatprep.subr.mxu0 %v6834_v55 }
0x2bd8   :  { %8718 = vtanh.f32 %v6590_v59  ;;  %8423 = vmatpush3.msra.mxu0 %v6834_v55 }
0x2bd9   :  { %8424 = vmatprep.subr.mxu0 %v6833_v53 }
0x2bda   :  { %8425 = vmatpush3.msra.mxu0 %v6833_v53 }
0x2bdb   :  { %v8713_v46 = vpop.eup %8712 }
0x2bdc   :  { %v6601_v2 = vadd.f32 1.0, %v8713_v46 }
0x2bdd   :  { %v8715_v51 = vpop.eup %8714 }
0x2bde   :  { %v6600_v35 = vadd.f32 1.0, %v8715_v51  ;;  %v6607_v61 = vmul.f32 %v6601_v2, %v6559_v56 }
0x2be0   :  { %v6606_v29 = vmul.f32 %v6600_v35, %v6558_v33 }
0x2be2   :  { %8412 = vmatprep.mubr.f32.mxu1 %v6606_v29 }
0x2be3   :  { %v8717_v9 = vpop.eup %8716  ;;  %8413 = vmatmul.mubr.f32.gmra.mxu1 %v6607_v61 }
0x2be4   :  { %v6603_v52 = vadd.f32 1.0, %v8717_v9 }
0x2be5   :  { %v8719_v13 = vpop.eup %8718 }
0x2be6   :  { %v6602_v63 = vadd.f32 1.0, %v8719_v13  ;;  %v6609_v49 = vmul.f32 %v6603_v52, %v6561_v62 }
0x2be8   :  { %v6608_v12 = vmul.f32 %v6602_v63, %v6560_v17 }
0x2bea   :  { %8415 = vmatprep.mubr.f32.mxu1 %v6608_v12 }
0x2beb   :  { %8416 = vmatmul.mubr.f32.gmra.mxu1 %v6609_v49 }
0x2c1e   :  { %v8411_v3 = vpop.f32.mrf.mxu1 }
0x2c1f   :  { %v6688_v48 = vadd.f32 %v8411_v3, %v7224_v23 }
0x2c20   :  { %v6682_v36 = vpop.f32.mrf.mxu1 }
0x2c21   :  { %v6712_v45 = vadd.f32 %v6688_v48, %v10381_v20  ;;  %v6683_v1 = vadd.f32 %v7224_v23, %v6682_v36 }
0x2c23   :  { %6718 = vst.msk [vmem:[#allocation2 + $0x8] sm:$0xff] %vm171_vm1, %v6712_v45  ;;  %v6711_v7 = vadd.f32 %v6683_v1, %v10377_v44 }
0x2c25   :  { %6717 = vst.msk [vmem:[#allocation2] sm:$0xff] %vm171_vm1, %v6711_v7 }
0x2c2a   :  { %v6724_v8 = vld [vmem:[#allocation2 + $0x8] sm:$0xff] }
0x2c2b   :  { %v6732_v11 = vsel %vm171_vm1, %v6724_v8, 0.0 }
0x2c2c   :  { %6733 = vadd.xlane.f32.xlu1 %v6732_v11  ;;  %v6723_v14 = vld [vmem:[#allocation2] sm:$0xff] }
0x2c2d   :  { %v6729_v19 = vsel %vm171_vm1, %v6723_v14, 0.0  ;;  %v7225_v11 = vld [vmem:[%s10598_s11] ss:$0 sm:$0xff] }
0x2c2e   :  { %6730 = vadd.xlane.f32.xlu0 %v6729_v19 }
0x2ca3   :  { %v8414_v54 = vpop.f32.mrf.mxu1 }
0x2ca4   :  { %v6698_v15 = vadd.f32 %v8414_v54, %v7224_v23 }
0x2ca5   :  { %v6692_v16 = vpop.f32.mrf.mxu1 }
0x2ca6   :  { %v6714_v20 = vadd.f32 %v6698_v15, %v10406_v28  ;;  %v6693_v38 = vadd.f32 %v7224_v23, %v6692_v16 }
0x2ca8   :  { %6720 = vst.msk [vmem:[#allocation2 + $0x18] sm:$0xff] %vm171_vm1, %v6714_v20  ;;  %v6713_v44 = vadd.f32 %v6693_v38, %v10385_v5  ;;  %v7226_v20 = vld [vmem:[%s10599_s12] ss:$0 sm:$0xff] }
0x2caa   :  { %6719 = vst.msk [vmem:[#allocation2 + $0x10] sm:$0xff] %vm171_vm1, %v6713_v44 }
0x2cab   :  { %v8417_v4 = vpop.f32.mrf.mxu1 }
0x2cac   :  { %v6708_v22 = vadd.f32 %v8417_v4, %v7224_v23 }
0x2cad   :  { %v6702_v57 = vpop.f32.mrf.mxu1 }
0x2cae   :  { %v6716_v41 = vadd.f32 %v6708_v22, %v10426_v42  ;;  %v6703_v18 = vadd.f32 %v7224_v23, %v6702_v57 }
0x2caf   :  { %v6726_v0 = vld [vmem:[#allocation2 + $0x18] sm:$0xff] }
0x2cb0   :  { %6722 = vst.msk [vmem:[#allocation2 + $0x28] sm:$0xff] %vm171_vm1, %v6716_v41  ;;  %v6715_v58 = vadd.f32 %v6703_v18, %v10414_v60  ;;  %v6738_v28 = vsel %vm171_vm1, %v6726_v0, 0.0 }
0x2cb1   :  { %6739 = vadd.xlane.f32.xlu1 %v6738_v28  ;;  %v6725_v10 = vld [vmem:[#allocation2 + $0x10] sm:$0xff] }
0x2cb2   :  { %6721 = vst.msk [vmem:[#allocation2 + $0x20] sm:$0xff] %vm171_vm1, %v6715_v58  ;;  %v6735_v5 = vsel %vm171_vm1, %v6725_v10, 0.0 }
0x2cb3   :  { %6736 = vadd.xlane.f32.xlu0 %v6735_v5 }
0x2cb5   :  { %v6734_v39 = vpop.xlane.xlu1 %6733 }
0x2cb6   :  { %v6748_v24 = vmul.f32 0.03125, %v6734_v39 }
0x2cb7   :  { %v6731_v25 = vpop.xlane.xlu0 %6730  ;;  %v6728_v26 = vld [vmem:[#allocation2 + $0x28] sm:$0xff] }
0x2cb8   :  { %v6754_v42 = vsub.f32 %v6724_v8, %v6748_v24  ;;  %v6747_v27 = vmul.f32 0.03125, %v6731_v25  ;;  %v6744_v32 = vsel %vm171_vm1, %v6728_v26, 0.0 }
0x2cb9   :  { %6745 = vadd.xlane.f32.xlu1 %v6744_v32  ;;  %v6727_v34 = vld [vmem:[#allocation2 + $0x20] sm:$0xff] }
0x2cba   :  { %v6753_v60 = vsub.f32 %v6723_v14, %v6747_v27  ;;  %v6741_v37 = vsel %vm171_vm1, %v6727_v34, 0.0  ;;  %v6760_v40 = vmul.f32 %v6754_v42, %v6754_v42 }
0x2cbb   :  { %6742 = vadd.xlane.f32.xlu0 %v6741_v37 }
0x2cbc   :  { %v6768_v47 = vsel %vm171_vm1, %v6760_v40, 0.0  ;;  %v6759_v6 = vmul.f32 %v6753_v60, %v6753_v60 }
0x2cbd   :  { %6769 = vadd.xlane.f32.xlu1 %v6768_v47 }
0x2cbe   :  { %v6765_v50 = vsel %vm171_vm1, %v6759_v6, 0.0 }
0x2cbf   :  { %6766 = vadd.xlane.f32.xlu0 %v6765_v50 }
0x2d3a   :  { %v6740_v43 = vpop.xlane.xlu1 %6739 }
0x2d3b   :  { %v6750_v31 = vmul.f32 0.03125, %v6740_v43 }
0x2d3c   :  { %v6737_v59 = vpop.xlane.xlu0 %6736 }
0x2d3d   :  { %v6756_v46 = vsub.f32 %v6726_v0, %v6750_v31  ;;  %v6749_v51 = vmul.f32 0.03125, %v6737_v59  ;;  %v7227_v31 = vld [vmem:[%s10601_s14] ss:$0 sm:$0xff] }
0x2d3f   :  { %v6755_v2 = vsub.f32 %v6725_v10, %v6749_v51  ;;  %v6762_v33 = vmul.f32 %v6756_v46, %v6756_v46 }
0x2d41   :  { %v6774_v35 = vsel %vm171_vm1, %v6762_v33, 0.0  ;;  %v6761_v56 = vmul.f32 %v6755_v2, %v6755_v2 }
0x2d42   :  { %6775 = vadd.xlane.f32.xlu1 %v6774_v35  ;;  %v6746_v29 = vpop.xlane.xlu1 %6745 }
0x2d43   :  { %v6752_v61 = vmul.f32 0.03125, %v6746_v29  ;;  %v6771_v9 = vsel %vm171_vm1, %v6761_v56, 0.0 }
0x2d44   :  { %6772 = vadd.xlane.f32.xlu0 %v6771_v9  ;;  %v6743_v13 = vpop.xlane.xlu0 %6742 }
0x2d45   :  { %v6758_v52 = vsub.f32 %v6728_v26, %v6752_v61  ;;  %v6751_v17 = vmul.f32 0.03125, %v6743_v13 }
0x2d46   :  { %v6770_v63 = vpop.xlane.xlu1 %6769 }
0x2d47   :  { %v6757_v62 = vsub.f32 %v6727_v34, %v6751_v17  ;;  %v6784_v12 = vmul.f32 0.03125, %v6770_v63  ;;  %v6764_v49 = vmul.f32 %v6758_v52, %v6758_v52 }
0x2d48   :  { %v6767_v23 = vpop.xlane.xlu0 %6766 }
0x2d49   :  { %v6790_v3 = vadd.f32 1e-05, %v6784_v12  ;;  %v6783_v48 = vmul.f32 0.03125, %v6767_v23  ;;  %v6780_v36 = vsel %vm171_vm1, %v6764_v49, 0.0  ;;  %v6763_v45 = vmul.f32 %v6757_v62, %v6757_v62 }
0x2d4a   :  { %6781 = vadd.xlane.f32.xlu1 %v6780_v36 }
0x2d4b   :  { %8720 = vrsqrt.f32 %v6790_v3  ;;  %v6789_v1 = vadd.f32 1e-05, %v6783_v48  ;;  %v6777_v7 = vsel %vm171_vm1, %v6763_v45, 0.0 }
0x2d4c   :  { %6778 = vadd.xlane.f32.xlu0 %v6777_v7 }
0x2d4d   :  { %8722 = vrsqrt.f32 %v6789_v1 }
0x2d58   :  { %v8721_v8 = vpop.eup %8720 }
0x2d59   :  { %v6802_v14 = vmul.f32 %v8721_v8, %v6754_v42 }
0x2d5a   :  { %v8723_v19 = vpop.eup %8722 }
0x2d5b   :  { %v6801_v54 = vmul.f32 %v8723_v19, %v6753_v60  ;;  %v6815_v15 = vmul.f32 %v7225_v11, %v6802_v14 }
0x2d5d   :  { %v6814_v16 = vmul.f32 %v7225_v11, %v6801_v54  ;;  %v6828_v44 = vadd.f32 %v7226_v20, %v6815_v15 }
0x2d5f   :  { %v6827_v38 = vadd.f32 %v7226_v20, %v6814_v16 }
0x2d61   :  { %8426 = vmatprep.mubr.msk.f32.mxu0 %vm171_vm1, %v6827_v38 }
0x2d62   :  { %8427 = vmatmul.mubr.msk.f32.vlgmr.msra.gmra.mxu0 %vm171_vm1, %v6828_v44 }
0x2dcb   :  { %v6776_v4 = vpop.xlane.xlu1 %6775 }
0x2dcc   :  { %v6786_v22 = vmul.f32 0.03125, %v6776_v4 }
0x2dcd   :  { %v6773_v57 = vpop.xlane.xlu0 %6772 }
0x2dce   :  { %v6792_v41 = vadd.f32 1e-05, %v6786_v22  ;;  %v6785_v18 = vmul.f32 0.03125, %v6773_v57 }
0x2dd0   :  { %8724 = vrsqrt.f32 %v6792_v41  ;;  %v6791_v0 = vadd.f32 1e-05, %v6785_v18 }
0x2dd2   :  { %8726 = vrsqrt.f32 %v6791_v0 }
0x2dd3   :  { %v6782_v58 = vpop.xlane.xlu1 %6781 }
0x2dd4   :  { %v6788_v28 = vmul.f32 0.03125, %v6782_v58 }
0x2dd5   :  { %v6779_v10 = vpop.xlane.xlu0 %6778 }
0x2dd6   :  { %v6794_v5 = vadd.f32 1e-05, %v6788_v28  ;;  %v6787_v39 = vmul.f32 0.03125, %v6779_v10 }
0x2dd8   :  { %8728 = vrsqrt.f32 %v6794_v5  ;;  %v6793_v24 = vadd.f32 1e-05, %v6787_v39 }
0x2dda   :  { %8730 = vrsqrt.f32 %v6793_v24 }
0x2ddd   :  { %v8725_v25 = vpop.eup %8724 }
0x2dde   :  { %v6804_v26 = vmul.f32 %v8725_v25, %v6756_v46 }
0x2ddf   :  { %v8727_v42 = vpop.eup %8726 }
0x2de0   :  { %v6803_v27 = vmul.f32 %v8727_v42, %v6755_v2  ;;  %v6817_v32 = vmul.f32 %v7225_v11, %v6804_v26 }
0x2de2   :  { %v6816_v34 = vmul.f32 %v7225_v11, %v6803_v27  ;;  %v6830_v40 = vadd.f32 %v7226_v20, %v6817_v32 }
0x2de4   :  { %v6829_v60 = vadd.f32 %v7226_v20, %v6816_v34 }
0x2de5   :  { %v8729_v37 = vpop.eup %8728 }
0x2de6   :  { %v6806_v47 = vmul.f32 %v8729_v37, %v6758_v52  ;;  %8429 = vmatprep.mubr.msk.f32.mxu0 %vm171_vm1, %v6829_v60 }
0x2de7   :  { %v8731_v6 = vpop.eup %8730  ;;  %8430 = vmatmul.mubr.msk.f32.gmra.mxu0 %vm171_vm1, %v6830_v40 }
0x2de8   :  { %v6805_v50 = vmul.f32 %v8731_v6, %v6757_v62  ;;  %v6819_v30 = vmul.f32 %v7225_v11, %v6806_v47 }
0x2dea   :  { %v6818_v21 = vmul.f32 %v7225_v11, %v6805_v50  ;;  %v6832_v53 = vadd.f32 %v7226_v20, %v6819_v30 }
0x2dec   :  { %v6831_v55 = vadd.f32 %v7226_v20, %v6818_v21 }
0x2dee   :  { %8432 = vmatprep.mubr.msk.f32.mxu0 %vm171_vm1, %v6831_v55 }
0x2def   :  { %8433 = vmatmul.mubr.msk.f32.gmra.mxu0 %vm171_vm1, %v6832_v53 }
0x2e22   :  { %v8428_v43 = vpop.f32.mrf.mxu0 }
0x2e24   :  { %v6928_v59 = vpop.f32.mrf.mxu0 }
0x2e25   :  { %v6929_v46 = vadd.f32 %v7227_v31, %v6928_v59 }
0x2e27   :  { %6954 = vst.msk [vmem:[#allocation3] sm:$0x1] %vm6953_vm8, %v6929_v46 }
0x2ea7   :  { %v8431_v51 = vpop.f32.mrf.mxu0 }
0x2ea8   :  { %v6942_v2 = vadd.f32 %v8431_v51, %v7227_v31 }
0x2ea9   :  { %v6937_v33 = vpop.f32.mrf.mxu0 }
0x2eaa   :  { %6955 = vst.msk [vmem:[#allocation3 + $0x1] sm:$0x1] %vm6953_vm8, %v6942_v2 }
0x2eab   :  { %8755 = shalt.err (!%p8752_p4)
}
0x2eac   :  { %6965 = dma.vmem_to_hbm [thread:$0]  %s6963_s2, 32, %s10602_s15, [#allocation4]  }
0x2eaf   :  { %v8434_v35 = vpop.f32.mrf.mxu0 }
0x2eb1   :  { %v6946_v56 = vpop.f32.mrf.mxu0 }
0x2eb2   :  { %8764 = dma.done.wait [#allocation4], 32  }
0x2eb3   :  { %8765 = vsyncadd [#allocation4], 4294967264 }
0x2eb4   :  { %6969 = vsyncpa [#allocation4], 1 }

</bundles_post_ra>
